<compile_context>
chip_gen: v6e
topology: v6e:2x2x1
jax: 0.10.0
libtpu: 0.0.40
codegen_flags: <defaults>
</compile_context>

<pallas_src>
import jax
import jax.numpy as jnp
from jax import lax
from jax.experimental import pallas as pl
from jax.experimental.pallas import tpu as pltpu


def _round_up(x: int, m: int) -> int:
    return ((x + m - 1) // m) * m


def _make_lstm_kernel(n_layers: int, T: int, Bp: int, Hp: int, chunks):
    """Kernel body for static layer count / seq len / padded dims.

    chunks: static tuple of (t_start, t_size) covering [0, T).
    """

    def kernel(*refs):
        # refs = [x_ref, (w_ih, w_hh, b) * n_layers, w_lin, b_lin, out_ref,
        #         xproj_scratch, seq_scratch]
        x_ref = refs[0]
        layer_refs = refs[1:1 + 3 * n_layers]
        w_lin_ref = refs[1 + 3 * n_layers]
        b_lin_ref = refs[2 + 3 * n_layers]
        out_ref = refs[3 + 3 * n_layers]
        xproj_ref, seq_ref = refs[4 + 3 * n_layers:]

        h = jnp.zeros((Bp, Hp), jnp.float32)  # final value feeds the Linear head

        for l in range(n_layers):  # static Python loop over layers
            w_ih_ref = layer_refs[3 * l]      # (in_p, 4Hp)
            w_hh_ref = layer_refs[3 * l + 1]  # (Hp, 4Hp)
            b_ref = layer_refs[3 * l + 2]     # (1, 4Hp)  == b_ih + b_hh (padded)

            x_src = x_ref if l == 0 else seq_ref  # (T*Bp, in_p)
            last_layer = (l == n_layers - 1)

            # Zero initial hidden/cell state per layer (PyTorch default),
            # carried through the recurrence in vregs (not VMEM).
            h = jnp.zeros((Bp, Hp), jnp.float32)
            c = jnp.zeros((Bp, Hp), jnp.float32)

            for (t0, tc) in chunks:  # static chunk loop over time
                row0 = t0 * Bp

                # Batched input projection for this chunk of timesteps: one big
                # MXU matmul, bias folded in, so the recurrent body never
                # touches x or the bias.
                xproj_ref[pl.ds(0, tc * Bp), :] = (
                    jnp.dot(x_src[pl.ds(row0, tc * Bp), :], w_ih_ref[...],
                            preferred_element_type=jnp.float32)
                    + b_ref[...]
                )  # (tc*Bp, 4Hp)

                def step(t, carry, w_hh_ref=w_hh_ref, row0=row0,
                         last_layer=last_layer):
                    h, c = carry
                    loc = pl.multiple_of(t * Bp, Bp)
                    # Recurrent matmul only; x-projection precomputed above.
                    gates = (
                        jnp.dot(h, w_hh_ref[...],
                                preferred_element_type=jnp.float32)
                        + xproj_ref[pl.ds(loc, Bp), :]
                    )  # (Bp, 4Hp) — gate blocks are 128-lane aligned
                    i_g = jax.nn.sigmoid(gates[:, 0 * Hp:1 * Hp])
                    f_g = jax.nn.sigmoid(gates[:, 1 * Hp:2 * Hp])
                    g_g = jnp.tanh(gates[:, 2 * Hp:3 * Hp])
                    o_g = jax.nn.sigmoid(gates[:, 3 * Hp:4 * Hp])
                    c_new = f_g * c + i_g * g_g
                    h_new = o_g * jnp.tanh(c_new)
                    if not last_layer:
                        # Only lower layers need their full output sequence.
                        glob = pl.multiple_of(row0 + t * Bp, Bp)
                        seq_ref[pl.ds(glob, Bp), :] = h_new
                    return (h_new, c_new)

                unroll = True if tc <= 16 else 8
                h, c = lax.fori_loop(0, tc, step, (h, c), unroll=unroll)

        # Linear head on the last timestep's hidden state of the top layer.
        out_ref[...] = (
            jnp.dot(h, w_lin_ref[...], preferred_element_type=jnp.float32)
            + b_lin_ref[...]
        )  # (Bp, 128) lane-dense slab; column 0 holds the real output

    return kernel


def lstm_predictor_forward(x, params, n_hidden: int):
    """Pallas forward pass.  x: (B, T, F) float32.  Returns (B, 1) float32."""
    B, T, F = x.shape
    H = n_hidden
    n_layers = len(params["layers"])

    Bp = _round_up(max(B, 8), 8)       # sublane-align batch
    Hp = _round_up(max(H, 128), 128)   # lane-align hidden
    Fp = _round_up(max(F, 128), 128)   # lane-align features

    # Time-major, zero-padded, flattened to (T*Bp, Fp).
    x_tm = jnp.transpose(x, (1, 0, 2)).astype(jnp.float32)            # (T, B, F)
    x_p = jnp.zeros((T, Bp, Fp), jnp.float32).at[:, :B, :F].set(x_tm)
    x_flat = x_p.reshape(T * Bp, Fp)

    def pack_gate_weight(w, in_dim, in_p):
        # w: (4H, in_dim) PyTorch layout -> (in_p, 4*Hp); each gate block at a
        # 128-aligned column offset, zero padding elsewhere.
        wt = jnp.transpose(w).astype(jnp.float32)                     # (in_dim, 4H)
        out = jnp.zeros((in_p, 4 * Hp), jnp.float32)
        for k in range(4):
            out = out.at[:in_dim, k * Hp:k * Hp + H].set(wt[:, k * H:(k + 1) * H])
        return out

    def pack_gate_bias(b):
        out = jnp.zeros((1, 4 * Hp), jnp.float32)
        for k in range(4):
            out = out.at[0, k * Hp:k * Hp + H].set(b[k * H:(k + 1) * H])
        return out

    kernel_inputs = [x_flat]
    for l, (w_ih, w_hh, b_ih, b_hh) in enumerate(params["layers"]):
        in_dim = F if l == 0 else H
        in_p = Fp if l == 0 else Hp
        kernel_inputs.append(pack_gate_weight(w_ih, in_dim, in_p))           # (in_p, 4Hp)
        kernel_inputs.append(pack_gate_weight(w_hh, H, Hp))                  # (Hp, 4Hp)
        kernel_inputs.append(pack_gate_bias((b_ih + b_hh).astype(jnp.float32)))

    w_lin_p = jnp.zeros((Hp, 128), jnp.float32).at[:H, 0].set(
        params["w_lin"].astype(jnp.float32)[0])
    b_lin_p = jnp.zeros((1, 128), jnp.float32).at[0, 0].set(
        params["b_lin"].astype(jnp.float32)[0])
    kernel_inputs += [w_lin_p, b_lin_p]

    # T-chunk the hoisted input projection so the xproj scratch stays ~<=4 MiB
    # regardless of T (instead of growing as (T*Bp, 4Hp)).
    bytes_per_t = Bp * 4 * Hp * 4
    t_chunk = max(1, min(T, (4 << 20) // bytes_per_t))
    chunks = tuple((s, min(t_chunk, T - s)) for s in range(0, T, t_chunk))

    seq_rows = T * Bp if n_layers > 1 else 8  # top layer never stores its sequence

    scratch_shapes = [
        pltpu.VMEM((t_chunk * Bp, 4 * Hp), jnp.float32),  # chunk of x @ W_ih + b
        pltpu.VMEM((seq_rows, Hp), jnp.float32),          # lower-layer output sequence
    ]

    # Explicit scoped-VMEM budget (inputs + output + scratch, with margin).
    def nbytes(shape):
        n = 1
        for s in shape:
            n *= s
        return 4 * n
    total = sum(nbytes(a.shape) for a in kernel_inputs)
    total += nbytes((Bp, 128))
    total += nbytes((t_chunk * Bp, 4 * Hp)) + nbytes((seq_rows, Hp))
    vmem_limit = int(min(128 << 20, max(32 << 20, 2 * total)))

    vmem = pl.BlockSpec(memory_space=pltpu.MemorySpace.VMEM)

    out_p = pl.pallas_call(
        _make_lstm_kernel(n_layers, T, Bp, Hp, chunks),
        out_shape=jax.ShapeDtypeStruct((Bp, 128), jnp.float32),
        in_specs=[vmem] * len(kernel_inputs),
        out_specs=vmem,
        scratch_shapes=scratch_shapes,
        compiler_params=pltpu.CompilerParams(vmem_limit_bytes=vmem_limit),
    )(*kernel_inputs)

    return out_p[:B, :1]


def init_params(key, n_features: int, n_hidden: int, n_layers: int):
    """Deterministic init matching PyTorch nn.LSTM / nn.Linear parameter shapes."""
    k = 1.0 / jnp.sqrt(jnp.float32(n_hidden))
    layers = []
    for l in range(n_layers):
        in_dim = n_features if l == 0 else n_hidden
        key, k1, k2, k3, k4 = jax.random.split(key, 5)
        w_ih = jax.random.uniform(k1, (4 * n_hidden, in_dim), jnp.float32, -k, k)
        w_hh = jax.random.uniform(k2, (4 * n_hidden, n_hidden), jnp.float32, -k, k)
        b_ih = jax.random.uniform(k3, (4 * n_hidden,), jnp.float32, -k, k)
        b_hh = jax.random.uniform(k4, (4 * n_hidden,), jnp.float32, -k, k)
        layers.append((w_ih, w_hh, b_ih, b_hh))
    key, k5, k6 = jax.random.split(key, 3)
    kl = 1.0 / jnp.sqrt(jnp.float32(n_hidden))
    w_lin = jax.random.uniform(k5, (1, n_hidden), jnp.float32, -kl, kl)
    b_lin = jax.random.uniform(k6, (1,), jnp.float32, -kl, kl)
    return {"layers": layers, "w_lin": w_lin, "b_lin": b_lin}


def reference_forward(x, params, n_hidden: int):
    """Pure-JAX reference mirroring torch.nn.LSTM (batch_first) + Linear."""
    B, T, F = x.shape
    H = n_hidden
    seq = x
    for (w_ih, w_hh, b_ih, b_hh) in params["layers"]:
        h = jnp.zeros((B, H), jnp.float32)
        c = jnp.zeros((B, H), jnp.float32)
        outs = []
        for t in range(T):
            gates = seq[:, t, :] @ w_ih.T + h @ w_hh.T + b_ih + b_hh
            i_g = jax.nn.sigmoid(gates[:, 0:H])
            f_g = jax.nn.sigmoid(gates[:, H:2 * H])
            g_g = jnp.tanh(gates[:, 2 * H:3 * H])
            o_g = jax.nn.sigmoid(gates[:, 3 * H:4 * H])
            c = f_g * c + i_g * g_g
            h = o_g * jnp.tanh(c)
            outs.append(h)
        seq = jnp.stack(outs, axis=1)
    return seq[:, -1, :] @ params["w_lin"].T + params["b_lin"]


if __name__ == "__main__":
    B, T, F, H, L = 2, 8, 4, 32, 2  # batch, seq len, n_features, n_hidden, n_layers

    key = jax.random.PRNGKey(0)
    key, xkey = jax.random.split(key)
    x = jax.random.normal(xkey, (B, T, F), jnp.float32)
    params = init_params(key, F, H, L)

    out = lstm_predictor_forward(x, params, H)
    out = jax.block_until_ready(out)

    ref = reference_forward(x, params, H)
    assert out.shape == (B, 1)
    assert jnp.allclose(out, ref, rtol=1e-3, atol=1e-3), (out, ref)

    print("KERNEL_OK")
</pallas_src>

<mosaic_0001>
module attributes {stable_mosaic.version = 11 : i64} {
  func.func @kernel(%arg0: memref<64x128xf32, #tpu.memory_space<vmem>>, %arg1: memref<128x512xf32, #tpu.memory_space<vmem>>, %arg2: memref<128x512xf32, #tpu.memory_space<vmem>>, %arg3: memref<1x512xf32, #tpu.memory_space<vmem>>, %arg4: memref<128x512xf32, #tpu.memory_space<vmem>>, %arg5: memref<128x512xf32, #tpu.memory_space<vmem>>, %arg6: memref<1x512xf32, #tpu.memory_space<vmem>>, %arg7: memref<128x128xf32, #tpu.memory_space<vmem>>, %arg8: memref<1x128xf32, #tpu.memory_space<vmem>>, %arg9: memref<8x128xf32, #tpu.memory_space<vmem>>, %arg10: memref<64x512xf32, #tpu.memory_space<vmem>>, %arg11: memref<64x128xf32, #tpu.memory_space<vmem>>) attributes {dimension_semantics = [], scalar_prefetch = 0 : i64, scratch_operands = 2 : i64, tpu.core_type = #tpu.core_type<tc>} {
    %cst = arith.constant 0.000000e+00 : f32
    %0 = vector.broadcast %cst : f32 to vector<8x128xf32>
    %cst_0 = arith.constant 0.000000e+00 : f32
    %1 = vector.broadcast %cst_0 : f32 to vector<8x128xf32>
    %c0 = arith.constant 0 : index
    %c0_1 = arith.constant 0 : index
    %2 = vector.load %arg0[%c0, %c0_1] : memref<64x128xf32, #tpu.memory_space<vmem>>, vector<64x128xf32>
    %c0_2 = arith.constant 0 : index
    %c0_3 = arith.constant 0 : index
    %3 = vector.load %arg1[%c0_2, %c0_3] : memref<128x512xf32, #tpu.memory_space<vmem>>, vector<128x512xf32>
    %cst_4 = arith.constant dense<0.000000e+00> : vector<64x512xf32>
    %4 = tpu.matmul %2, %3, %cst_4 {dimension_numbers = #tpu.dot_dimension_numbers<[1], [0], [0], [1], [0, 0, 1, 1], [], []>} : vector<64x128xf32>, vector<128x512xf32>, vector<64x512xf32> -> vector<64x512xf32>
    %c0_5 = arith.constant 0 : index
    %c0_6 = arith.constant 0 : index
    %5 = vector.load %arg3[%c0_5, %c0_6] : memref<1x512xf32, #tpu.memory_space<vmem>>, vector<1x512xf32>
    %6 = vector.broadcast %5 : vector<1x512xf32> to vector<64x512xf32>
    %7 = arith.addf %4, %6 : vector<64x512xf32>
    %c0_7 = arith.constant 0 : index
    %c0_8 = arith.constant 0 : index
    %8 = vector.load %arg10[%c0_7, %c0_8] : memref<64x512xf32, #tpu.memory_space<vmem>>, vector<64x512xf32>
    tpu.vector_store %arg10[%c0_7, %c0_8], %7 {strides = array<i32>} : memref<64x512xf32, #tpu.memory_space<vmem>>, vector<64x512xf32>,
    %c0_i32 = arith.constant 0 : i32
    %c8_i32 = arith.constant 8 : i32
    %9 = arith.muli %c0_i32, %c8_i32 : i32
    %10 = tpu.assume_multiple %9, 8 : i32
    %c0_9 = arith.constant 0 : index
    %c0_10 = arith.constant 0 : index
    %11 = vector.load %arg2[%c0_9, %c0_10] : memref<128x512xf32, #tpu.memory_space<vmem>>, vector<128x512xf32>
    %cst_11 = arith.constant dense<0.000000e+00> : vector<8x512xf32>
    %12 = tpu.matmul %0, %11, %cst_11 {dimension_numbers = #tpu.dot_dimension_numbers<[1], [0], [0], [1], [0, 0, 1, 1], [], []>} : vector<8x128xf32>, vector<128x512xf32>, vector<8x512xf32> -> vector<8x512xf32>
    %13 = arith.index_cast %10 : i32 to index
    %c0_12 = arith.constant 0 : index
    %14 = vector.load %arg10[%13, %c0_12] : memref<64x512xf32, #tpu.memory_space<vmem>>, vector<8x512xf32>
    %15 = arith.addf %12, %14 : vector<8x512xf32>
    %16 = vector.extract_strided_slice %15 {offsets = [0, 0], sizes = [8, 128], strides = [1, 1]} : vector<8x512xf32> to vector<8x128xf32>
    %17 = arith.negf %16 : vector<8x128xf32>
    %18 = math.exp %17 : vector<8x128xf32>
    %cst_13 = arith.constant 1.000000e+00 : f32
    %19 = vector.broadcast %cst_13 : f32 to vector<8x128xf32>
    %20 = arith.addf %19, %18 : vector<8x128xf32>
    %21 = arith.divf %19, %20 : vector<8x128xf32>
    %22 = vector.extract_strided_slice %15 {offsets = [0, 128], sizes = [8, 128], strides = [1, 1]} : vector<8x512xf32> to vector<8x128xf32>
    %23 = arith.negf %22 : vector<8x128xf32>
    %24 = math.exp %23 : vector<8x128xf32>
    %cst_14 = arith.constant 1.000000e+00 : f32
    %25 = vector.broadcast %cst_14 : f32 to vector<8x128xf32>
    %26 = arith.addf %25, %24 : vector<8x128xf32>
    %27 = arith.divf %25, %26 : vector<8x128xf32>
    %28 = vector.extract_strided_slice %15 {offsets = [0, 256], sizes = [8, 128], strides = [1, 1]} : vector<8x512xf32> to vector<8x128xf32>
    %29 = math.tanh %28 : vector<8x128xf32>
    %30 = vector.extract_strided_slice %15 {offsets = [0, 384], sizes = [8, 128], strides = [1, 1]} : vector<8x512xf32> to vector<8x128xf32>
    %31 = arith.negf %30 : vector<8x128xf32>
    %32 = math.exp %31 : vector<8x128xf32>
    %cst_15 = arith.constant 1.000000e+00 : f32
    %33 = vector.broadcast %cst_15 : f32 to vector<8x128xf32>
    %34 = arith.addf %33, %32 : vector<8x128xf32>
    %35 = arith.divf %33, %34 : vector<8x128xf32>
    %36 = arith.mulf %27, %1 : vector<8x128xf32>
    %37 = arith.mulf %21, %29 : vector<8x128xf32>
    %38 = arith.addf %36, %37 : vector<8x128xf32>
    %39 = math.tanh %38 : vector<8x128xf32>
    %40 = arith.mulf %35, %39 : vector<8x128xf32>
    %c8_i32_16 = arith.constant 8 : i32
    %41 = arith.muli %c0_i32, %c8_i32_16 : i32
    %c0_i32_17 = arith.constant 0 : i32
    %42 = arith.addi %c0_i32_17, %41 : i32
    %43 = tpu.assume_multiple %42, 8 : i32
    %44 = arith.index_cast %43 : i32 to index
    %c0_18 = arith.constant 0 : index
    %45 = vector.load %arg11[%44, %c0_18] : memref<64x128xf32, #tpu.memory_space<vmem>>, vector<8x128xf32>
    tpu.vector_store %arg11[%44, %c0_18], %40 {strides = array<i32>} : memref<64x128xf32, #tpu.memory_space<vmem>>, vector<8x128xf32>,
    %c1_i32 = arith.constant 1 : i32
    %c8_i32_19 = arith.constant 8 : i32
    %46 = arith.muli %c1_i32, %c8_i32_19 : i32
    %47 = tpu.assume_multiple %46, 8 : i32
    %c0_20 = arith.constant 0 : index
    %c0_21 = arith.constant 0 : index
    %48 = vector.load %arg2[%c0_20, %c0_21] : memref<128x512xf32, #tpu.memory_space<vmem>>, vector<128x512xf32>
    %cst_22 = arith.constant dense<0.000000e+00> : vector<8x512xf32>
    %49 = tpu.matmul %40, %48, %cst_22 {dimension_numbers = #tpu.dot_dimension_numbers<[1], [0], [0], [1], [0, 0, 1, 1], [], []>} : vector<8x128xf32>, vector<128x512xf32>, vector<8x512xf32> -> vector<8x512xf32>
    %50 = arith.index_cast %47 : i32 to index
    %c0_23 = arith.constant 0 : index
    %51 = vector.load %arg10[%50, %c0_23] : memref<64x512xf32, #tpu.memory_space<vmem>>, vector<8x512xf32>
    %52 = arith.addf %49, %51 : vector<8x512xf32>
    %53 = vector.extract_strided_slice %52 {offsets = [0, 0], sizes = [8, 128], strides = [1, 1]} : vector<8x512xf32> to vector<8x128xf32>
    %54 = arith.negf %53 : vector<8x128xf32>
    %55 = math.exp %54 : vector<8x128xf32>
    %cst_24 = arith.constant 1.000000e+00 : f32
    %56 = vector.broadcast %cst_24 : f32 to vector<8x128xf32>
    %57 = arith.addf %56, %55 : vector<8x128xf32>
    %58 = arith.divf %56, %57 : vector<8x128xf32>
    %59 = vector.extract_strided_slice %52 {offsets = [0, 128], sizes = [8, 128], strides = [1, 1]} : vector<8x512xf32> to vector<8x128xf32>
    %60 = arith.negf %59 : vector<8x128xf32>
    %61 = math.exp %60 : vector<8x128xf32>
    %cst_25 = arith.constant 1.000000e+00 : f32
    %62 = vector.broadcast %cst_25 : f32 to vector<8x128xf32>
    %63 = arith.addf %62, %61 : vector<8x128xf32>
    %64 = arith.divf %62, %63 : vector<8x128xf32>
    %65 = vector.extract_strided_slice %52 {offsets = [0, 256], sizes = [8, 128], strides = [1, 1]} : vector<8x512xf32> to vector<8x128xf32>
    %66 = math.tanh %65 : vector<8x128xf32>
    %67 = vector.extract_strided_slice %52 {offsets = [0, 384], sizes = [8, 128], strides = [1, 1]} : vector<8x512xf32> to vector<8x128xf32>
    %68 = arith.negf %67 : vector<8x128xf32>
    %69 = math.exp %68 : vector<8x128xf32>
    %cst_26 = arith.constant 1.000000e+00 : f32
    %70 = vector.broadcast %cst_26 : f32 to vector<8x128xf32>
    %71 = arith.addf %70, %69 : vector<8x128xf32>
    %72 = arith.divf %70, %71 : vector<8x128xf32>
    %73 = arith.mulf %64, %38 : vector<8x128xf32>
    %74 = arith.mulf %58, %66 : vector<8x128xf32>
    %75 = arith.addf %73, %74 : vector<8x128xf32>
    %76 = math.tanh %75 : vector<8x128xf32>
    %77 = arith.mulf %72, %76 : vector<8x128xf32>
    %c8_i32_27 = arith.constant 8 : i32
    %78 = arith.muli %c1_i32, %c8_i32_27 : i32
    %c0_i32_28 = arith.constant 0 : i32
    %79 = arith.addi %c0_i32_28, %78 : i32
    %80 = tpu.assume_multiple %79, 8 : i32
    %81 = arith.index_cast %80 : i32 to index
    %c0_29 = arith.constant 0 : index
    %82 = vector.load %arg11[%81, %c0_29] : memref<64x128xf32, #tpu.memory_space<vmem>>, vector<8x128xf32>
    tpu.vector_store %arg11[%81, %c0_29], %77 {strides = array<i32>} : memref<64x128xf32, #tpu.memory_space<vmem>>, vector<8x128xf32>,
    %c2_i32 = arith.constant 2 : i32
    %c8_i32_30 = arith.constant 8 : i32
    %83 = arith.muli %c2_i32, %c8_i32_30 : i32
    %84 = tpu.assume_multiple %83, 8 : i32
    %c0_31 = arith.constant 0 : index
    %c0_32 = arith.constant 0 : index
    %85 = vector.load %arg2[%c0_31, %c0_32] : memref<128x512xf32, #tpu.memory_space<vmem>>, vector<128x512xf32>
    %cst_33 = arith.constant dense<0.000000e+00> : vector<8x512xf32>
    %86 = tpu.matmul %77, %85, %cst_33 {dimension_numbers = #tpu.dot_dimension_numbers<[1], [0], [0], [1], [0, 0, 1, 1], [], []>} : vector<8x128xf32>, vector<128x512xf32>, vector<8x512xf32> -> vector<8x512xf32>
    %87 = arith.index_cast %84 : i32 to index
    %c0_34 = arith.constant 0 : index
    %88 = vector.load %arg10[%87, %c0_34] : memref<64x512xf32, #tpu.memory_space<vmem>>, vector<8x512xf32>
    %89 = arith.addf %86, %88 : vector<8x512xf32>
    %90 = vector.extract_strided_slice %89 {offsets = [0, 0], sizes = [8, 128], strides = [1, 1]} : vector<8x512xf32> to vector<8x128xf32>
    %91 = arith.negf %90 : vector<8x128xf32>
    %92 = math.exp %91 : vector<8x128xf32>
    %cst_35 = arith.constant 1.000000e+00 : f32
    %93 = vector.broadcast %cst_35 : f32 to vector<8x128xf32>
    %94 = arith.addf %93, %92 : vector<8x128xf32>
    %95 = arith.divf %93, %94 : vector<8x128xf32>
    %96 = vector.extract_strided_slice %89 {offsets = [0, 128], sizes = [8, 128], strides = [1, 1]} : vector<8x512xf32> to vector<8x128xf32>
    %97 = arith.negf %96 : vector<8x128xf32>
    %98 = math.exp %97 : vector<8x128xf32>
    %cst_36 = arith.constant 1.000000e+00 : f32
    %99 = vector.broadcast %cst_36 : f32 to vector<8x128xf32>
    %100 = arith.addf %99, %98 : vector<8x128xf32>
    %101 = arith.divf %99, %100 : vector<8x128xf32>
    %102 = vector.extract_strided_slice %89 {offsets = [0, 256], sizes = [8, 128], strides = [1, 1]} : vector<8x512xf32> to vector<8x128xf32>
    %103 = math.tanh %102 : vector<8x128xf32>
    %104 = vector.extract_strided_slice %89 {offsets = [0, 384], sizes = [8, 128], strides = [1, 1]} : vector<8x512xf32> to vector<8x128xf32>
    %105 = arith.negf %104 : vector<8x128xf32>
    %106 = math.exp %105 : vector<8x128xf32>
    %cst_37 = arith.constant 1.000000e+00 : f32
    %107 = vector.broadcast %cst_37 : f32 to vector<8x128xf32>
    %108 = arith.addf %107, %106 : vector<8x128xf32>
    %109 = arith.divf %107, %108 : vector<8x128xf32>
    %110 = arith.mulf %101, %75 : vector<8x128xf32>
    %111 = arith.mulf %95, %103 : vector<8x128xf32>
    %112 = arith.addf %110, %111 : vector<8x128xf32>
    %113 = math.tanh %112 : vector<8x128xf32>
    %114 = arith.mulf %109, %113 : vector<8x128xf32>
    %c8_i32_38 = arith.constant 8 : i32
    %115 = arith.muli %c2_i32, %c8_i32_38 : i32
    %c0_i32_39 = arith.constant 0 : i32
    %116 = arith.addi %c0_i32_39, %115 : i32
    %117 = tpu.assume_multiple %116, 8 : i32
    %118 = arith.index_cast %117 : i32 to index
    %c0_40 = arith.constant 0 : index
    %119 = vector.load %arg11[%118, %c0_40] : memref<64x128xf32, #tpu.memory_space<vmem>>, vector<8x128xf32>
    tpu.vector_store %arg11[%118, %c0_40], %114 {strides = array<i32>} : memref<64x128xf32, #tpu.memory_space<vmem>>, vector<8x128xf32>,
    %c3_i32 = arith.constant 3 : i32
    %c8_i32_41 = arith.constant 8 : i32
    %120 = arith.muli %c3_i32, %c8_i32_41 : i32
    %121 = tpu.assume_multiple %120, 8 : i32
    %c0_42 = arith.constant 0 : index
    %c0_43 = arith.constant 0 : index
    %122 = vector.load %arg2[%c0_42, %c0_43] : memref<128x512xf32, #tpu.memory_space<vmem>>, vector<128x512xf32>
    %cst_44 = arith.constant dense<0.000000e+00> : vector<8x512xf32>
    %123 = tpu.matmul %114, %122, %cst_44 {dimension_numbers = #tpu.dot_dimension_numbers<[1], [0], [0], [1], [0, 0, 1, 1], [], []>} : vector<8x128xf32>, vector<128x512xf32>, vector<8x512xf32> -> vector<8x512xf32>
    %124 = arith.index_cast %121 : i32 to index
    %c0_45 = arith.constant 0 : index
    %125 = vector.load %arg10[%124, %c0_45] : memref<64x512xf32, #tpu.memory_space<vmem>>, vector<8x512xf32>
    %126 = arith.addf %123, %125 : vector<8x512xf32>
    %127 = vector.extract_strided_slice %126 {offsets = [0, 0], sizes = [8, 128], strides = [1, 1]} : vector<8x512xf32> to vector<8x128xf32>
    %128 = arith.negf %127 : vector<8x128xf32>
    %129 = math.exp %128 : vector<8x128xf32>
    %cst_46 = arith.constant 1.000000e+00 : f32
    %130 = vector.broadcast %cst_46 : f32 to vector<8x128xf32>
    %131 = arith.addf %130, %129 : vector<8x128xf32>
    %132 = arith.divf %130, %131 : vector<8x128xf32>
    %133 = vector.extract_strided_slice %126 {offsets = [0, 128], sizes = [8, 128], strides = [1, 1]} : vector<8x512xf32> to vector<8x128xf32>
    %134 = arith.negf %133 : vector<8x128xf32>
    %135 = math.exp %134 : vector<8x128xf32>
    %cst_47 = arith.constant 1.000000e+00 : f32
    %136 = vector.broadcast %cst_47 : f32 to vector<8x128xf32>
    %137 = arith.addf %136, %135 : vector<8x128xf32>
    %138 = arith.divf %136, %137 : vector<8x128xf32>
    %139 = vector.extract_strided_slice %126 {offsets = [0, 256], sizes = [8, 128], strides = [1, 1]} : vector<8x512xf32> to vector<8x128xf32>
    %140 = math.tanh %139 : vector<8x128xf32>
    %141 = vector.extract_strided_slice %126 {offsets = [0, 384], sizes = [8, 128], strides = [1, 1]} : vector<8x512xf32> to vector<8x128xf32>
    %142 = arith.negf %141 : vector<8x128xf32>
    %143 = math.exp %142 : vector<8x128xf32>
    %cst_48 = arith.constant 1.000000e+00 : f32
    %144 = vector.broadcast %cst_48 : f32 to vector<8x128xf32>
    %145 = arith.addf %144, %143 : vector<8x128xf32>
    %146 = arith.divf %144, %145 : vector<8x128xf32>
    %147 = arith.mulf %138, %112 : vector<8x128xf32>
    %148 = arith.mulf %132, %140 : vector<8x128xf32>
    %149 = arith.addf %147, %148 : vector<8x128xf32>
    %150 = math.tanh %149 : vector<8x128xf32>
    %151 = arith.mulf %146, %150 : vector<8x128xf32>
    %c8_i32_49 = arith.constant 8 : i32
    %152 = arith.muli %c3_i32, %c8_i32_49 : i32
    %c0_i32_50 = arith.constant 0 : i32
    %153 = arith.addi %c0_i32_50, %152 : i32
    %154 = tpu.assume_multiple %153, 8 : i32
    %155 = arith.index_cast %154 : i32 to index
    %c0_51 = arith.constant 0 : index
    %156 = vector.load %arg11[%155, %c0_51] : memref<64x128xf32, #tpu.memory_space<vmem>>, vector<8x128xf32>
    tpu.vector_store %arg11[%155, %c0_51], %151 {strides = array<i32>} : memref<64x128xf32, #tpu.memory_space<vmem>>, vector<8x128xf32>,
    %c4_i32 = arith.constant 4 : i32
    %c8_i32_52 = arith.constant 8 : i32
    %157 = arith.muli %c4_i32, %c8_i32_52 : i32
    %158 = tpu.assume_multiple %157, 8 : i32
    %c0_53 = arith.constant 0 : index
    %c0_54 = arith.constant 0 : index
    %159 = vector.load %arg2[%c0_53, %c0_54] : memref<128x512xf32, #tpu.memory_space<vmem>>, vector<128x512xf32>
    %cst_55 = arith.constant dense<0.000000e+00> : vector<8x512xf32>
    %160 = tpu.matmul %151, %159, %cst_55 {dimension_numbers = #tpu.dot_dimension_numbers<[1], [0], [0], [1], [0, 0, 1, 1], [], []>} : vector<8x128xf32>, vector<128x512xf32>, vector<8x512xf32> -> vector<8x512xf32>
    %161 = arith.index_cast %158 : i32 to index
    %c0_56 = arith.constant 0 : index
    %162 = vector.load %arg10[%161, %c0_56] : memref<64x512xf32, #tpu.memory_space<vmem>>, vector<8x512xf32>
    %163 = arith.addf %160, %162 : vector<8x512xf32>
    %164 = vector.extract_strided_slice %163 {offsets = [0, 0], sizes = [8, 128], strides = [1, 1]} : vector<8x512xf32> to vector<8x128xf32>
    %165 = arith.negf %164 : vector<8x128xf32>
    %166 = math.exp %165 : vector<8x128xf32>
    %cst_57 = arith.constant 1.000000e+00 : f32
    %167 = vector.broadcast %cst_57 : f32 to vector<8x128xf32>
    %168 = arith.addf %167, %166 : vector<8x128xf32>
    %169 = arith.divf %167, %168 : vector<8x128xf32>
    %170 = vector.extract_strided_slice %163 {offsets = [0, 128], sizes = [8, 128], strides = [1, 1]} : vector<8x512xf32> to vector<8x128xf32>
    %171 = arith.negf %170 : vector<8x128xf32>
    %172 = math.exp %171 : vector<8x128xf32>
    %cst_58 = arith.constant 1.000000e+00 : f32
    %173 = vector.broadcast %cst_58 : f32 to vector<8x128xf32>
    %174 = arith.addf %173, %172 : vector<8x128xf32>
    %175 = arith.divf %173, %174 : vector<8x128xf32>
    %176 = vector.extract_strided_slice %163 {offsets = [0, 256], sizes = [8, 128], strides = [1, 1]} : vector<8x512xf32> to vector<8x128xf32>
    %177 = math.tanh %176 : vector<8x128xf32>
    %178 = vector.extract_strided_slice %163 {offsets = [0, 384], sizes = [8, 128], strides = [1, 1]} : vector<8x512xf32> to vector<8x128xf32>
    %179 = arith.negf %178 : vector<8x128xf32>
    %180 = math.exp %179 : vector<8x128xf32>
    %cst_59 = arith.constant 1.000000e+00 : f32
    %181 = vector.broadcast %cst_59 : f32 to vector<8x128xf32>
    %182 = arith.addf %181, %180 : vector<8x128xf32>
    %183 = arith.divf %181, %182 : vector<8x128xf32>
    %184 = arith.mulf %175, %149 : vector<8x128xf32>
    %185 = arith.mulf %169, %177 : vector<8x128xf32>
    %186 = arith.addf %184, %185 : vector<8x128xf32>
    %187 = math.tanh %186 : vector<8x128xf32>
    %188 = arith.mulf %183, %187 : vector<8x128xf32>
    %c8_i32_60 = arith.constant 8 : i32
    %189 = arith.muli %c4_i32, %c8_i32_60 : i32
    %c0_i32_61 = arith.constant 0 : i32
    %190 = arith.addi %c0_i32_61, %189 : i32
    %191 = tpu.assume_multiple %190, 8 : i32
    %192 = arith.index_cast %191 : i32 to index
    %c0_62 = arith.constant 0 : index
    %193 = vector.load %arg11[%192, %c0_62] : memref<64x128xf32, #tpu.memory_space<vmem>>, vector<8x128xf32>
    tpu.vector_store %arg11[%192, %c0_62], %188 {strides = array<i32>} : memref<64x128xf32, #tpu.memory_space<vmem>>, vector<8x128xf32>,
    %c5_i32 = arith.constant 5 : i32
    %c8_i32_63 = arith.constant 8 : i32
    %194 = arith.muli %c5_i32, %c8_i32_63 : i32
    %195 = tpu.assume_multiple %194, 8 : i32
    %c0_64 = arith.constant 0 : index
    %c0_65 = arith.constant 0 : index
    %196 = vector.load %arg2[%c0_64, %c0_65] : memref<128x512xf32, #tpu.memory_space<vmem>>, vector<128x512xf32>
    %cst_66 = arith.constant dense<0.000000e+00> : vector<8x512xf32>
    %197 = tpu.matmul %188, %196, %cst_66 {dimension_numbers = #tpu.dot_dimension_numbers<[1], [0], [0], [1], [0, 0, 1, 1], [], []>} : vector<8x128xf32>, vector<128x512xf32>, vector<8x512xf32> -> vector<8x512xf32>
    %198 = arith.index_cast %195 : i32 to index
    %c0_67 = arith.constant 0 : index
    %199 = vector.load %arg10[%198, %c0_67] : memref<64x512xf32, #tpu.memory_space<vmem>>, vector<8x512xf32>
    %200 = arith.addf %197, %199 : vector<8x512xf32>
    %201 = vector.extract_strided_slice %200 {offsets = [0, 0], sizes = [8, 128], strides = [1, 1]} : vector<8x512xf32> to vector<8x128xf32>
    %202 = arith.negf %201 : vector<8x128xf32>
    %203 = math.exp %202 : vector<8x128xf32>
    %cst_68 = arith.constant 1.000000e+00 : f32
    %204 = vector.broadcast %cst_68 : f32 to vector<8x128xf32>
    %205 = arith.addf %204, %203 : vector<8x128xf32>
    %206 = arith.divf %204, %205 : vector<8x128xf32>
    %207 = vector.extract_strided_slice %200 {offsets = [0, 128], sizes = [8, 128], strides = [1, 1]} : vector<8x512xf32> to vector<8x128xf32>
    %208 = arith.negf %207 : vector<8x128xf32>
    %209 = math.exp %208 : vector<8x128xf32>
    %cst_69 = arith.constant 1.000000e+00 : f32
    %210 = vector.broadcast %cst_69 : f32 to vector<8x128xf32>
    %211 = arith.addf %210, %209 : vector<8x128xf32>
    %212 = arith.divf %210, %211 : vector<8x128xf32>
    %213 = vector.extract_strided_slice %200 {offsets = [0, 256], sizes = [8, 128], strides = [1, 1]} : vector<8x512xf32> to vector<8x128xf32>
    %214 = math.tanh %213 : vector<8x128xf32>
    %215 = vector.extract_strided_slice %200 {offsets = [0, 384], sizes = [8, 128], strides = [1, 1]} : vector<8x512xf32> to vector<8x128xf32>
    %216 = arith.negf %215 : vector<8x128xf32>
    %217 = math.exp %216 : vector<8x128xf32>
    %cst_70 = arith.constant 1.000000e+00 : f32
    %218 = vector.broadcast %cst_70 : f32 to vector<8x128xf32>
    %219 = arith.addf %218, %217 : vector<8x128xf32>
    %220 = arith.divf %218, %219 : vector<8x128xf32>
    %221 = arith.mulf %212, %186 : vector<8x128xf32>
    %222 = arith.mulf %206, %214 : vector<8x128xf32>
    %223 = arith.addf %221, %222 : vector<8x128xf32>
    %224 = math.tanh %223 : vector<8x128xf32>
    %225 = arith.mulf %220, %224 : vector<8x128xf32>
    %c8_i32_71 = arith.constant 8 : i32
    %226 = arith.muli %c5_i32, %c8_i32_71 : i32
    %c0_i32_72 = arith.constant 0 : i32
    %227 = arith.addi %c0_i32_72, %226 : i32
    %228 = tpu.assume_multiple %227, 8 : i32
    %229 = arith.index_cast %228 : i32 to index
    %c0_73 = arith.constant 0 : index
    %230 = vector.load %arg11[%229, %c0_73] : memref<64x128xf32, #tpu.memory_space<vmem>>, vector<8x128xf32>
    tpu.vector_store %arg11[%229, %c0_73], %225 {strides = array<i32>} : memref<64x128xf32, #tpu.memory_space<vmem>>, vector<8x128xf32>,
    %c6_i32 = arith.constant 6 : i32
    %c8_i32_74 = arith.constant 8 : i32
    %231 = arith.muli %c6_i32, %c8_i32_74 : i32
    %232 = tpu.assume_multiple %231, 8 : i32
    %c0_75 = arith.constant 0 : index
    %c0_76 = arith.constant 0 : index
    %233 = vector.load %arg2[%c0_75, %c0_76] : memref<128x512xf32, #tpu.memory_space<vmem>>, vector<128x512xf32>
    %cst_77 = arith.constant dense<0.000000e+00> : vector<8x512xf32>
    %234 = tpu.matmul %225, %233, %cst_77 {dimension_numbers = #tpu.dot_dimension_numbers<[1], [0], [0], [1], [0, 0, 1, 1], [], []>} : vector<8x128xf32>, vector<128x512xf32>, vector<8x512xf32> -> vector<8x512xf32>
    %235 = arith.index_cast %232 : i32 to index
    %c0_78 = arith.constant 0 : index
    %236 = vector.load %arg10[%235, %c0_78] : memref<64x512xf32, #tpu.memory_space<vmem>>, vector<8x512xf32>
    %237 = arith.addf %234, %236 : vector<8x512xf32>
    %238 = vector.extract_strided_slice %237 {offsets = [0, 0], sizes = [8, 128], strides = [1, 1]} : vector<8x512xf32> to vector<8x128xf32>
    %239 = arith.negf %238 : vector<8x128xf32>
    %240 = math.exp %239 : vector<8x128xf32>
    %cst_79 = arith.constant 1.000000e+00 : f32
    %241 = vector.broadcast %cst_79 : f32 to vector<8x128xf32>
    %242 = arith.addf %241, %240 : vector<8x128xf32>
    %243 = arith.divf %241, %242 : vector<8x128xf32>
    %244 = vector.extract_strided_slice %237 {offsets = [0, 128], sizes = [8, 128], strides = [1, 1]} : vector<8x512xf32> to vector<8x128xf32>
    %245 = arith.negf %244 : vector<8x128xf32>
    %246 = math.exp %245 : vector<8x128xf32>
    %cst_80 = arith.constant 1.000000e+00 : f32
    %247 = vector.broadcast %cst_80 : f32 to vector<8x128xf32>
    %248 = arith.addf %247, %246 : vector<8x128xf32>
    %249 = arith.divf %247, %248 : vector<8x128xf32>
    %250 = vector.extract_strided_slice %237 {offsets = [0, 256], sizes = [8, 128], strides = [1, 1]} : vector<8x512xf32> to vector<8x128xf32>
    %251 = math.tanh %250 : vector<8x128xf32>
    %252 = vector.extract_strided_slice %237 {offsets = [0, 384], sizes = [8, 128], strides = [1, 1]} : vector<8x512xf32> to vector<8x128xf32>
    %253 = arith.negf %252 : vector<8x128xf32>
    %254 = math.exp %253 : vector<8x128xf32>
    %cst_81 = arith.constant 1.000000e+00 : f32
    %255 = vector.broadcast %cst_81 : f32 to vector<8x128xf32>
    %256 = arith.addf %255, %254 : vector<8x128xf32>
    %257 = arith.divf %255, %256 : vector<8x128xf32>
    %258 = arith.mulf %249, %223 : vector<8x128xf32>
    %259 = arith.mulf %243, %251 : vector<8x128xf32>
    %260 = arith.addf %258, %259 : vector<8x128xf32>
    %261 = math.tanh %260 : vector<8x128xf32>
    %262 = arith.mulf %257, %261 : vector<8x128xf32>
    %c8_i32_82 = arith.constant 8 : i32
    %263 = arith.muli %c6_i32, %c8_i32_82 : i32
    %c0_i32_83 = arith.constant 0 : i32
    %264 = arith.addi %c0_i32_83, %263 : i32
    %265 = tpu.assume_multiple %264, 8 : i32
    %266 = arith.index_cast %265 : i32 to index
    %c0_84 = arith.constant 0 : index
    %267 = vector.load %arg11[%266, %c0_84] : memref<64x128xf32, #tpu.memory_space<vmem>>, vector<8x128xf32>
    tpu.vector_store %arg11[%266, %c0_84], %262 {strides = array<i32>} : memref<64x128xf32, #tpu.memory_space<vmem>>, vector<8x128xf32>,
    %c7_i32 = arith.constant 7 : i32
    %c8_i32_85 = arith.constant 8 : i32
    %268 = arith.muli %c7_i32, %c8_i32_85 : i32
    %269 = tpu.assume_multiple %268, 8 : i32
    %c0_86 = arith.constant 0 : index
    %c0_87 = arith.constant 0 : index
    %270 = vector.load %arg2[%c0_86, %c0_87] : memref<128x512xf32, #tpu.memory_space<vmem>>, vector<128x512xf32>
    %cst_88 = arith.constant dense<0.000000e+00> : vector<8x512xf32>
    %271 = tpu.matmul %262, %270, %cst_88 {dimension_numbers = #tpu.dot_dimension_numbers<[1], [0], [0], [1], [0, 0, 1, 1], [], []>} : vector<8x128xf32>, vector<128x512xf32>, vector<8x512xf32> -> vector<8x512xf32>
    %272 = arith.index_cast %269 : i32 to index
    %c0_89 = arith.constant 0 : index
    %273 = vector.load %arg10[%272, %c0_89] : memref<64x512xf32, #tpu.memory_space<vmem>>, vector<8x512xf32>
    %274 = arith.addf %271, %273 : vector<8x512xf32>
    %275 = vector.extract_strided_slice %274 {offsets = [0, 0], sizes = [8, 128], strides = [1, 1]} : vector<8x512xf32> to vector<8x128xf32>
    %276 = arith.negf %275 : vector<8x128xf32>
    %277 = math.exp %276 : vector<8x128xf32>
    %cst_90 = arith.constant 1.000000e+00 : f32
    %278 = vector.broadcast %cst_90 : f32 to vector<8x128xf32>
    %279 = arith.addf %278, %277 : vector<8x128xf32>
    %280 = arith.divf %278, %279 : vector<8x128xf32>
    %281 = vector.extract_strided_slice %274 {offsets = [0, 128], sizes = [8, 128], strides = [1, 1]} : vector<8x512xf32> to vector<8x128xf32>
    %282 = arith.negf %281 : vector<8x128xf32>
    %283 = math.exp %282 : vector<8x128xf32>
    %cst_91 = arith.constant 1.000000e+00 : f32
    %284 = vector.broadcast %cst_91 : f32 to vector<8x128xf32>
    %285 = arith.addf %284, %283 : vector<8x128xf32>
    %286 = arith.divf %284, %285 : vector<8x128xf32>
    %287 = vector.extract_strided_slice %274 {offsets = [0, 256], sizes = [8, 128], strides = [1, 1]} : vector<8x512xf32> to vector<8x128xf32>
    %288 = math.tanh %287 : vector<8x128xf32>
    %289 = vector.extract_strided_slice %274 {offsets = [0, 384], sizes = [8, 128], strides = [1, 1]} : vector<8x512xf32> to vector<8x128xf32>
    %290 = arith.negf %289 : vector<8x128xf32>
    %291 = math.exp %290 : vector<8x128xf32>
    %cst_92 = arith.constant 1.000000e+00 : f32
    %292 = vector.broadcast %cst_92 : f32 to vector<8x128xf32>
    %293 = arith.addf %292, %291 : vector<8x128xf32>
    %294 = arith.divf %292, %293 : vector<8x128xf32>
    %295 = arith.mulf %286, %260 : vector<8x128xf32>
    %296 = arith.mulf %280, %288 : vector<8x128xf32>
    %297 = arith.addf %295, %296 : vector<8x128xf32>
    %298 = math.tanh %297 : vector<8x128xf32>
    %299 = arith.mulf %294, %298 : vector<8x128xf32>
    %c8_i32_93 = arith.constant 8 : i32
    %300 = arith.muli %c7_i32, %c8_i32_93 : i32
    %c0_i32_94 = arith.constant 0 : i32
    %301 = arith.addi %c0_i32_94, %300 : i32
    %302 = tpu.assume_multiple %301, 8 : i32
    %303 = arith.index_cast %302 : i32 to index
    %c0_95 = arith.constant 0 : index
    %304 = vector.load %arg11[%303, %c0_95] : memref<64x128xf32, #tpu.memory_space<vmem>>, vector<8x128xf32>
    tpu.vector_store %arg11[%303, %c0_95], %299 {strides = array<i32>} : memref<64x128xf32, #tpu.memory_space<vmem>>, vector<8x128xf32>,
    %c8_i32_96 = arith.constant 8 : i32
    %cst_97 = arith.constant 0.000000e+00 : f32
    %305 = vector.broadcast %cst_97 : f32 to vector<8x128xf32>
    %cst_98 = arith.constant 0.000000e+00 : f32
    %306 = vector.broadcast %cst_98 : f32 to vector<8x128xf32>
    %c0_99 = arith.constant 0 : index
    %c0_100 = arith.constant 0 : index
    %307 = vector.load %arg11[%c0_99, %c0_100] : memref<64x128xf32, #tpu.memory_space<vmem>>, vector<64x128xf32>
    %c0_101 = arith.constant 0 : index
    %c0_102 = arith.constant 0 : index
    %308 = vector.load %arg4[%c0_101, %c0_102] : memref<128x512xf32, #tpu.memory_space<vmem>>, vector<128x512xf32>
    %cst_103 = arith.constant dense<0.000000e+00> : vector<64x512xf32>
    %309 = tpu.matmul %307, %308, %cst_103 {dimension_numbers = #tpu.dot_dimension_numbers<[1], [0], [0], [1], [0, 0, 1, 1], [], []>} : vector<64x128xf32>, vector<128x512xf32>, vector<64x512xf32> -> vector<64x512xf32>
    %c0_104 = arith.constant 0 : index
    %c0_105 = arith.constant 0 : index
    %310 = vector.load %arg6[%c0_104, %c0_105] : memref<1x512xf32, #tpu.memory_space<vmem>>, vector<1x512xf32>
    %311 = vector.broadcast %310 : vector<1x512xf32> to vector<64x512xf32>
    %312 = arith.addf %309, %311 : vector<64x512xf32>
    %c0_106 = arith.constant 0 : index
    %c0_107 = arith.constant 0 : index
    %313 = vector.load %arg10[%c0_106, %c0_107] : memref<64x512xf32, #tpu.memory_space<vmem>>, vector<64x512xf32>
    tpu.vector_store %arg10[%c0_106, %c0_107], %312 {strides = array<i32>} : memref<64x512xf32, #tpu.memory_space<vmem>>, vector<64x512xf32>,
    %c0_i32_108 = arith.constant 0 : i32
    %c8_i32_109 = arith.constant 8 : i32
    %314 = arith.muli %c0_i32_108, %c8_i32_109 : i32
    %315 = tpu.assume_multiple %314, 8 : i32
    %c0_110 = arith.constant 0 : index
    %c0_111 = arith.constant 0 : index
    %316 = vector.load %arg5[%c0_110, %c0_111] : memref<128x512xf32, #tpu.memory_space<vmem>>, vector<128x512xf32>
    %cst_112 = arith.constant dense<0.000000e+00> : vector<8x512xf32>
    %317 = tpu.matmul %305, %316, %cst_112 {dimension_numbers = #tpu.dot_dimension_numbers<[1], [0], [0], [1], [0, 0, 1, 1], [], []>} : vector<8x128xf32>, vector<128x512xf32>, vector<8x512xf32> -> vector<8x512xf32>
    %318 = arith.index_cast %315 : i32 to index
    %c0_113 = arith.constant 0 : index
    %319 = vector.load %arg10[%318, %c0_113] : memref<64x512xf32, #tpu.memory_space<vmem>>, vector<8x512xf32>
    %320 = arith.addf %317, %319 : vector<8x512xf32>
    %321 = vector.extract_strided_slice %320 {offsets = [0, 0], sizes = [8, 128], strides = [1, 1]} : vector<8x512xf32> to vector<8x128xf32>
    %322 = arith.negf %321 : vector<8x128xf32>
    %323 = math.exp %322 : vector<8x128xf32>
    %cst_114 = arith.constant 1.000000e+00 : f32
    %324 = vector.broadcast %cst_114 : f32 to vector<8x128xf32>
    %325 = arith.addf %324, %323 : vector<8x128xf32>
    %326 = arith.divf %324, %325 : vector<8x128xf32>
    %327 = vector.extract_strided_slice %320 {offsets = [0, 128], sizes = [8, 128], strides = [1, 1]} : vector<8x512xf32> to vector<8x128xf32>
    %328 = arith.negf %327 : vector<8x128xf32>
    %329 = math.exp %328 : vector<8x128xf32>
    %cst_115 = arith.constant 1.000000e+00 : f32
    %330 = vector.broadcast %cst_115 : f32 to vector<8x128xf32>
    %331 = arith.addf %330, %329 : vector<8x128xf32>
    %332 = arith.divf %330, %331 : vector<8x128xf32>
    %333 = vector.extract_strided_slice %320 {offsets = [0, 256], sizes = [8, 128], strides = [1, 1]} : vector<8x512xf32> to vector<8x128xf32>
    %334 = math.tanh %333 : vector<8x128xf32>
    %335 = vector.extract_strided_slice %320 {offsets = [0, 384], sizes = [8, 128], strides = [1, 1]} : vector<8x512xf32> to vector<8x128xf32>
    %336 = arith.negf %335 : vector<8x128xf32>
    %337 = math.exp %336 : vector<8x128xf32>
    %cst_116 = arith.constant 1.000000e+00 : f32
    %338 = vector.broadcast %cst_116 : f32 to vector<8x128xf32>
    %339 = arith.addf %338, %337 : vector<8x128xf32>
    %340 = arith.divf %338, %339 : vector<8x128xf32>
    %341 = arith.mulf %332, %306 : vector<8x128xf32>
    %342 = arith.mulf %326, %334 : vector<8x128xf32>
    %343 = arith.addf %341, %342 : vector<8x128xf32>
    %344 = math.tanh %343 : vector<8x128xf32>
    %345 = arith.mulf %340, %344 : vector<8x128xf32>
    %c1_i32_117 = arith.constant 1 : i32
    %c8_i32_118 = arith.constant 8 : i32
    %346 = arith.muli %c1_i32_117, %c8_i32_118 : i32
    %347 = tpu.assume_multiple %346, 8 : i32
    %c0_119 = arith.constant 0 : index
    %c0_120 = arith.constant 0 : index
    %348 = vector.load %arg5[%c0_119, %c0_120] : memref<128x512xf32, #tpu.memory_space<vmem>>, vector<128x512xf32>
    %cst_121 = arith.constant dense<0.000000e+00> : vector<8x512xf32>
    %349 = tpu.matmul %345, %348, %cst_121 {dimension_numbers = #tpu.dot_dimension_numbers<[1], [0], [0], [1], [0, 0, 1, 1], [], []>} : vector<8x128xf32>, vector<128x512xf32>, vector<8x512xf32> -> vector<8x512xf32>
    %350 = arith.index_cast %347 : i32 to index
    %c0_122 = arith.constant 0 : index
    %351 = vector.load %arg10[%350, %c0_122] : memref<64x512xf32, #tpu.memory_space<vmem>>, vector<8x512xf32>
    %352 = arith.addf %349, %351 : vector<8x512xf32>
    %353 = vector.extract_strided_slice %352 {offsets = [0, 0], sizes = [8, 128], strides = [1, 1]} : vector<8x512xf32> to vector<8x128xf32>
    %354 = arith.negf %353 : vector<8x128xf32>
    %355 = math.exp %354 : vector<8x128xf32>
    %cst_123 = arith.constant 1.000000e+00 : f32
    %356 = vector.broadcast %cst_123 : f32 to vector<8x128xf32>
    %357 = arith.addf %356, %355 : vector<8x128xf32>
    %358 = arith.divf %356, %357 : vector<8x128xf32>
    %359 = vector.extract_strided_slice %352 {offsets = [0, 128], sizes = [8, 128], strides = [1, 1]} : vector<8x512xf32> to vector<8x128xf32>
    %360 = arith.negf %359 : vector<8x128xf32>
    %361 = math.exp %360 : vector<8x128xf32>
    %cst_124 = arith.constant 1.000000e+00 : f32
    %362 = vector.broadcast %cst_124 : f32 to vector<8x128xf32>
    %363 = arith.addf %362, %361 : vector<8x128xf32>
    %364 = arith.divf %362, %363 : vector<8x128xf32>
    %365 = vector.extract_strided_slice %352 {offsets = [0, 256], sizes = [8, 128], strides = [1, 1]} : vector<8x512xf32> to vector<8x128xf32>
    %366 = math.tanh %365 : vector<8x128xf32>
    %367 = vector.extract_strided_slice %352 {offsets = [0, 384], sizes = [8, 128], strides = [1, 1]} : vector<8x512xf32> to vector<8x128xf32>
    %368 = arith.negf %367 : vector<8x128xf32>
    %369 = math.exp %368 : vector<8x128xf32>
    %cst_125 = arith.constant 1.000000e+00 : f32
    %370 = vector.broadcast %cst_125 : f32 to vector<8x128xf32>
    %371 = arith.addf %370, %369 : vector<8x128xf32>
    %372 = arith.divf %370, %371 : vector<8x128xf32>
    %373 = arith.mulf %364, %343 : vector<8x128xf32>
    %374 = arith.mulf %358, %366 : vector<8x128xf32>
    %375 = arith.addf %373, %374 : vector<8x128xf32>
    %376 = math.tanh %375 : vector<8x128xf32>
    %377 = arith.mulf %372, %376 : vector<8x128xf32>
    %c2_i32_126 = arith.constant 2 : i32
    %c8_i32_127 = arith.constant 8 : i32
    %378 = arith.muli %c2_i32_126, %c8_i32_127 : i32
    %379 = tpu.assume_multiple %378, 8 : i32
    %c0_128 = arith.constant 0 : index
    %c0_129 = arith.constant 0 : index
    %380 = vector.load %arg5[%c0_128, %c0_129] : memref<128x512xf32, #tpu.memory_space<vmem>>, vector<128x512xf32>
    %cst_130 = arith.constant dense<0.000000e+00> : vector<8x512xf32>
    %381 = tpu.matmul %377, %380, %cst_130 {dimension_numbers = #tpu.dot_dimension_numbers<[1], [0], [0], [1], [0, 0, 1, 1], [], []>} : vector<8x128xf32>, vector<128x512xf32>, vector<8x512xf32> -> vector<8x512xf32>
    %382 = arith.index_cast %379 : i32 to index
    %c0_131 = arith.constant 0 : index
    %383 = vector.load %arg10[%382, %c0_131] : memref<64x512xf32, #tpu.memory_space<vmem>>, vector<8x512xf32>
    %384 = arith.addf %381, %383 : vector<8x512xf32>
    %385 = vector.extract_strided_slice %384 {offsets = [0, 0], sizes = [8, 128], strides = [1, 1]} : vector<8x512xf32> to vector<8x128xf32>
    %386 = arith.negf %385 : vector<8x128xf32>
    %387 = math.exp %386 : vector<8x128xf32>
    %cst_132 = arith.constant 1.000000e+00 : f32
    %388 = vector.broadcast %cst_132 : f32 to vector<8x128xf32>
    %389 = arith.addf %388, %387 : vector<8x128xf32>
    %390 = arith.divf %388, %389 : vector<8x128xf32>
    %391 = vector.extract_strided_slice %384 {offsets = [0, 128], sizes = [8, 128], strides = [1, 1]} : vector<8x512xf32> to vector<8x128xf32>
    %392 = arith.negf %391 : vector<8x128xf32>
    %393 = math.exp %392 : vector<8x128xf32>
    %cst_133 = arith.constant 1.000000e+00 : f32
    %394 = vector.broadcast %cst_133 : f32 to vector<8x128xf32>
    %395 = arith.addf %394, %393 : vector<8x128xf32>
    %396 = arith.divf %394, %395 : vector<8x128xf32>
    %397 = vector.extract_strided_slice %384 {offsets = [0, 256], sizes = [8, 128], strides = [1, 1]} : vector<8x512xf32> to vector<8x128xf32>
    %398 = math.tanh %397 : vector<8x128xf32>
    %399 = vector.extract_strided_slice %384 {offsets = [0, 384], sizes = [8, 128], strides = [1, 1]} : vector<8x512xf32> to vector<8x128xf32>
    %400 = arith.negf %399 : vector<8x128xf32>
    %401 = math.exp %400 : vector<8x128xf32>
    %cst_134 = arith.constant 1.000000e+00 : f32
    %402 = vector.broadcast %cst_134 : f32 to vector<8x128xf32>
    %403 = arith.addf %402, %401 : vector<8x128xf32>
    %404 = arith.divf %402, %403 : vector<8x128xf32>
    %405 = arith.mulf %396, %375 : vector<8x128xf32>
    %406 = arith.mulf %390, %398 : vector<8x128xf32>
    %407 = arith.addf %405, %406 : vector<8x128xf32>
    %408 = math.tanh %407 : vector<8x128xf32>
    %409 = arith.mulf %404, %408 : vector<8x128xf32>
    %c3_i32_135 = arith.constant 3 : i32
    %c8_i32_136 = arith.constant 8 : i32
    %410 = arith.muli %c3_i32_135, %c8_i32_136 : i32
    %411 = tpu.assume_multiple %410, 8 : i32
    %c0_137 = arith.constant 0 : index
    %c0_138 = arith.constant 0 : index
    %412 = vector.load %arg5[%c0_137, %c0_138] : memref<128x512xf32, #tpu.memory_space<vmem>>, vector<128x512xf32>
    %cst_139 = arith.constant dense<0.000000e+00> : vector<8x512xf32>
    %413 = tpu.matmul %409, %412, %cst_139 {dimension_numbers = #tpu.dot_dimension_numbers<[1], [0], [0], [1], [0, 0, 1, 1], [], []>} : vector<8x128xf32>, vector<128x512xf32>, vector<8x512xf32> -> vector<8x512xf32>
    %414 = arith.index_cast %411 : i32 to index
    %c0_140 = arith.constant 0 : index
    %415 = vector.load %arg10[%414, %c0_140] : memref<64x512xf32, #tpu.memory_space<vmem>>, vector<8x512xf32>
    %416 = arith.addf %413, %415 : vector<8x512xf32>
    %417 = vector.extract_strided_slice %416 {offsets = [0, 0], sizes = [8, 128], strides = [1, 1]} : vector<8x512xf32> to vector<8x128xf32>
    %418 = arith.negf %417 : vector<8x128xf32>
    %419 = math.exp %418 : vector<8x128xf32>
    %cst_141 = arith.constant 1.000000e+00 : f32
    %420 = vector.broadcast %cst_141 : f32 to vector<8x128xf32>
    %421 = arith.addf %420, %419 : vector<8x128xf32>
    %422 = arith.divf %420, %421 : vector<8x128xf32>
    %423 = vector.extract_strided_slice %416 {offsets = [0, 128], sizes = [8, 128], strides = [1, 1]} : vector<8x512xf32> to vector<8x128xf32>
    %424 = arith.negf %423 : vector<8x128xf32>
    %425 = math.exp %424 : vector<8x128xf32>
    %cst_142 = arith.constant 1.000000e+00 : f32
    %426 = vector.broadcast %cst_142 : f32 to vector<8x128xf32>
    %427 = arith.addf %426, %425 : vector<8x128xf32>
    %428 = arith.divf %426, %427 : vector<8x128xf32>
    %429 = vector.extract_strided_slice %416 {offsets = [0, 256], sizes = [8, 128], strides = [1, 1]} : vector<8x512xf32> to vector<8x128xf32>
    %430 = math.tanh %429 : vector<8x128xf32>
    %431 = vector.extract_strided_slice %416 {offsets = [0, 384], sizes = [8, 128], strides = [1, 1]} : vector<8x512xf32> to vector<8x128xf32>
    %432 = arith.negf %431 : vector<8x128xf32>
    %433 = math.exp %432 : vector<8x128xf32>
    %cst_143 = arith.constant 1.000000e+00 : f32
    %434 = vector.broadcast %cst_143 : f32 to vector<8x128xf32>
    %435 = arith.addf %434, %433 : vector<8x128xf32>
    %436 = arith.divf %434, %435 : vector<8x128xf32>
    %437 = arith.mulf %428, %407 : vector<8x128xf32>
    %438 = arith.mulf %422, %430 : vector<8x128xf32>
    %439 = arith.addf %437, %438 : vector<8x128xf32>
    %440 = math.tanh %439 : vector<8x128xf32>
    %441 = arith.mulf %436, %440 : vector<8x128xf32>
    %c4_i32_144 = arith.constant 4 : i32
    %c8_i32_145 = arith.constant 8 : i32
    %442 = arith.muli %c4_i32_144, %c8_i32_145 : i32
    %443 = tpu.assume_multiple %442, 8 : i32
    %c0_146 = arith.constant 0 : index
    %c0_147 = arith.constant 0 : index
    %444 = vector.load %arg5[%c0_146, %c0_147] : memref<128x512xf32, #tpu.memory_space<vmem>>, vector<128x512xf32>
    %cst_148 = arith.constant dense<0.000000e+00> : vector<8x512xf32>
    %445 = tpu.matmul %441, %444, %cst_148 {dimension_numbers = #tpu.dot_dimension_numbers<[1], [0], [0], [1], [0, 0, 1, 1], [], []>} : vector<8x128xf32>, vector<128x512xf32>, vector<8x512xf32> -> vector<8x512xf32>
    %446 = arith.index_cast %443 : i32 to index
    %c0_149 = arith.constant 0 : index
    %447 = vector.load %arg10[%446, %c0_149] : memref<64x512xf32, #tpu.memory_space<vmem>>, vector<8x512xf32>
    %448 = arith.addf %445, %447 : vector<8x512xf32>
    %449 = vector.extract_strided_slice %448 {offsets = [0, 0], sizes = [8, 128], strides = [1, 1]} : vector<8x512xf32> to vector<8x128xf32>
    %450 = arith.negf %449 : vector<8x128xf32>
    %451 = math.exp %450 : vector<8x128xf32>
    %cst_150 = arith.constant 1.000000e+00 : f32
    %452 = vector.broadcast %cst_150 : f32 to vector<8x128xf32>
    %453 = arith.addf %452, %451 : vector<8x128xf32>
    %454 = arith.divf %452, %453 : vector<8x128xf32>
    %455 = vector.extract_strided_slice %448 {offsets = [0, 128], sizes = [8, 128], strides = [1, 1]} : vector<8x512xf32> to vector<8x128xf32>
    %456 = arith.negf %455 : vector<8x128xf32>
    %457 = math.exp %456 : vector<8x128xf32>
    %cst_151 = arith.constant 1.000000e+00 : f32
    %458 = vector.broadcast %cst_151 : f32 to vector<8x128xf32>
    %459 = arith.addf %458, %457 : vector<8x128xf32>
    %460 = arith.divf %458, %459 : vector<8x128xf32>
    %461 = vector.extract_strided_slice %448 {offsets = [0, 256], sizes = [8, 128], strides = [1, 1]} : vector<8x512xf32> to vector<8x128xf32>
    %462 = math.tanh %461 : vector<8x128xf32>
    %463 = vector.extract_strided_slice %448 {offsets = [0, 384], sizes = [8, 128], strides = [1, 1]} : vector<8x512xf32> to vector<8x128xf32>
    %464 = arith.negf %463 : vector<8x128xf32>
    %465 = math.exp %464 : vector<8x128xf32>
    %cst_152 = arith.constant 1.000000e+00 : f32
    %466 = vector.broadcast %cst_152 : f32 to vector<8x128xf32>
    %467 = arith.addf %466, %465 : vector<8x128xf32>
    %468 = arith.divf %466, %467 : vector<8x128xf32>
    %469 = arith.mulf %460, %439 : vector<8x128xf32>
    %470 = arith.mulf %454, %462 : vector<8x128xf32>
    %471 = arith.addf %469, %470 : vector<8x128xf32>
    %472 = math.tanh %471 : vector<8x128xf32>
    %473 = arith.mulf %468, %472 : vector<8x128xf32>
    %c5_i32_153 = arith.constant 5 : i32
    %c8_i32_154 = arith.constant 8 : i32
    %474 = arith.muli %c5_i32_153, %c8_i32_154 : i32
    %475 = tpu.assume_multiple %474, 8 : i32
    %c0_155 = arith.constant 0 : index
    %c0_156 = arith.constant 0 : index
    %476 = vector.load %arg5[%c0_155, %c0_156] : memref<128x512xf32, #tpu.memory_space<vmem>>, vector<128x512xf32>
    %cst_157 = arith.constant dense<0.000000e+00> : vector<8x512xf32>
    %477 = tpu.matmul %473, %476, %cst_157 {dimension_numbers = #tpu.dot_dimension_numbers<[1], [0], [0], [1], [0, 0, 1, 1], [], []>} : vector<8x128xf32>, vector<128x512xf32>, vector<8x512xf32> -> vector<8x512xf32>
    %478 = arith.index_cast %475 : i32 to index
    %c0_158 = arith.constant 0 : index
    %479 = vector.load %arg10[%478, %c0_158] : memref<64x512xf32, #tpu.memory_space<vmem>>, vector<8x512xf32>
    %480 = arith.addf %477, %479 : vector<8x512xf32>
    %481 = vector.extract_strided_slice %480 {offsets = [0, 0], sizes = [8, 128], strides = [1, 1]} : vector<8x512xf32> to vector<8x128xf32>
    %482 = arith.negf %481 : vector<8x128xf32>
    %483 = math.exp %482 : vector<8x128xf32>
    %cst_159 = arith.constant 1.000000e+00 : f32
    %484 = vector.broadcast %cst_159 : f32 to vector<8x128xf32>
    %485 = arith.addf %484, %483 : vector<8x128xf32>
    %486 = arith.divf %484, %485 : vector<8x128xf32>
    %487 = vector.extract_strided_slice %480 {offsets = [0, 128], sizes = [8, 128], strides = [1, 1]} : vector<8x512xf32> to vector<8x128xf32>
    %488 = arith.negf %487 : vector<8x128xf32>
    %489 = math.exp %488 : vector<8x128xf32>
    %cst_160 = arith.constant 1.000000e+00 : f32
    %490 = vector.broadcast %cst_160 : f32 to vector<8x128xf32>
    %491 = arith.addf %490, %489 : vector<8x128xf32>
    %492 = arith.divf %490, %491 : vector<8x128xf32>
    %493 = vector.extract_strided_slice %480 {offsets = [0, 256], sizes = [8, 128], strides = [1, 1]} : vector<8x512xf32> to vector<8x128xf32>
    %494 = math.tanh %493 : vector<8x128xf32>
    %495 = vector.extract_strided_slice %480 {offsets = [0, 384], sizes = [8, 128], strides = [1, 1]} : vector<8x512xf32> to vector<8x128xf32>
    %496 = arith.negf %495 : vector<8x128xf32>
    %497 = math.exp %496 : vector<8x128xf32>
    %cst_161 = arith.constant 1.000000e+00 : f32
    %498 = vector.broadcast %cst_161 : f32 to vector<8x128xf32>
    %499 = arith.addf %498, %497 : vector<8x128xf32>
    %500 = arith.divf %498, %499 : vector<8x128xf32>
    %501 = arith.mulf %492, %471 : vector<8x128xf32>
    %502 = arith.mulf %486, %494 : vector<8x128xf32>
    %503 = arith.addf %501, %502 : vector<8x128xf32>
    %504 = math.tanh %503 : vector<8x128xf32>
    %505 = arith.mulf %500, %504 : vector<8x128xf32>
    %c6_i32_162 = arith.constant 6 : i32
    %c8_i32_163 = arith.constant 8 : i32
    %506 = arith.muli %c6_i32_162, %c8_i32_163 : i32
    %507 = tpu.assume_multiple %506, 8 : i32
    %c0_164 = arith.constant 0 : index
    %c0_165 = arith.constant 0 : index
    %508 = vector.load %arg5[%c0_164, %c0_165] : memref<128x512xf32, #tpu.memory_space<vmem>>, vector<128x512xf32>
    %cst_166 = arith.constant dense<0.000000e+00> : vector<8x512xf32>
    %509 = tpu.matmul %505, %508, %cst_166 {dimension_numbers = #tpu.dot_dimension_numbers<[1], [0], [0], [1], [0, 0, 1, 1], [], []>} : vector<8x128xf32>, vector<128x512xf32>, vector<8x512xf32> -> vector<8x512xf32>
    %510 = arith.index_cast %507 : i32 to index
    %c0_167 = arith.constant 0 : index
    %511 = vector.load %arg10[%510, %c0_167] : memref<64x512xf32, #tpu.memory_space<vmem>>, vector<8x512xf32>
    %512 = arith.addf %509, %511 : vector<8x512xf32>
    %513 = vector.extract_strided_slice %512 {offsets = [0, 0], sizes = [8, 128], strides = [1, 1]} : vector<8x512xf32> to vector<8x128xf32>
    %514 = arith.negf %513 : vector<8x128xf32>
    %515 = math.exp %514 : vector<8x128xf32>
    %cst_168 = arith.constant 1.000000e+00 : f32
    %516 = vector.broadcast %cst_168 : f32 to vector<8x128xf32>
    %517 = arith.addf %516, %515 : vector<8x128xf32>
    %518 = arith.divf %516, %517 : vector<8x128xf32>
    %519 = vector.extract_strided_slice %512 {offsets = [0, 128], sizes = [8, 128], strides = [1, 1]} : vector<8x512xf32> to vector<8x128xf32>
    %520 = arith.negf %519 : vector<8x128xf32>
    %521 = math.exp %520 : vector<8x128xf32>
    %cst_169 = arith.constant 1.000000e+00 : f32
    %522 = vector.broadcast %cst_169 : f32 to vector<8x128xf32>
    %523 = arith.addf %522, %521 : vector<8x128xf32>
    %524 = arith.divf %522, %523 : vector<8x128xf32>
    %525 = vector.extract_strided_slice %512 {offsets = [0, 256], sizes = [8, 128], strides = [1, 1]} : vector<8x512xf32> to vector<8x128xf32>
    %526 = math.tanh %525 : vector<8x128xf32>
    %527 = vector.extract_strided_slice %512 {offsets = [0, 384], sizes = [8, 128], strides = [1, 1]} : vector<8x512xf32> to vector<8x128xf32>
    %528 = arith.negf %527 : vector<8x128xf32>
    %529 = math.exp %528 : vector<8x128xf32>
    %cst_170 = arith.constant 1.000000e+00 : f32
    %530 = vector.broadcast %cst_170 : f32 to vector<8x128xf32>
    %531 = arith.addf %530, %529 : vector<8x128xf32>
    %532 = arith.divf %530, %531 : vector<8x128xf32>
    %533 = arith.mulf %524, %503 : vector<8x128xf32>
    %534 = arith.mulf %518, %526 : vector<8x128xf32>
    %535 = arith.addf %533, %534 : vector<8x128xf32>
    %536 = math.tanh %535 : vector<8x128xf32>
    %537 = arith.mulf %532, %536 : vector<8x128xf32>
    %c7_i32_171 = arith.constant 7 : i32
    %c8_i32_172 = arith.constant 8 : i32
    %538 = arith.muli %c7_i32_171, %c8_i32_172 : i32
    %539 = tpu.assume_multiple %538, 8 : i32
    %c0_173 = arith.constant 0 : index
    %c0_174 = arith.constant 0 : index
    %540 = vector.load %arg5[%c0_173, %c0_174] : memref<128x512xf32, #tpu.memory_space<vmem>>, vector<128x512xf32>
    %cst_175 = arith.constant dense<0.000000e+00> : vector<8x512xf32>
    %541 = tpu.matmul %537, %540, %cst_175 {dimension_numbers = #tpu.dot_dimension_numbers<[1], [0], [0], [1], [0, 0, 1, 1], [], []>} : vector<8x128xf32>, vector<128x512xf32>, vector<8x512xf32> -> vector<8x512xf32>
    %542 = arith.index_cast %539 : i32 to index
    %c0_176 = arith.constant 0 : index
    %543 = vector.load %arg10[%542, %c0_176] : memref<64x512xf32, #tpu.memory_space<vmem>>, vector<8x512xf32>
    %544 = arith.addf %541, %543 : vector<8x512xf32>
    %545 = vector.extract_strided_slice %544 {offsets = [0, 0], sizes = [8, 128], strides = [1, 1]} : vector<8x512xf32> to vector<8x128xf32>
    %546 = arith.negf %545 : vector<8x128xf32>
    %547 = math.exp %546 : vector<8x128xf32>
    %cst_177 = arith.constant 1.000000e+00 : f32
    %548 = vector.broadcast %cst_177 : f32 to vector<8x128xf32>
    %549 = arith.addf %548, %547 : vector<8x128xf32>
    %550 = arith.divf %548, %549 : vector<8x128xf32>
    %551 = vector.extract_strided_slice %544 {offsets = [0, 128], sizes = [8, 128], strides = [1, 1]} : vector<8x512xf32> to vector<8x128xf32>
    %552 = arith.negf %551 : vector<8x128xf32>
    %553 = math.exp %552 : vector<8x128xf32>
    %cst_178 = arith.constant 1.000000e+00 : f32
    %554 = vector.broadcast %cst_178 : f32 to vector<8x128xf32>
    %555 = arith.addf %554, %553 : vector<8x128xf32>
    %556 = arith.divf %554, %555 : vector<8x128xf32>
    %557 = vector.extract_strided_slice %544 {offsets = [0, 256], sizes = [8, 128], strides = [1, 1]} : vector<8x512xf32> to vector<8x128xf32>
    %558 = math.tanh %557 : vector<8x128xf32>
    %559 = vector.extract_strided_slice %544 {offsets = [0, 384], sizes = [8, 128], strides = [1, 1]} : vector<8x512xf32> to vector<8x128xf32>
    %560 = arith.negf %559 : vector<8x128xf32>
    %561 = math.exp %560 : vector<8x128xf32>
    %cst_179 = arith.constant 1.000000e+00 : f32
    %562 = vector.broadcast %cst_179 : f32 to vector<8x128xf32>
    %563 = arith.addf %562, %561 : vector<8x128xf32>
    %564 = arith.divf %562, %563 : vector<8x128xf32>
    %565 = arith.mulf %556, %535 : vector<8x128xf32>
    %566 = arith.mulf %550, %558 : vector<8x128xf32>
    %567 = arith.addf %565, %566 : vector<8x128xf32>
    %568 = math.tanh %567 : vector<8x128xf32>
    %569 = arith.mulf %564, %568 : vector<8x128xf32>
    %c8_i32_180 = arith.constant 8 : i32
    %c0_181 = arith.constant 0 : index
    %c0_182 = arith.constant 0 : index
    %570 = vector.load %arg7[%c0_181, %c0_182] : memref<128x128xf32, #tpu.memory_space<vmem>>, vector<128x128xf32>
    %cst_183 = arith.constant dense<0.000000e+00> : vector<8x128xf32>
    %571 = tpu.matmul %569, %570, %cst_183 {dimension_numbers = #tpu.dot_dimension_numbers<[1], [0], [0], [1], [0, 0, 1, 1], [], []>} : vector<8x128xf32>, vector<128x128xf32>, vector<8x128xf32> -> vector<8x128xf32>
    %c0_184 = arith.constant 0 : index
    %c0_185 = arith.constant 0 : index
    %572 = vector.load %arg8[%c0_184, %c0_185] : memref<1x128xf32, #tpu.memory_space<vmem>>, vector<1x128xf32>
    %573 = vector.broadcast %572 : vector<1x128xf32> to vector<8x128xf32>
    %574 = arith.addf %571, %573 : vector<8x128xf32>
    %c0_186 = arith.constant 0 : index
    %c0_187 = arith.constant 0 : index
    %575 = vector.load %arg9[%c0_186, %c0_187] : memref<8x128xf32, #tpu.memory_space<vmem>>, vector<8x128xf32>
    tpu.vector_store %arg9[%c0_186, %c0_187], %574 {strides = array<i32>} : memref<8x128xf32, #tpu.memory_space<vmem>>, vector<8x128xf32>,
    return
  }
}

</mosaic_0001>

<bundles_post_ra>
// kernel: tpu_custom_call.1
= control target key start
LH: loop header
LB: loop body
LE: loop exit
PB: predicated region body
PF: predicated region fallthrough
CT: control target
= control target key end

     0   :  { %14 = vsyncpa [#allocation5], 0  ;;  %s6885_s0 = inlined_call_operand.hbm [shape: f32[64,128], index: 0, kind: input, shape index: {}]   ;;  %s6886_s1 = inlined_call_operand.hbm [shape: f32[128,512], index: 1, kind: input, shape index: {}]   ;;  %s6887_s2 = inlined_call_operand.hbm [shape: f32[128,512], index: 2, kind: input, shape index: {}]   ;;  %s6888_s3 = inlined_call_operand.vmem [shape: f32[1,512], index: 3, kind: input, shape index: {}]   ;;  %s6889_s4 = inlined_call_operand.hbm [shape: f32[128,512], index: 4, kind: input, shape index: {}]   ;;  %s6890_s5 = inlined_call_operand.hbm [shape: f32[128,512], index: 5, kind: input, shape index: {}]   ;;  %s6891_s6 = inlined_call_operand.vmem [shape: f32[1,512], index: 6, kind: input, shape index: {}]   ;;  %s6892_s7 = inlined_call_operand.hbm [shape: f32[128,128], index: 7, kind: input, shape index: {}]   ;;  %s6893_s8 = inlined_call_operand.vmem [shape: f32[1,128], index: 8, kind: input, shape index: {}]   ;;  %s6894_s9 = inlined_call_operand.hbm [shape: f32[8,128], index: 9, kind: output, shape index: {}]  }
   0x1   :  { %15 = vsyncpa [#allocation8], 0 }
   0x2   :  { %16 = vsyncpa [#allocation11], 0 }
   0x3   :  { %17 = vsyncpa [#allocation14], 0 }
   0x4   :  { %18 = vsyncpa [#allocation6], 0  ;;  %s4857_s30 = smov [#allocation7]  }
   0x5   :  { %s36_s10 = sshll.u32 %s4857_s30, 4  ;;  %s37_s10 = int_to_ptr.vmem [resolvable:$true] %s36_s10 }
   0x6   :  { %s4715_s11 = scalar_lea.vmem %s37_s10, 8192  ;;  %p4720_p1 = scmp.lt.s32.totalorder %s37_s10, %s37_s10 }
   0x7   :  { %p4716_p0 = scmp.ne.s32.totalorder %s37_s10, %s4715_s11  ;;  %p4721_p2 = scmp.lt.s32.totalorder %s4715_s11, %s4715_s11 }
   0x9   :  { %p4722_p3 = por %p4721_p2, %p4720_p1 }
   0xb   :  { %p4723_p4 = pnand %p4722_p3, %p4716_p0 }
   0xd   :  { %4726 = shalt.err (!%p4723_p4)
}
   0xe   :  { %s4858_s12 = smov 512   ;;  %s4859_s13 = smov 32  }
   0xf   :  { %42 = dma.hbm_to_vmem [thread:$0]  %s6886_s1, 8192, %s37_s10, [#allocation8], %s4858_s12, %s4858_s12, %s4859_s13  }
  0x10   :  { %s4860_s16 = smov [#allocation10]   ;;  %s4861_s18 = smov [#allocation4]  }
  0x11   :  { %s62_s17 = sshll.u32 %s4860_s16, 4  ;;  %s24_s19 = sshll.u32 %s4861_s18, 4  ;;  %s63_s17 = int_to_ptr.vmem [resolvable:$true] %s62_s17  ;;  %s25_s19 = int_to_ptr.vmem [resolvable:$true] %s24_s19 }
  0x12   :  { %s4735_s20 = scalar_lea.vmem %s63_s17, 8192  ;;  %p4740_p6 = scmp.lt.s32.totalorder %s63_s17, %s63_s17 }
  0x13   :  { %p4736_p5 = scmp.ne.s32.totalorder %s63_s17, %s4735_s20  ;;  %p4741_p7 = scmp.lt.s32.totalorder %s4735_s20, %s4735_s20 }
  0x15   :  { %p4742_p8 = por %p4741_p7, %p4740_p6 }
  0x17   :  { %p4743_p9 = pnand %p4742_p8, %p4736_p5 }
  0x19   :  { %4746 = shalt.err (!%p4743_p9)
}
  0x1a   :  { %68 = dma.hbm_to_vmem [thread:$0]  %s6889_s4, 8192, %s63_s17, [#allocation11], %s4858_s12, %s4858_s12, %s4859_s13  }
  0x1b   :  { %s4755_s1 = scalar_lea.vmem %s25_s19, 1024  ;;  %p4760_p11 = scmp.lt.s32.totalorder %s25_s19, %s25_s19 }
  0x1c   :  { %p4756_p10 = scmp.ne.s32.totalorder %s25_s19, %s4755_s1  ;;  %p4761_p12 = scmp.lt.s32.totalorder %s4755_s1, %s4755_s1 }
  0x1e   :  { %p4762_p13 = por %p4761_p12, %p4760_p11 }
  0x20   :  { %p4763_p0 = pnand %p4762_p13, %p4756_p10 }
  0x22   :  { %4766 = shalt.err (!%p4763_p0)
}
  0x23   :  { %s4862_s23 = smov 128   ;;  %s4863_s24 = smov 8  }
  0x24   :  { %30 = dma.hbm_to_vmem [thread:$0]  %s6885_s0, 1024, %s25_s19, [#allocation5], %s4862_s23, %s4862_s23, %s4863_s24  }
  0x25   :  { %s4864_s27 = smov [#allocation9]   ;;  %s4865_s4 = smov [#allocation12]  }
  0x26   :  { %s48_s28 = sshll.u32 %s4864_s27, 4  ;;  %s74_s29 = sshll.u32 %s4865_s4, 4  ;;  %s49_s28 = int_to_ptr.vmem [resolvable:$true] %s48_s28  ;;  %s75_s29 = int_to_ptr.vmem [resolvable:$true] %s74_s29 }
  0x27   :  { %s4775_s30 = scalar_lea.vmem %s49_s28, 8192  ;;  %p4780_p2 = scmp.lt.s32.totalorder %s49_s28, %s49_s28 }
  0x28   :  { %p4776_p1 = scmp.ne.s32.totalorder %s49_s28, %s4775_s30  ;;  %p4781_p3 = scmp.lt.s32.totalorder %s4775_s30, %s4775_s30 }
  0x2a   :  { %p4782_p4 = por %p4781_p3, %p4780_p2 }
  0x2c   :  { %p4783_p5 = pnand %p4782_p4, %p4776_p1 }
  0x2e   :  { %4786 = shalt.err (!%p4783_p5)
}
  0x2f   :  { %54 = dma.hbm_to_vmem [thread:$0]  %s6887_s2, 8192, %s49_s28, [#allocation8], %s4858_s12, %s4858_s12, %s4859_s13  }
  0x30   :  { %s4795_s0 = scalar_lea.vmem %s75_s29, 8192  ;;  %p4800_p7 = scmp.lt.s32.totalorder %s75_s29, %s75_s29 }
  0x31   :  { %p4796_p6 = scmp.ne.s32.totalorder %s75_s29, %s4795_s0  ;;  %p4801_p8 = scmp.lt.s32.totalorder %s4795_s0, %s4795_s0 }
  0x33   :  { %p4802_p9 = por %p4801_p8, %p4800_p7 }
  0x35   :  { %p4803_p10 = pnand %p4802_p9, %p4796_p6 }
  0x37   :  { %4806 = shalt.err (!%p4803_p10)
}
  0x38   :  { %80 = dma.hbm_to_vmem [thread:$0]  %s6890_s5, 8192, %s75_s29, [#allocation11], %s4858_s12, %s4858_s12, %s4859_s13  }
  0x39   :  { %s4866_s16 = smov [#allocation13]  }
  0x3a   :  { %s88_s17 = sshll.u32 %s4866_s16, 4  ;;  %s89_s17 = int_to_ptr.vmem [resolvable:$true] %s88_s17 }
  0x3b   :  { %s4815_s18 = scalar_lea.vmem %s89_s17, 2048  ;;  %p4820_p12 = scmp.lt.s32.totalorder %s89_s17, %s89_s17 }
  0x3c   :  { %p4816_p11 = scmp.ne.s32.totalorder %s89_s17, %s4815_s18  ;;  %p4821_p13 = scmp.lt.s32.totalorder %s4815_s18, %s4815_s18 }
  0x3e   :  { %p4822_p0 = por %p4821_p13, %p4820_p12 }
  0x40   :  { %p4823_p1 = pnand %p4822_p0, %p4816_p11 }
  0x42   :  { %4826 = shalt.err (!%p4823_p1)
}
  0x43   :  { %94 = dma.hbm_to_vmem [thread:$0]  %s6892_s7, 2048, %s89_s17, [#allocation14], %s4862_s23, %s4862_s23, %s4863_s24  }
  0x44   :  { %4847 = dma.done.wait [#allocation5], 1024  }
  0x45   :  { %4848 = vsyncadd [#allocation5], 4294966272 }
  0x46   :  { %4849 = dma.done.wait [#allocation8], 16384  }
  0x47   :  { %4850 = vsyncadd [#allocation8], 4294950912 }
  0x48   :  { %4851 = dma.done.wait [#allocation11], 16384  }
  0x49   :  { %4852 = vsyncadd [#allocation11], 4294950912 }
  0x4a   :  { %4853 = dma.done.wait [#allocation14], 2048  }
  0x4b   :  { %4854 = vsyncadd [#allocation14], 4294965248  ;;  %v6895_v0 = vmov 0.0   ;;  %v184_v1 = vld [vmem:[#allocation7 + $0x1e8] sm:$0xff]  ;;  %v186_v2 = vld [vmem:[#allocation7 + $0x1f8] sm:$0xff]  ;;  %vm4868_vm0 = vmmov 0  }
  0x4c   :  { %273 = vmatprep.mubr.f32.mxu0 %v6895_v0  ;;  %386 = vmatprep.mubr.f32.mxu1 %v6895_v0  ;;  %v183_v3 = vld [vmem:[#allocation7 + $0x1e0] sm:$0xff]  ;;  %v185_v4 = vld [vmem:[#allocation7 + $0x1f0] sm:$0xff]  ;;  %v180_v5 = vld [vmem:[#allocation7 + $0x1c8] sm:$0xff]  ;;  %s4869_s20 = smov [#allocation15]  }
  0x4d   :  { %209 = vmatprep.subr.mxu0 %v184_v1  ;;  %322 = vmatprep.subr.mxu1 %v186_v2  ;;  %v182_v6 = vld [vmem:[#allocation7 + $0x1d8] sm:$0xff]  ;;  %v179_v7 = vld [vmem:[#allocation7 + $0x1c0] sm:$0xff]  ;;  %v181_v8 = vld [vmem:[#allocation7 + $0x1d0] sm:$0xff]  ;;  %s4254_s21 = sshll.u32 %s4869_s20, 4  ;;  %s4255_s21 = int_to_ptr.vmem [resolvable:$true] %s4254_s21 }
  0x4e   :  { %210 = vmatpush1.msra.mxu0 %v183_v3  ;;  %323 = vmatpush1.msra.mxu1 %v185_v4  ;;  %v176_v9 = vld [vmem:[#allocation7 + $0x1a8] sm:$0xff]  ;;  %v178_v10 = vld [vmem:[#allocation7 + $0x1b8] sm:$0xff]  ;;  %v175_v11 = vld [vmem:[#allocation7 + $0x1a0] sm:$0xff]  ;;  %s4827_s22 = scalar_lea.vmem %s4255_s21, 128  ;;  %p4832_p3 = scmp.lt.s32.totalorder %s4255_s21, %s4255_s21 }
  0x4f   :  { %211 = vmatprep.subr.mxu0 %v180_v5  ;;  %324 = vmatprep.subr.mxu1 %v182_v6  ;;  %v177_v12 = vld [vmem:[#allocation7 + $0x1b0] sm:$0xff]  ;;  %v172_v13 = vld [vmem:[#allocation7 + $0x188] sm:$0xff]  ;;  %v174_v14 = vld [vmem:[#allocation7 + $0x198] sm:$0xff]  ;;  %p4828_p2 = scmp.ne.s32.totalorder %s4255_s21, %s4827_s22  ;;  %p4833_p4 = scmp.lt.s32.totalorder %s4827_s22, %s4827_s22 }
  0x50   :  { %212 = vmatpush1.msra.mxu0 %v179_v7  ;;  %325 = vmatpush1.msra.mxu1 %v181_v8  ;;  %v171_v15 = vld [vmem:[#allocation7 + $0x180] sm:$0xff]  ;;  %v173_v16 = vld [vmem:[#allocation7 + $0x190] sm:$0xff]  ;;  %v168_v17 = vld [vmem:[#allocation7 + $0x168] sm:$0xff] }
  0x51   :  { %213 = vmatprep.subr.mxu0 %v176_v9  ;;  %326 = vmatprep.subr.mxu1 %v178_v10  ;;  %v170_v18 = vld [vmem:[#allocation7 + $0x178] sm:$0xff]  ;;  %v167_v19 = vld [vmem:[#allocation7 + $0x160] sm:$0xff]  ;;  %v169_v20 = vld [vmem:[#allocation7 + $0x170] sm:$0xff]  ;;  %p4834_p5 = por %p4833_p4, %p4832_p3 }
  0x52   :  { %214 = vmatpush1.msra.mxu0 %v175_v11  ;;  %327 = vmatpush1.msra.mxu1 %v177_v12  ;;  %v164_v21 = vld [vmem:[#allocation7 + $0x148] sm:$0xff]  ;;  %v166_v22 = vld [vmem:[#allocation7 + $0x158] sm:$0xff]  ;;  %v163_v23 = vld [vmem:[#allocation7 + $0x140] sm:$0xff] }
  0x53   :  { %215 = vmatprep.subr.mxu0 %v172_v13  ;;  %328 = vmatprep.subr.mxu1 %v174_v14  ;;  %v165_v24 = vld [vmem:[#allocation7 + $0x150] sm:$0xff]  ;;  %v160_v25 = vld [vmem:[#allocation7 + $0x128] sm:$0xff]  ;;  %v162_v26 = vld [vmem:[#allocation7 + $0x138] sm:$0xff]  ;;  %p4835_p6 = pnand %p4834_p5, %p4828_p2 }
  0x54   :  { %216 = vmatpush1.msra.mxu0 %v171_v15  ;;  %329 = vmatpush1.msra.mxu1 %v173_v16  ;;  %v159_v27 = vld [vmem:[#allocation7 + $0x120] sm:$0xff]  ;;  %v161_v28 = vld [vmem:[#allocation7 + $0x130] sm:$0xff]  ;;  %v156_v29 = vld [vmem:[#allocation7 + $0x108] sm:$0xff] }
  0x55   :  { %217 = vmatprep.subr.mxu0 %v168_v17  ;;  %330 = vmatprep.subr.mxu1 %v170_v18  ;;  %v158_v30 = vld [vmem:[#allocation7 + $0x118] sm:$0xff]  ;;  %v155_v31 = vld [vmem:[#allocation7 + $0x100] sm:$0xff]  ;;  %v157_v32 = vld [vmem:[#allocation7 + $0x110] sm:$0xff] }
  0x56   :  { %218 = vmatpush1.msra.mxu0 %v167_v19  ;;  %331 = vmatpush1.msra.mxu1 %v169_v20  ;;  %v152_v33 = vld [vmem:[#allocation7 + $0xe8] sm:$0xff]  ;;  %v154_v34 = vld [vmem:[#allocation7 + $0xf8] sm:$0xff]  ;;  %v151_v35 = vld [vmem:[#allocation7 + $0xe0] sm:$0xff] }
  0x57   :  { %219 = vmatprep.subr.mxu0 %v164_v21  ;;  %332 = vmatprep.subr.mxu1 %v166_v22  ;;  %v153_v36 = vld [vmem:[#allocation7 + $0xf0] sm:$0xff]  ;;  %v148_v37 = vld [vmem:[#allocation7 + $0xc8] sm:$0xff]  ;;  %v150_v38 = vld [vmem:[#allocation7 + $0xd8] sm:$0xff] }
  0x58   :  { %220 = vmatpush1.msra.mxu0 %v163_v23  ;;  %333 = vmatpush1.msra.mxu1 %v165_v24  ;;  %v147_v39 = vld [vmem:[#allocation7 + $0xc0] sm:$0xff]  ;;  %v149_v40 = vld [vmem:[#allocation7 + $0xd0] sm:$0xff]  ;;  %v144_v41 = vld [vmem:[#allocation7 + $0xa8] sm:$0xff] }
  0x59   :  { %221 = vmatprep.subr.mxu0 %v160_v25  ;;  %334 = vmatprep.subr.mxu1 %v162_v26  ;;  %v146_v42 = vld [vmem:[#allocation7 + $0xb8] sm:$0xff]  ;;  %v143_v43 = vld [vmem:[#allocation7 + $0xa0] sm:$0xff]  ;;  %v145_v44 = vld [vmem:[#allocation7 + $0xb0] sm:$0xff] }
  0x5a   :  { %222 = vmatpush1.msra.mxu0 %v159_v27  ;;  %335 = vmatpush1.msra.mxu1 %v161_v28  ;;  %v140_v45 = vld [vmem:[#allocation7 + $0x88] sm:$0xff]  ;;  %v142_v46 = vld [vmem:[#allocation7 + $0x98] sm:$0xff]  ;;  %v139_v47 = vld [vmem:[#allocation7 + $0x80] sm:$0xff] }
  0x5b   :  { %223 = vmatprep.subr.mxu0 %v156_v29  ;;  %336 = vmatprep.subr.mxu1 %v158_v30  ;;  %v141_v48 = vld [vmem:[#allocation7 + $0x90] sm:$0xff]  ;;  %v136_v49 = vld [vmem:[#allocation7 + $0x68] sm:$0xff]  ;;  %v138_v50 = vld [vmem:[#allocation7 + $0x78] sm:$0xff] }
  0x5c   :  { %224 = vmatpush1.msra.mxu0 %v155_v31  ;;  %337 = vmatpush1.msra.mxu1 %v157_v32  ;;  %v135_v51 = vld [vmem:[#allocation7 + $0x60] sm:$0xff]  ;;  %v137_v52 = vld [vmem:[#allocation7 + $0x70] sm:$0xff]  ;;  %v132_v53 = vld [vmem:[#allocation7 + $0x48] sm:$0xff] }
  0x5d   :  { %225 = vmatprep.subr.mxu0 %v152_v33  ;;  %338 = vmatprep.subr.mxu1 %v154_v34  ;;  %v134_v54 = vld [vmem:[#allocation7 + $0x58] sm:$0xff]  ;;  %v131_v55 = vld [vmem:[#allocation7 + $0x40] sm:$0xff]  ;;  %v133_v56 = vld [vmem:[#allocation7 + $0x50] sm:$0xff] }
  0x5e   :  { %226 = vmatpush1.msra.mxu0 %v151_v35  ;;  %339 = vmatpush1.msra.mxu1 %v153_v36  ;;  %v128_v57 = vld [vmem:[#allocation7 + $0x28] sm:$0xff]  ;;  %v130_v58 = vld [vmem:[#allocation7 + $0x38] sm:$0xff]  ;;  %v127_v59 = vld [vmem:[#allocation7 + $0x20] sm:$0xff] }
  0x5f   :  { %227 = vmatprep.subr.mxu0 %v148_v37  ;;  %340 = vmatprep.subr.mxu1 %v150_v38  ;;  %v129_v60 = vld [vmem:[#allocation7 + $0x30] sm:$0xff]  ;;  %v124_v61 = vld [vmem:[#allocation7 + $0x8] sm:$0xff]  ;;  %v126_v62 = vld [vmem:[#allocation7 + $0x18] sm:$0xff] }
  0x60   :  { %228 = vmatpush1.msra.mxu0 %v147_v39  ;;  %341 = vmatpush1.msra.mxu1 %v149_v40  ;;  %v123_v63 = vld [vmem:[#allocation7] sm:$0xff]  ;;  %v125_v1 = vld [vmem:[#allocation7 + $0x10] sm:$0xff]  ;;  %v4958_v3 = vld [vmem:[#allocation9 + $0x1e8] sm:$0xff] }
  0x61   :  { %229 = vmatprep.subr.mxu0 %v144_v41  ;;  %342 = vmatprep.subr.mxu1 %v146_v42  ;;  %v115_v2 = vld [vmem:[#allocation4] sm:$0xff]  ;;  %v4960_v4 = vld [vmem:[#allocation9 + $0x1f8] sm:$0xff]  ;;  %v4964_v6 = vld [vmem:[#allocation9 + $0x1f0] sm:$0xff] }
  0x62   :  { %230 = vmatpush1.msra.mxu0 %v143_v43  ;;  %343 = vmatpush1.msra.mxu1 %v145_v44  ;;  %v4962_v5 = vld [vmem:[#allocation9 + $0x1e0] sm:$0xff]  ;;  %v4966_v7 = vld [vmem:[#allocation9 + $0x1c8] sm:$0xff]  ;;  %v4968_v8 = vld [vmem:[#allocation9 + $0x1d8] sm:$0xff] }
  0x63   :  { %231 = vmatprep.subr.mxu0 %v140_v45  ;;  %344 = vmatprep.subr.mxu1 %v142_v46  ;;  %v4974_v9 = vld [vmem:[#allocation9 + $0x1c0] sm:$0xff]  ;;  %v4976_v10 = vld [vmem:[#allocation9 + $0x1d0] sm:$0xff]  ;;  %v116_v11 = vld [vmem:[#allocation4 + $0x8] sm:$0xff] }
  0x64   :  { %232 = vmatpush1.msra.mxu0 %v139_v47  ;;  %345 = vmatpush1.msra.mxu1 %v141_v48  ;;  %v4982_v12 = vld [vmem:[#allocation9 + $0x1a8] sm:$0xff]  ;;  %v4984_v13 = vld [vmem:[#allocation9 + $0x1b8] sm:$0xff]  ;;  %v4988_v14 = vld [vmem:[#allocation9 + $0x1a0] sm:$0xff] }
  0x65   :  { %233 = vmatprep.subr.mxu0 %v136_v49  ;;  %346 = vmatprep.subr.mxu1 %v138_v50  ;;  %v4990_v15 = vld [vmem:[#allocation9 + $0x1b0] sm:$0xff]  ;;  %v4992_v16 = vld [vmem:[#allocation9 + $0x188] sm:$0xff]  ;;  %v4994_v17 = vld [vmem:[#allocation9 + $0x198] sm:$0xff] }
  0x66   :  { %234 = vmatpush1.msra.mxu0 %v135_v51  ;;  %347 = vmatpush1.msra.mxu1 %v137_v52  ;;  %v5000_v18 = vld [vmem:[#allocation9 + $0x180] sm:$0xff]  ;;  %v5002_v19 = vld [vmem:[#allocation9 + $0x190] sm:$0xff]  ;;  %v5008_v21 = vld [vmem:[#allocation9 + $0x168] sm:$0xff] }
  0x67   :  { %235 = vmatprep.subr.mxu0 %v132_v53  ;;  %348 = vmatprep.subr.mxu1 %v134_v54  ;;  %v117_v20 = vld [vmem:[#allocation4 + $0x10] sm:$0xff]  ;;  %v5010_v22 = vld [vmem:[#allocation9 + $0x178] sm:$0xff]  ;;  %v5014_v23 = vld [vmem:[#allocation9 + $0x160] sm:$0xff] }
  0x68   :  { %236 = vmatpush1.msra.mxu0 %v131_v55  ;;  %349 = vmatpush1.msra.mxu1 %v133_v56  ;;  %v5016_v24 = vld [vmem:[#allocation9 + $0x170] sm:$0xff]  ;;  %v5018_v25 = vld [vmem:[#allocation9 + $0x148] sm:$0xff]  ;;  %v5020_v26 = vld [vmem:[#allocation9 + $0x158] sm:$0xff] }
  0x69   :  { %237 = vmatprep.subr.mxu0 %v128_v57  ;;  %350 = vmatprep.subr.mxu1 %v130_v58  ;;  %v5026_v27 = vld [vmem:[#allocation9 + $0x140] sm:$0xff]  ;;  %v5028_v28 = vld [vmem:[#allocation9 + $0x150] sm:$0xff]  ;;  %v118_v29 = vld [vmem:[#allocation4 + $0x18] sm:$0xff] }
  0x6a   :  { %238 = vmatpush1.msra.mxu0 %v127_v59  ;;  %351 = vmatpush1.msra.mxu1 %v129_v60  ;;  %v5034_v30 = vld [vmem:[#allocation9 + $0x128] sm:$0xff]  ;;  %v5036_v31 = vld [vmem:[#allocation9 + $0x138] sm:$0xff]  ;;  %v5040_v32 = vld [vmem:[#allocation9 + $0x120] sm:$0xff] }
  0x6b   :  { %239 = vmatprep.subr.mxu0 %v124_v61  ;;  %352 = vmatprep.subr.mxu1 %v126_v62  ;;  %v5042_v33 = vld [vmem:[#allocation9 + $0x130] sm:$0xff]  ;;  %v5044_v34 = vld [vmem:[#allocation9 + $0x108] sm:$0xff]  ;;  %v5046_v35 = vld [vmem:[#allocation9 + $0x118] sm:$0xff] }
  0x6c   :  { %240 = vmatpush1.msra.mxu0 %v123_v63  ;;  %353 = vmatpush1.msra.mxu1 %v125_v1  ;;  %v5052_v36 = vld [vmem:[#allocation9 + $0x100] sm:$0xff]  ;;  %v5054_v37 = vld [vmem:[#allocation9 + $0x110] sm:$0xff]  ;;  %v5060_v39 = vld [vmem:[#allocation9 + $0xe8] sm:$0xff] }
  0x6d   :  { %274 = vmatmul.mubr.f32.vlgmr.msra.gmra.mxu0 %v115_v2  ;;  %387 = vmatmul.mubr.f32.vlgmr.msra.gmra.mxu1 %v115_v2  ;;  %v119_v38 = vld [vmem:[#allocation4 + $0x20] sm:$0xff]  ;;  %v5062_v40 = vld [vmem:[#allocation9 + $0xf8] sm:$0xff]  ;;  %v5068_v42 = vld [vmem:[#allocation9 + $0xf0] sm:$0xff] }
  0x6e   :  { %538 = vmatprep.subr.mxu0 %v4958_v3  ;;  %609 = vmatprep.subr.mxu1 %v4960_v4  ;;  %v5066_v41 = vld [vmem:[#allocation9 + $0xe0] sm:$0xff]  ;;  %v5070_v43 = vld [vmem:[#allocation9 + $0xc8] sm:$0xff]  ;;  %v5072_v44 = vld [vmem:[#allocation9 + $0xd8] sm:$0xff] }
  0x6f   :  { %539 = vmatpush1.msra.mxu0 %v4962_v5  ;;  %610 = vmatpush1.msra.mxu1 %v4964_v6  ;;  %v5078_v45 = vld [vmem:[#allocation9 + $0xc0] sm:$0xff]  ;;  %v5080_v46 = vld [vmem:[#allocation9 + $0xd0] sm:$0xff]  ;;  %v120_v47 = vld [vmem:[#allocation4 + $0x28] sm:$0xff] }
  0x70   :  { %540 = vmatprep.subr.mxu0 %v4966_v7  ;;  %611 = vmatprep.subr.mxu1 %v4968_v8  ;;  %v5086_v48 = vld [vmem:[#allocation9 + $0xa8] sm:$0xff]  ;;  %v5088_v49 = vld [vmem:[#allocation9 + $0xb8] sm:$0xff]  ;;  %v5092_v50 = vld [vmem:[#allocation9 + $0xa0] sm:$0xff] }
  0x71   :  { %279 = vmatprep.mubr.f32.mxu0 %v6895_v0  ;;  %392 = vmatprep.mubr.f32.mxu1 %v6895_v0  ;;  %v5094_v51 = vld [vmem:[#allocation9 + $0xb0] sm:$0xff]  ;;  %v5096_v52 = vld [vmem:[#allocation9 + $0x88] sm:$0xff]  ;;  %v5098_v53 = vld [vmem:[#allocation9 + $0x98] sm:$0xff] }
  0x72   :  { %541 = vmatpush1.msra.mxu0 %v4974_v9  ;;  %612 = vmatpush1.msra.mxu1 %v4976_v10  ;;  %7075 = vst [vmem:[#allocation21_spill] sm:$0xff] %v5094_v51  ;;  %7076 = vst [vmem:[#allocation22_spill] sm:$0xff] %v5096_v52  ;;  %v5104_v54 = vld [vmem:[#allocation9 + $0x80] sm:$0xff]  ;;  %v5106_v55 = vld [vmem:[#allocation9 + $0x90] sm:$0xff] }
  0x73   :  { %280 = vmatmul.mubr.f32.gmra.mxu0 %v116_v11  ;;  %393 = vmatmul.mubr.f32.gmra.mxu1 %v116_v11  ;;  %7077 = vst [vmem:[#allocation23_spill] sm:$0xff] %v5098_v53  ;;  %7078 = vst [vmem:[#allocation24_spill] sm:$0xff] %v5104_v54  ;;  %v121_v56 = vld [vmem:[#allocation4 + $0x30] sm:$0xff]  ;;  %v5112_v57 = vld [vmem:[#allocation9 + $0x68] sm:$0xff] }
  0x74   :  { %542 = vmatprep.subr.mxu0 %v4982_v12  ;;  %613 = vmatprep.subr.mxu1 %v4984_v13  ;;  %7079 = vst [vmem:[#allocation25_spill] sm:$0xff] %v5106_v55  ;;  %7080 = vst [vmem:[#allocation26_spill] sm:$0xff] %v5112_v57  ;;  %v5114_v58 = vld [vmem:[#allocation9 + $0x78] sm:$0xff]  ;;  %v5118_v59 = vld [vmem:[#allocation9 + $0x60] sm:$0xff] }
  0x75   :  { %543 = vmatpush1.msra.mxu0 %v4988_v14  ;;  %614 = vmatpush1.msra.mxu1 %v4990_v15  ;;  %7081 = vst [vmem:[#allocation27_spill] sm:$0xff] %v5114_v58  ;;  %7082 = vst [vmem:[#allocation28_spill] sm:$0xff] %v5118_v59  ;;  %v5120_v60 = vld [vmem:[#allocation9 + $0x70] sm:$0xff]  ;;  %v5122_v61 = vld [vmem:[#allocation9 + $0x48] sm:$0xff] }
  0x76   :  { %544 = vmatprep.subr.mxu0 %v4992_v16  ;;  %615 = vmatprep.subr.mxu1 %v4994_v17  ;;  %7083 = vst [vmem:[#allocation29_spill] sm:$0xff] %v5120_v60  ;;  %7084 = vst [vmem:[#allocation30_spill] sm:$0xff] %v5122_v61  ;;  %v5124_v62 = vld [vmem:[#allocation9 + $0x58] sm:$0xff]  ;;  %v5130_v63 = vld [vmem:[#allocation9 + $0x40] sm:$0xff] }
  0x77   :  { %285 = vmatprep.mubr.f32.mxu0 %v6895_v0  ;;  %398 = vmatprep.mubr.f32.mxu1 %v6895_v0  ;;  %7085 = vst [vmem:[#allocation31_spill] sm:$0xff] %v5124_v62  ;;  %7086 = vst [vmem:[#allocation32_spill] sm:$0xff] %v5130_v63  ;;  %v5132_v1 = vld [vmem:[#allocation9 + $0x50] sm:$0xff]  ;;  %v122_v2 = vld [vmem:[#allocation4 + $0x38] sm:$0xff] }
  0x78   :  { %545 = vmatpush1.msra.mxu0 %v5000_v18  ;;  %616 = vmatpush1.msra.mxu1 %v5002_v19  ;;  %7087 = vst [vmem:[#allocation33_spill] sm:$0xff] %v5132_v1  ;;  %v5138_v11 = vld [vmem:[#allocation9 + $0x28] sm:$0xff] }
  0x79   :  { %286 = vmatmul.mubr.f32.gmra.mxu0 %v117_v20  ;;  %399 = vmatmul.mubr.f32.gmra.mxu1 %v117_v20  ;;  %7088 = vst [vmem:[#allocation34_spill] sm:$0xff] %v5138_v11  ;;  %v5140_v20 = vld [vmem:[#allocation9 + $0x38] sm:$0xff] }
  0x7a   :  { %546 = vmatprep.subr.mxu0 %v5008_v21  ;;  %617 = vmatprep.subr.mxu1 %v5010_v22  ;;  %7089 = vst [vmem:[#allocation35_spill] sm:$0xff] %v5140_v20 }
  0x7b   :  { %547 = vmatpush1.msra.mxu0 %v5014_v23  ;;  %618 = vmatpush1.msra.mxu1 %v5016_v24 }
  0x7c   :  { %548 = vmatprep.subr.mxu0 %v5018_v25  ;;  %619 = vmatprep.subr.mxu1 %v5020_v26 }
  0x7d   :  { %291 = vmatprep.mubr.f32.mxu0 %v6895_v0  ;;  %404 = vmatprep.mubr.f32.mxu1 %v6895_v0 }
  0x7e   :  { %549 = vmatpush1.msra.mxu0 %v5026_v27  ;;  %620 = vmatpush1.msra.mxu1 %v5028_v28 }
  0x7f   :  { %292 = vmatmul.mubr.f32.gmra.mxu0 %v118_v29  ;;  %405 = vmatmul.mubr.f32.gmra.mxu1 %v118_v29  ;;  %v5144_v29 = vld [vmem:[#allocation9 + $0x20] sm:$0xff] }
  0x80   :  { %550 = vmatprep.subr.mxu0 %v5034_v30  ;;  %621 = vmatprep.subr.mxu1 %v5036_v31  ;;  %7090 = vst [vmem:[#allocation36_spill] sm:$0xff] %v5144_v29 }
  0x81   :  { %551 = vmatpush1.msra.mxu0 %v5040_v32  ;;  %622 = vmatpush1.msra.mxu1 %v5042_v33 }
  0x82   :  { %552 = vmatprep.subr.mxu0 %v5044_v34  ;;  %623 = vmatprep.subr.mxu1 %v5046_v35 }
  0x83   :  { %297 = vmatprep.mubr.f32.mxu0 %v6895_v0  ;;  %410 = vmatprep.mubr.f32.mxu1 %v6895_v0 }
  0x84   :  { %553 = vmatpush1.msra.mxu0 %v5052_v36  ;;  %624 = vmatpush1.msra.mxu1 %v5054_v37 }
  0x85   :  { %298 = vmatmul.mubr.f32.gmra.mxu0 %v119_v38  ;;  %411 = vmatmul.mubr.f32.gmra.mxu1 %v119_v38  ;;  %v5146_v38 = vld [vmem:[#allocation9 + $0x30] sm:$0xff] }
  0x86   :  { %554 = vmatprep.subr.mxu0 %v5060_v39  ;;  %625 = vmatprep.subr.mxu1 %v5062_v40  ;;  %7091 = vst [vmem:[#allocation37_spill] sm:$0xff] %v5146_v38 }
  0x87   :  { %555 = vmatpush1.msra.mxu0 %v5066_v41  ;;  %626 = vmatpush1.msra.mxu1 %v5068_v42 }
  0x88   :  { %556 = vmatprep.subr.mxu0 %v5070_v43  ;;  %627 = vmatprep.subr.mxu1 %v5072_v44 }
  0x89   :  { %303 = vmatprep.mubr.f32.mxu0 %v6895_v0  ;;  %416 = vmatprep.mubr.f32.mxu1 %v6895_v0 }
  0x8a   :  { %557 = vmatpush1.msra.mxu0 %v5078_v45  ;;  %628 = vmatpush1.msra.mxu1 %v5080_v46 }
  0x8b   :  { %304 = vmatmul.mubr.f32.gmra.mxu0 %v120_v47  ;;  %417 = vmatmul.mubr.f32.gmra.mxu1 %v120_v47  ;;  %v5148_v47 = vld [vmem:[#allocation9 + $0x8] sm:$0xff] }
  0x8c   :  { %558 = vmatprep.subr.mxu0 %v5086_v48  ;;  %629 = vmatprep.subr.mxu1 %v5088_v49  ;;  %7092 = vst [vmem:[#allocation38_spill] sm:$0xff] %v5148_v47 }
  0x8d   :  { %559 = vmatpush1.msra.mxu0 %v5092_v50  ;;  %630 = vmatpush1.msra.mxu1 %v5094_v51 }
  0x8e   :  { %560 = vmatprep.subr.mxu0 %v5096_v52  ;;  %631 = vmatprep.subr.mxu1 %v5098_v53 }
  0x8f   :  { %309 = vmatprep.mubr.f32.mxu0 %v6895_v0  ;;  %422 = vmatprep.mubr.f32.mxu1 %v6895_v0 }
  0x90   :  { %561 = vmatpush1.msra.mxu0 %v5104_v54  ;;  %632 = vmatpush1.msra.mxu1 %v5106_v55 }
  0x91   :  { %310 = vmatmul.mubr.f32.gmra.mxu0 %v121_v56  ;;  %423 = vmatmul.mubr.f32.gmra.mxu1 %v121_v56  ;;  %v5150_v56 = vld [vmem:[#allocation9 + $0x18] sm:$0xff] }
  0x92   :  { %562 = vmatprep.subr.mxu0 %v5112_v57  ;;  %633 = vmatprep.subr.mxu1 %v5114_v58  ;;  %7093 = vst [vmem:[#allocation39_spill] sm:$0xff] %v5150_v56 }
  0x93   :  { %563 = vmatpush1.msra.mxu0 %v5118_v59  ;;  %634 = vmatpush1.msra.mxu1 %v5120_v60 }
  0x94   :  { %564 = vmatprep.subr.mxu0 %v5122_v61  ;;  %635 = vmatprep.subr.mxu1 %v5124_v62 }
  0x95   :  { %315 = vmatprep.mubr.f32.mxu0 %v6895_v0  ;;  %428 = vmatprep.mubr.f32.mxu1 %v6895_v0  ;;  %v5154_v0 = vld [vmem:[#allocation9] sm:$0xff] }
  0x96   :  { %565 = vmatpush1.msra.mxu0 %v5130_v63  ;;  %636 = vmatpush1.msra.mxu1 %v5132_v1  ;;  %7094 = vst [vmem:[#allocation40_spill] sm:$0xff] %v5154_v0  ;;  %v5158_v1 = vld [vmem:[#allocation9 + $0x10] sm:$0xff] }
  0x97   :  { %316 = vmatmul.mubr.f32.gmra.mxu0 %v122_v2  ;;  %429 = vmatmul.mubr.f32.gmra.mxu1 %v122_v2  ;;  %7095 = vst [vmem:[#allocation41_spill] sm:$0xff] %v5158_v1  ;;  %v7096_v2 = vmov 0.0  }
  0x98   :  { %566 = vmatprep.subr.mxu0 %v5138_v11  ;;  %637 = vmatprep.subr.mxu1 %v5140_v20 }
  0x99   :  { %567 = vmatpush1.msra.mxu0 %v5144_v29  ;;  %638 = vmatpush1.msra.mxu1 %v5146_v38 }
  0x9a   :  { %568 = vmatprep.subr.mxu0 %v5148_v47  ;;  %639 = vmatprep.subr.mxu1 %v5150_v56 }
  0x9b   :  { %569 = vmatpush1.msra.mxu0 %v5154_v0  ;;  %602 = vmatprep.mubr.f32.mxu0 %v7096_v2 }
  0x9c   :  { %640 = vmatpush1.msra.mxu1 %v5158_v1  ;;  %673 = vmatprep.mubr.f32.mxu1 %v7096_v2 }
  0x9d   :  { %603 = vmatmul.mubr.f32.vlgmr.msra.gmra.mxu0 %v7096_v2  ;;  %674 = vmatmul.mubr.f32.vlgmr.msra.gmra.mxu1 %v7096_v2 }
  0x9e   :  { %776 = vmatprep.subr.mxu0 %v4958_v3  ;;  %847 = vmatprep.subr.mxu1 %v4960_v4 }
  0x9f   :  { %777 = vmatpush1.msra.mxu0 %v4962_v5  ;;  %848 = vmatpush1.msra.mxu1 %v4964_v6 }
  0xa0   :  { %778 = vmatprep.subr.mxu0 %v4966_v7  ;;  %849 = vmatprep.subr.mxu1 %v4968_v8 }
  0xa1   :  { %779 = vmatpush1.msra.mxu0 %v4974_v9  ;;  %850 = vmatpush1.msra.mxu1 %v4976_v10 }
  0xa2   :  { %780 = vmatprep.subr.mxu0 %v4982_v12  ;;  %851 = vmatprep.subr.mxu1 %v4984_v13 }
  0xa3   :  { %781 = vmatpush1.msra.mxu0 %v4988_v14  ;;  %852 = vmatpush1.msra.mxu1 %v4990_v15 }
  0xa4   :  { %782 = vmatprep.subr.mxu0 %v4992_v16  ;;  %853 = vmatprep.subr.mxu1 %v4994_v17 }
  0xa5   :  { %783 = vmatpush1.msra.mxu0 %v5000_v18  ;;  %854 = vmatpush1.msra.mxu1 %v5002_v19 }
  0xa6   :  { %784 = vmatprep.subr.mxu0 %v5008_v21  ;;  %855 = vmatprep.subr.mxu1 %v5010_v22 }
  0xa7   :  { %785 = vmatpush1.msra.mxu0 %v5014_v23  ;;  %856 = vmatpush1.msra.mxu1 %v5016_v24 }
  0xa8   :  { %786 = vmatprep.subr.mxu0 %v5018_v25  ;;  %857 = vmatprep.subr.mxu1 %v5020_v26 }
  0xa9   :  { %787 = vmatpush1.msra.mxu0 %v5026_v27  ;;  %858 = vmatpush1.msra.mxu1 %v5028_v28 }
  0xaa   :  { %788 = vmatprep.subr.mxu0 %v5034_v30  ;;  %859 = vmatprep.subr.mxu1 %v5036_v31 }
  0xab   :  { %789 = vmatpush1.msra.mxu0 %v5040_v32  ;;  %860 = vmatpush1.msra.mxu1 %v5042_v33 }
  0xac   :  { %790 = vmatprep.subr.mxu0 %v5044_v34  ;;  %861 = vmatprep.subr.mxu1 %v5046_v35 }
  0xad   :  { %791 = vmatpush1.msra.mxu0 %v5052_v36  ;;  %862 = vmatpush1.msra.mxu1 %v5054_v37 }
  0xae   :  { %792 = vmatprep.subr.mxu0 %v5060_v39  ;;  %863 = vmatprep.subr.mxu1 %v5062_v40 }
  0xaf   :  { %793 = vmatpush1.msra.mxu0 %v5066_v41  ;;  %864 = vmatpush1.msra.mxu1 %v5068_v42 }
  0xb0   :  { %794 = vmatprep.subr.mxu0 %v5070_v43  ;;  %865 = vmatprep.subr.mxu1 %v5072_v44 }
  0xb1   :  { %795 = vmatpush1.msra.mxu0 %v5078_v45  ;;  %866 = vmatpush1.msra.mxu1 %v5080_v46 }
  0xb2   :  { %796 = vmatprep.subr.mxu0 %v5086_v48  ;;  %867 = vmatprep.subr.mxu1 %v5088_v49 }
  0xb3   :  { %797 = vmatpush1.msra.mxu0 %v5092_v50  ;;  %868 = vmatpush1.msra.mxu1 %v5094_v51 }
  0xb4   :  { %798 = vmatprep.subr.mxu0 %v5096_v52  ;;  %869 = vmatprep.subr.mxu1 %v5098_v53  ;;  %v7097_v52 = vld [vmem:[#allocation33_spill] sm:$0xff] }
  0xb5   :  { %799 = vmatpush1.msra.mxu0 %v5104_v54  ;;  %870 = vmatpush1.msra.mxu1 %v5106_v55 }
  0xb6   :  { %800 = vmatprep.subr.mxu0 %v5112_v57  ;;  %871 = vmatprep.subr.mxu1 %v5114_v58 }
  0xb7   :  { %801 = vmatpush1.msra.mxu0 %v5118_v59  ;;  %872 = vmatpush1.msra.mxu1 %v5120_v60 }
  0xb8   :  { %802 = vmatprep.subr.mxu0 %v5122_v61  ;;  %873 = vmatprep.subr.mxu1 %v5124_v62 }
  0xb9   :  { %803 = vmatpush1.msra.mxu0 %v5130_v63  ;;  %874 = vmatpush1.msra.mxu1 %v7097_v52 }
  0xba   :  { %804 = vmatprep.subr.mxu0 %v5138_v11  ;;  %875 = vmatprep.subr.mxu1 %v5140_v20  ;;  %v189_v20 = vlaneseq }
  0xbb   :  { %805 = vmatpush1.msra.mxu0 %v5144_v29  ;;  %876 = vmatpush1.msra.mxu1 %v5146_v38 }
  0xbc   :  { %806 = vmatprep.subr.mxu0 %v5148_v47  ;;  %877 = vmatprep.subr.mxu1 %v5150_v56  ;;  %v5236_v29 = vshrl.u32 %v189_v20, 7 }
  0xbd   :  { %807 = vmatpush1.msra.mxu0 %v5154_v0  ;;  %840 = vmatprep.mubr.f32.mxu0 %v7096_v2 }
  0xbe   :  { %878 = vmatpush1.msra.mxu1 %v5158_v1  ;;  %911 = vmatprep.mubr.f32.mxu1 %v7096_v2  ;;  %7098 = vst [vmem:[#allocation42_spill] sm:$0xff] %v5236_v29  ;;  %v6916_v56 = vsub.s32 0, %v5236_v29  ;;  %v6918_v0 = vsub.s32 2, %v5236_v29  ;;  %v187_v1 = vld [vmem:[%s6888_s3] sm:$0xf]  ;;  %v6923_v20 = vsub.s32 3, %v5236_v29 }
  0xbf   :  { %1015 = vmatprep.subr.mxu0 %v4958_v3  ;;  %1086 = vmatprep.subr.mxu1 %v4960_v4  ;;  %v6922_v4 = vsub.s32 1, %v5236_v29 }
  0xc0   :  { %v192_v11 = vrot.slane %v187_v1, %v6916_v56  ;;  %v5257_v52 = vrot.slane %v187_v1, %v6918_v0  ;;  %v5263_v60 = vrot.slane %v187_v1, %v6923_v20 }
  0xc1   :  { %v196_v61 = vrot.slane %v187_v1, %v6922_v4 }
 0x12d   :  { %v5238_v38 = vpop.f32.mrf.mxu0  ;;  %v5240_v47 = vpop.f32.mrf.mxu1 }
 0x12f   :  { %v5247_v2 = vpop.f32.mrf.mxu0  ;;  %v5249_v3 = vpop.f32.mrf.mxu1 }
 0x133   :  { %v281_v63 = vpop.f32.mrf.mxu0  ;;  %v394_v62 = vpop.f32.mrf.mxu1 }
 0x134   :  { %v5265_v59 = vadd.f32 %v281_v63, %v192_v11  ;;  %v5268_v58 = vadd.f32 %v394_v62, %v5257_v52 }
 0x135   :  { %v283_v57 = vpop.f32.mrf.mxu0  ;;  %v396_v56 = vpop.f32.mrf.mxu1 }
 0x136   :  { %7099 = vst [vmem:[#allocation43_spill] sm:$0xff] %v5268_v58  ;;  %v5270_v55 = vadd.f32 %v283_v57, %v196_v61  ;;  %v5273_v0 = vadd.f32 %v396_v56, %v5263_v60 }
 0x138   :  { %7100 = vst [vmem:[#allocation44_spill] sm:$0xff] %v5270_v55  ;;  %7101 = vst [vmem:[#allocation45_spill] sm:$0xff] %v5273_v0 }
 0x139   :  { %v287_v54 = vpop.f32.mrf.mxu0  ;;  %v400_v53 = vpop.f32.mrf.mxu1 }
 0x13a   :  { %v5275_v51 = vadd.f32 %v287_v54, %v192_v11  ;;  %v5278_v4 = vadd.f32 %v400_v53, %v5257_v52 }
 0x13b   :  { %v289_v1 = vpop.f32.mrf.mxu0  ;;  %v402_v63 = vpop.f32.mrf.mxu1 }
 0x13c   :  { %7102 = vst [vmem:[#allocation46_spill] sm:$0xff] %v5275_v51  ;;  %7103 = vst [vmem:[#allocation47_spill] sm:$0xff] %v5278_v4  ;;  %v5280_v20 = vadd.f32 %v289_v1, %v196_v61  ;;  %v5283_v62 = vadd.f32 %v402_v63, %v5263_v60 }
 0x13e   :  { %7104 = vst [vmem:[#allocation48_spill] sm:$0xff] %v5280_v20  ;;  %7105 = vst [vmem:[#allocation49_spill] sm:$0xff] %v5283_v62 }
 0x13f   :  { %v293_v29 = vpop.f32.mrf.mxu0  ;;  %v406_v57 = vpop.f32.mrf.mxu1 }
 0x140   :  { %v5285_v58 = vadd.f32 %v293_v29, %v192_v11  ;;  %v5288_v56 = vadd.f32 %v406_v57, %v5257_v52 }
 0x141   :  { %v295_v0 = vpop.f32.mrf.mxu0  ;;  %v408_v54 = vpop.f32.mrf.mxu1 }
 0x142   :  { %7106 = vst [vmem:[#allocation50_spill] sm:$0xff] %v5285_v58  ;;  %7107 = vst [vmem:[#allocation51_spill] sm:$0xff] %v5288_v56  ;;  %v5290_v51 = vadd.f32 %v295_v0, %v196_v61  ;;  %v5293_v53 = vadd.f32 %v408_v54, %v5263_v60 }
 0x144   :  { %7108 = vst [vmem:[#allocation52_spill] sm:$0xff] %v5290_v51  ;;  %7109 = vst [vmem:[#allocation53_spill] sm:$0xff] %v5293_v53 }
 0x145   :  { %v299_v4 = vpop.f32.mrf.mxu0  ;;  %v412_v1 = vpop.f32.mrf.mxu1 }
 0x146   :  { %v5295_v20 = vadd.f32 %v299_v4, %v192_v11  ;;  %v5298_v63 = vadd.f32 %v412_v1, %v5257_v52 }
 0x147   :  { %v301_v62 = vpop.f32.mrf.mxu0  ;;  %v414_v29 = vpop.f32.mrf.mxu1 }
 0x148   :  { %7110 = vst [vmem:[#allocation54_spill] sm:$0xff] %v5295_v20  ;;  %7111 = vst [vmem:[#allocation55_spill] sm:$0xff] %v5298_v63  ;;  %v5300_v58 = vadd.f32 %v301_v62, %v196_v61  ;;  %v5303_v57 = vadd.f32 %v414_v29, %v5263_v60 }
 0x14a   :  { %7112 = vst [vmem:[#allocation56_spill] sm:$0xff] %v5300_v58  ;;  %7113 = vst [vmem:[#allocation57_spill] sm:$0xff] %v5303_v57 }
 0x14b   :  { %v305_v56 = vpop.f32.mrf.mxu0  ;;  %v418_v0 = vpop.f32.mrf.mxu1 }
 0x14c   :  { %v5305_v51 = vadd.f32 %v305_v56, %v192_v11  ;;  %v5308_v54 = vadd.f32 %v418_v0, %v5257_v52 }
 0x14d   :  { %v307_v53 = vpop.f32.mrf.mxu0  ;;  %v420_v4 = vpop.f32.mrf.mxu1 }
 0x14e   :  { %7114 = vst [vmem:[#allocation58_spill] sm:$0xff] %v5305_v51  ;;  %7115 = vst [vmem:[#allocation59_spill] sm:$0xff] %v5308_v54  ;;  %v5310_v20 = vadd.f32 %v307_v53, %v196_v61  ;;  %v5313_v1 = vadd.f32 %v420_v4, %v5263_v60 }
 0x150   :  { %7116 = vst [vmem:[#allocation60_spill] sm:$0xff] %v5310_v20  ;;  %7117 = vst [vmem:[#allocation61_spill] sm:$0xff] %v5313_v1 }
 0x151   :  { %v311_v63 = vpop.f32.mrf.mxu0  ;;  %v424_v62 = vpop.f32.mrf.mxu1 }
 0x152   :  { %v5315_v58 = vadd.f32 %v311_v63, %v192_v11  ;;  %v5318_v29 = vadd.f32 %v424_v62, %v5257_v52 }
 0x153   :  { %v313_v57 = vpop.f32.mrf.mxu0  ;;  %v426_v56 = vpop.f32.mrf.mxu1 }
 0x154   :  { %7118 = vst [vmem:[#allocation62_spill] sm:$0xff] %v5315_v58  ;;  %7119 = vst [vmem:[#allocation63_spill] sm:$0xff] %v5318_v29  ;;  %v5320_v51 = vadd.f32 %v313_v57, %v196_v61  ;;  %v5323_v0 = vadd.f32 %v426_v56, %v5263_v60  ;;  %v276_v57 = vadd.f32 %v5238_v38, %v192_v11 }
 0x155   :  { %v278_v56 = vadd.f32 %v5247_v2, %v196_v61 }
 0x156   :  { %7120 = vst [vmem:[#allocation64_spill] sm:$0xff] %v5320_v51  ;;  %7121 = vst [vmem:[#allocation65_spill] sm:$0xff] %v5323_v0 }
 0x157   :  { %v317_v54 = vpop.f32.mrf.mxu0  ;;  %v430_v53 = vpop.f32.mrf.mxu1 }
 0x158   :  { %v5325_v20 = vadd.f32 %v317_v54, %v192_v11  ;;  %v5328_v4 = vadd.f32 %v430_v53, %v5257_v52 }
 0x159   :  { %v319_v1 = vpop.f32.mrf.mxu0  ;;  %v432_v63 = vpop.f32.mrf.mxu1 }
 0x15a   :  { %7122 = vst [vmem:[#allocation66_spill] sm:$0xff] %v5325_v20  ;;  %7123 = vst [vmem:[#allocation67_spill] sm:$0xff] %v5328_v4  ;;  %v5330_v58 = vadd.f32 %v319_v1, %v196_v61  ;;  %v5333_v62 = vadd.f32 %v432_v63, %v5263_v60  ;;  %v391_v1 = vadd.f32 %v5249_v3, %v5263_v60 }
 0x15b   :  { %v389_v63 = vadd.f32 %v5240_v47, %v5257_v52 }
 0x15c   :  { %7124 = vst [vmem:[#allocation68_spill] sm:$0xff] %v5330_v58  ;;  %7125 = vst [vmem:[#allocation69_spill] sm:$0xff] %v5333_v62 }
 0x15d   :  { %v604_v29 = vpop.f32.mrf.mxu0  ;;  %v675_v20 = vpop.f32.mrf.mxu1 }
 0x15e   :  { %v605_v0 = vadd.f32 %v604_v29, %v276_v57  ;;  %v676_v62 = vadd.f32 %v675_v20, %v389_v63 }
 0x15f   :  { %v606_v51 = vpop.f32.mrf.mxu0  ;;  %v677_v4 = vpop.f32.mrf.mxu1 }
 0x160   :  { %v4273_v55 = vmul.f32 -1.442695, %v605_v0  ;;  %v607_v54 = vadd.f32 %v606_v51, %v278_v56  ;;  %v678_v58 = vadd.f32 %v677_v4, %v391_v1 }
 0x162   :  { %4387 = vpow2.f32 %v4273_v55  ;;  %v4274_v53 = vmul.f32 -1.442695, %v607_v54  ;;  %v4275_v11 = vmul.f32 -1.442695, %v678_v58 }
 0x164   :  { %4389 = vpow2.f32 %v4274_v53 }
 0x165   :  { %4391 = vpow2.f32 %v4275_v11 }
 0x16f   :  { %v4388_v38 = vpop.eup %4387 }
 0x170   :  { %v683_v61 = vadd.f32 1.0, %v4388_v38 }
 0x171   :  { %v4390_v2 = vpop.eup %4389 }
 0x172   :  { %4393 = vrcp.f32 %v683_v61  ;;  %v689_v51 = vadd.f32 1.0, %v4390_v2  ;;  %v4392_v55 = vpop.eup %4391  ;;  %v5426_v2 = vld [vmem:[#allocation9 + $0x1e8] sm:$0xff] }
 0x173   :  { %4395 = vtanh.f32 %v676_v62  ;;  %v696_v56 = vadd.f32 1.0, %v4392_v55  ;;  %v5432_v55 = vld [vmem:[#allocation9 + $0x1e0] sm:$0xff] }
 0x174   :  { %4397 = vrcp.f32 %v689_v51  ;;  %v5428_v51 = vld [vmem:[#allocation9 + $0x1f8] sm:$0xff] }
 0x175   :  { %4399 = vrcp.f32 %v696_v56  ;;  %v5444_v56 = vld [vmem:[#allocation9 + $0x1c0] sm:$0xff] }
 0x17f   :  { %v4394_v29 = vpop.eup %4393 }
 0x180   :  { %v4396_v0 = vpop.eup %4395 }
 0x181   :  { %v4398_v57 = vpop.eup %4397  ;;  %v700_v3 = vmul.f32 %v4396_v0, %v4394_v29  ;;  %v5434_v29 = vld [vmem:[#allocation9 + $0x1f0] sm:$0xff]  ;;  %v5438_v0 = vld [vmem:[#allocation9 + $0x1c8] sm:$0xff] }
 0x182   :  { %v699_v60 = vmul.f32 0.0, %v4398_v57  ;;  %v4400_v52 = vpop.eup %4399  ;;  %v5440_v57 = vld [vmem:[#allocation9 + $0x1d8] sm:$0xff] }
 0x184   :  { %v5341_v4 = vadd.f32 %v700_v3, %v699_v60  ;;  %v5446_v60 = vld [vmem:[#allocation9 + $0x1d0] sm:$0xff]  ;;  %v5450_v3 = vld [vmem:[#allocation9 + $0x1a8] sm:$0xff] }
 0x186   :  { %4401 = vtanh.f32 %v5341_v4 }
 0x193   :  { %v4402_v58 = vpop.eup %4401 }
 0x194   :  { %v5344_v47 = vmul.f32 %v4402_v58, %v4400_v52  ;;  %v5456_v52 = vld [vmem:[#allocation9 + $0x1a0] sm:$0xff]  ;;  %v5458_v58 = vld [vmem:[#allocation9 + $0x1b0] sm:$0xff] }
 0x196   :  { %7126 = vst [vmem:[#allocation70_spill] sm:$0xff] %v5344_v47  ;;  %841 = vmatmul.mubr.f32.vlgmr.msra.gmra.mxu0 %v5344_v47  ;;  %912 = vmatmul.mubr.f32.vlgmr.msra.gmra.mxu1 %v5344_v47  ;;  %v5604_v47 = vld [vmem:[#allocation9 + $0x18] sm:$0xff] }
 0x197   :  { %1016 = vmatpush1.msra.mxu0 %v4962_v5  ;;  %1087 = vmatpush1.msra.mxu1 %v4964_v6  ;;  %v7127_v5 = vld [vmem:[#allocation21_spill] sm:$0xff]  ;;  %v7128_v6 = vld [vmem:[#allocation22_spill] sm:$0xff] }
 0x198   :  { %1017 = vmatprep.subr.mxu0 %v4966_v7  ;;  %1088 = vmatprep.subr.mxu1 %v4968_v8  ;;  %v7129_v7 = vld [vmem:[#allocation23_spill] sm:$0xff]  ;;  %v7130_v8 = vld [vmem:[#allocation24_spill] sm:$0xff]  ;;  %7153 = vst [vmem:[#allocation22_spill] sm:$0xff] %v5426_v2 }
 0x199   :  { %1018 = vmatpush1.msra.mxu0 %v4974_v9  ;;  %1089 = vmatpush1.msra.mxu1 %v4976_v10  ;;  %v7131_v9 = vld [vmem:[#allocation25_spill] sm:$0xff]  ;;  %v7132_v10 = vld [vmem:[#allocation26_spill] sm:$0xff]  ;;  %7154 = vst [vmem:[#allocation23_spill] sm:$0xff] %v5428_v51 }
 0x19a   :  { %1019 = vmatprep.subr.mxu0 %v4982_v12  ;;  %1090 = vmatprep.subr.mxu1 %v4984_v13  ;;  %v7133_v12 = vld [vmem:[#allocation27_spill] sm:$0xff]  ;;  %v7134_v13 = vld [vmem:[#allocation28_spill] sm:$0xff] }
 0x19b   :  { %1020 = vmatpush1.msra.mxu0 %v4988_v14  ;;  %1091 = vmatpush1.msra.mxu1 %v4990_v15  ;;  %v7135_v14 = vld [vmem:[#allocation29_spill] sm:$0xff]  ;;  %v7136_v15 = vld [vmem:[#allocation30_spill] sm:$0xff] }
 0x19c   :  { %1021 = vmatprep.subr.mxu0 %v4992_v16  ;;  %1092 = vmatprep.subr.mxu1 %v4994_v17  ;;  %v7137_v16 = vld [vmem:[#allocation31_spill] sm:$0xff]  ;;  %v7138_v17 = vld [vmem:[#allocation32_spill] sm:$0xff] }
 0x19d   :  { %1022 = vmatpush1.msra.mxu0 %v5000_v18  ;;  %1093 = vmatpush1.msra.mxu1 %v5002_v19  ;;  %v7139_v18 = vld [vmem:[#allocation33_spill] sm:$0xff]  ;;  %v7140_v19 = vld [vmem:[#allocation34_spill] sm:$0xff] }
 0x19e   :  { %1023 = vmatprep.subr.mxu0 %v5008_v21  ;;  %1094 = vmatprep.subr.mxu1 %v5010_v22  ;;  %v7141_v21 = vld [vmem:[#allocation35_spill] sm:$0xff]  ;;  %v7142_v22 = vld [vmem:[#allocation36_spill] sm:$0xff] }
 0x19f   :  { %1024 = vmatpush1.msra.mxu0 %v5014_v23  ;;  %1095 = vmatpush1.msra.mxu1 %v5016_v24  ;;  %v7143_v23 = vld [vmem:[#allocation37_spill] sm:$0xff]  ;;  %v7144_v24 = vld [vmem:[#allocation38_spill] sm:$0xff] }
 0x1a0   :  { %1025 = vmatprep.subr.mxu0 %v5018_v25  ;;  %1096 = vmatprep.subr.mxu1 %v5020_v26  ;;  %v7145_v25 = vld [vmem:[#allocation39_spill] sm:$0xff]  ;;  %v7146_v26 = vld [vmem:[#allocation40_spill] sm:$0xff]  ;;  %7169 = vst [vmem:[#allocation38_spill] sm:$0xff] %v5604_v47 }
 0x1a1   :  { %1026 = vmatpush1.msra.mxu0 %v5026_v27  ;;  %1097 = vmatpush1.msra.mxu1 %v5028_v28  ;;  %v7147_v27 = vmov 0.0   ;;  %v7148_v28 = vld [vmem:[#allocation41_spill] sm:$0xff] }
 0x1a2   :  { %1027 = vmatprep.subr.mxu0 %v5034_v30  ;;  %1098 = vmatprep.subr.mxu1 %v5036_v31 }
 0x1a3   :  { %1028 = vmatpush1.msra.mxu0 %v5040_v32  ;;  %1099 = vmatpush1.msra.mxu1 %v5042_v33 }
 0x1a4   :  { %1029 = vmatprep.subr.mxu0 %v5044_v34  ;;  %1100 = vmatprep.subr.mxu1 %v5046_v35  ;;  %v7149_v34 = vld [vmem:[#allocation44_spill] sm:$0xff] }
 0x1a5   :  { %1030 = vmatpush1.msra.mxu0 %v5052_v36  ;;  %1101 = vmatpush1.msra.mxu1 %v5054_v37 }
 0x1a6   :  { %1031 = vmatprep.subr.mxu0 %v5060_v39  ;;  %1102 = vmatprep.subr.mxu1 %v5062_v40  ;;  %v7150_v40 = vld [vmem:[#allocation45_spill] sm:$0xff] }
 0x1a7   :  { %1032 = vmatpush1.msra.mxu0 %v5066_v41  ;;  %1103 = vmatpush1.msra.mxu1 %v5068_v42  ;;  %v7151_v42 = vld [vmem:[#allocation43_spill] sm:$0xff] }
 0x1a8   :  { %1033 = vmatprep.subr.mxu0 %v5070_v43  ;;  %1104 = vmatprep.subr.mxu1 %v5072_v44 }
 0x1a9   :  { %1034 = vmatpush1.msra.mxu0 %v5078_v45  ;;  %1105 = vmatpush1.msra.mxu1 %v5080_v46 }
 0x1aa   :  { %1035 = vmatprep.subr.mxu0 %v5086_v48  ;;  %1106 = vmatprep.subr.mxu1 %v5088_v49 }
 0x1ab   :  { %1036 = vmatpush1.msra.mxu0 %v5092_v50  ;;  %1107 = vmatpush1.msra.mxu1 %v7127_v5  ;;  %v5462_v5 = vld [vmem:[#allocation9 + $0x188] sm:$0xff] }
 0x1ac   :  { %1037 = vmatprep.subr.mxu0 %v7128_v6  ;;  %1108 = vmatprep.subr.mxu1 %v7129_v7  ;;  %v5464_v6 = vld [vmem:[#allocation9 + $0x198] sm:$0xff]  ;;  %v5468_v7 = vld [vmem:[#allocation9 + $0x180] sm:$0xff] }
 0x1ad   :  { %1038 = vmatpush1.msra.mxu0 %v7130_v8  ;;  %1109 = vmatpush1.msra.mxu1 %v7131_v9  ;;  %v5470_v8 = vld [vmem:[#allocation9 + $0x190] sm:$0xff]  ;;  %v5474_v9 = vld [vmem:[#allocation9 + $0x168] sm:$0xff] }
 0x1ae   :  { %1039 = vmatprep.subr.mxu0 %v7132_v10  ;;  %1110 = vmatprep.subr.mxu1 %v7133_v12  ;;  %v5476_v10 = vld [vmem:[#allocation9 + $0x178] sm:$0xff]  ;;  %v5480_v12 = vld [vmem:[#allocation9 + $0x160] sm:$0xff] }
 0x1af   :  { %1040 = vmatpush1.msra.mxu0 %v7134_v13  ;;  %1111 = vmatpush1.msra.mxu1 %v7135_v14  ;;  %v5482_v13 = vld [vmem:[#allocation9 + $0x170] sm:$0xff]  ;;  %v5486_v14 = vld [vmem:[#allocation9 + $0x148] sm:$0xff] }
 0x1b0   :  { %1041 = vmatprep.subr.mxu0 %v7136_v15  ;;  %1112 = vmatprep.subr.mxu1 %v7137_v16  ;;  %v5488_v15 = vld [vmem:[#allocation9 + $0x158] sm:$0xff]  ;;  %v5492_v16 = vld [vmem:[#allocation9 + $0x140] sm:$0xff] }
 0x1b1   :  { %1042 = vmatpush1.msra.mxu0 %v7138_v17  ;;  %1113 = vmatpush1.msra.mxu1 %v7139_v18  ;;  %v5494_v17 = vld [vmem:[#allocation9 + $0x150] sm:$0xff]  ;;  %v5498_v18 = vld [vmem:[#allocation9 + $0x128] sm:$0xff] }
 0x1b2   :  { %1043 = vmatprep.subr.mxu0 %v7140_v19  ;;  %1114 = vmatprep.subr.mxu1 %v7141_v21  ;;  %v5500_v19 = vld [vmem:[#allocation9 + $0x138] sm:$0xff]  ;;  %v5504_v21 = vld [vmem:[#allocation9 + $0x120] sm:$0xff] }
 0x1b3   :  { %1044 = vmatpush1.msra.mxu0 %v7142_v22  ;;  %1115 = vmatpush1.msra.mxu1 %v7143_v23  ;;  %v5506_v22 = vld [vmem:[#allocation9 + $0x130] sm:$0xff]  ;;  %v5510_v23 = vld [vmem:[#allocation9 + $0x108] sm:$0xff] }
 0x1b4   :  { %1045 = vmatprep.subr.mxu0 %v7144_v24  ;;  %1116 = vmatprep.subr.mxu1 %v7145_v25  ;;  %v5512_v24 = vld [vmem:[#allocation9 + $0x118] sm:$0xff]  ;;  %v5514_v25 = vld [vmem:[#allocation9 + $0x100] sm:$0xff] }
 0x1b5   :  { %1046 = vmatpush1.msra.mxu0 %v7146_v26  ;;  %1079 = vmatprep.mubr.f32.mxu0 %v7147_v27  ;;  %v5518_v26 = vld [vmem:[#allocation9 + $0x110] sm:$0xff] }
 0x1b6   :  { %1117 = vmatpush1.msra.mxu1 %v7148_v28  ;;  %1150 = vmatprep.mubr.f32.mxu1 %v7147_v27  ;;  %v5520_v28 = vld [vmem:[#allocation9 + $0xe8] sm:$0xff] }
 0x1b7   :  { %1254 = vmatprep.subr.mxu0 %v5426_v2  ;;  %1325 = vmatprep.subr.mxu1 %v5428_v51 }
 0x256   :  { %v842_v30 = vpop.f32.mrf.mxu0  ;;  %v913_v36 = vpop.f32.mrf.mxu1 }
 0x257   :  { %v843_v31 = vadd.f32 %v842_v30, %v5265_v59  ;;  %v914_v43 = vadd.f32 %v913_v36, %v7151_v42  ;;  %v5522_v30 = vld [vmem:[#allocation9 + $0xf8] sm:$0xff]  ;;  %v5538_v36 = vld [vmem:[#allocation9 + $0xd0] sm:$0xff]  ;;  %v5554_v42 = vld [vmem:[#allocation9 + $0x88] sm:$0xff] }
 0x258   :  { %v844_v32 = vpop.f32.mrf.mxu0  ;;  %v915_v39 = vpop.f32.mrf.mxu1 }
 0x259   :  { %v4276_v33 = vmul.f32 -1.442695, %v843_v31  ;;  %v845_v35 = vadd.f32 %v844_v32, %v7149_v34  ;;  %v916_v41 = vadd.f32 %v915_v39, %v7150_v40  ;;  %v5526_v31 = vld [vmem:[#allocation9 + $0xe0] sm:$0xff]  ;;  %v5528_v32 = vld [vmem:[#allocation9 + $0xf0] sm:$0xff]  ;;  %v5534_v34 = vld [vmem:[#allocation9 + $0xd8] sm:$0xff] }
 0x25a   :  { %v5544_v39 = vld [vmem:[#allocation9 + $0xb8] sm:$0xff]  ;;  %v5548_v40 = vld [vmem:[#allocation9 + $0xa0] sm:$0xff] }
 0x25b   :  { %4403 = vpow2.f32 %v4276_v33  ;;  %v4277_v37 = vmul.f32 -1.442695, %v845_v35  ;;  %v4278_v44 = vmul.f32 -1.442695, %v916_v41  ;;  %v5530_v33 = vld [vmem:[#allocation9 + $0xc8] sm:$0xff]  ;;  %v5536_v35 = vld [vmem:[#allocation9 + $0xc0] sm:$0xff] }
 0x25c   :  { %v5550_v41 = vld [vmem:[#allocation9 + $0xb0] sm:$0xff] }
 0x25d   :  { %4405 = vpow2.f32 %v4277_v37  ;;  %v5542_v37 = vld [vmem:[#allocation9 + $0xa8] sm:$0xff] }
 0x25e   :  { %4407 = vtanh.f32 %v914_v43  ;;  %v5556_v43 = vld [vmem:[#allocation9 + $0x98] sm:$0xff] }
 0x25f   :  { %4409 = vpow2.f32 %v4278_v44  ;;  %v5560_v44 = vld [vmem:[#allocation9 + $0x80] sm:$0xff] }
 0x268   :  { %v4404_v45 = vpop.eup %4403 }
 0x269   :  { %v921_v46 = vadd.f32 1.0, %v4404_v45  ;;  %v5562_v45 = vld [vmem:[#allocation9 + $0x90] sm:$0xff] }
 0x26a   :  { %v4406_v48 = vpop.eup %4405  ;;  %7155 = vst [vmem:[#allocation24_spill] sm:$0xff] %v5562_v45 }
 0x26b   :  { %4411 = vrcp.f32 %v921_v46  ;;  %v927_v49 = vadd.f32 1.0, %v4406_v48  ;;  %v4408_v50 = vpop.eup %4407  ;;  %v5566_v46 = vld [vmem:[#allocation9 + $0x68] sm:$0xff]  ;;  %v5568_v48 = vld [vmem:[#allocation9 + $0x78] sm:$0xff] }
 0x26c   :  { %v4410_v59 = vpop.eup %4409  ;;  %7156 = vst [vmem:[#allocation25_spill] sm:$0xff] %v5566_v46  ;;  %7157 = vst [vmem:[#allocation26_spill] sm:$0xff] %v5568_v48 }
 0x26d   :  { %4413 = vrcp.f32 %v927_v49  ;;  %v934_v53 = vadd.f32 1.0, %v4410_v59  ;;  %v5572_v49 = vld [vmem:[#allocation9 + $0x60] sm:$0xff]  ;;  %v5578_v59 = vld [vmem:[#allocation9 + $0x48] sm:$0xff] }
 0x26e   :  { %7158 = vst [vmem:[#allocation27_spill] sm:$0xff] %v5572_v49  ;;  %7160 = vst [vmem:[#allocation29_spill] sm:$0xff] %v5578_v59 }
 0x26f   :  { %4415 = vrcp.f32 %v934_v53  ;;  %v5590_v53 = vld [vmem:[#allocation9 + $0x28] sm:$0xff] }
 0x270   :  { %7164 = vst [vmem:[#allocation33_spill] sm:$0xff] %v5590_v53 }
 0x278   :  { %v4412_v20 = vpop.eup %4411 }
 0x279   :  { %v938_v62 = vmul.f32 %v4412_v20, %v4408_v50  ;;  %v5574_v50 = vld [vmem:[#allocation9 + $0x70] sm:$0xff]  ;;  %v5580_v20 = vld [vmem:[#allocation9 + $0x58] sm:$0xff] }
 0x27a   :  { %v4414_v54 = vpop.eup %4413  ;;  %7159 = vst [vmem:[#allocation28_spill] sm:$0xff] %v5574_v50  ;;  %7161 = vst [vmem:[#allocation30_spill] sm:$0xff] %v5580_v20 }
 0x27b   :  { %v937_v1 = vmul.f32 %v4414_v54, %v5341_v4  ;;  %v5452_v4 = vld [vmem:[#allocation9 + $0x1b8] sm:$0xff]  ;;  %v5586_v54 = vld [vmem:[#allocation9 + $0x50] sm:$0xff] }
 0x27c   :  { %v4416_v11 = vpop.eup %4415  ;;  %7163 = vst [vmem:[#allocation32_spill] sm:$0xff] %v5586_v54 }
 0x27d   :  { %v5417_v63 = vadd.f32 %v938_v62, %v937_v1  ;;  %v5584_v62 = vld [vmem:[#allocation9 + $0x40] sm:$0xff]  ;;  %v5592_v1 = vld [vmem:[#allocation9 + $0x38] sm:$0xff] }
 0x27e   :  { %7162 = vst [vmem:[#allocation31_spill] sm:$0xff] %v5584_v62  ;;  %7165 = vst [vmem:[#allocation34_spill] sm:$0xff] %v5592_v1 }
 0x27f   :  { %4417 = vtanh.f32 %v5417_v63 }
 0x28c   :  { %v4418_v38 = vpop.eup %4417 }
 0x28d   :  { %v5420_v61 = vmul.f32 %v4418_v38, %v4416_v11  ;;  %v5596_v11 = vld [vmem:[#allocation9 + $0x20] sm:$0xff]  ;;  %v5598_v38 = vld [vmem:[#allocation9 + $0x30] sm:$0xff] }
 0x28e   :  { %7166 = vst [vmem:[#allocation35_spill] sm:$0xff] %v5596_v11  ;;  %7167 = vst [vmem:[#allocation36_spill] sm:$0xff] %v5598_v38 }
 0x28f   :  { %7152 = vst [vmem:[#allocation21_spill] sm:$0xff] %v5420_v61  ;;  %1080 = vmatmul.mubr.f32.vlgmr.msra.gmra.mxu0 %v5420_v61  ;;  %1151 = vmatmul.mubr.f32.vlgmr.msra.gmra.mxu1 %v5420_v61  ;;  %v5602_v61 = vld [vmem:[#allocation9 + $0x8] sm:$0xff] }
 0x290   :  { %1318 = vmatprep.mubr.f32.mxu0 %v7147_v27  ;;  %1389 = vmatprep.mubr.f32.mxu1 %v7147_v27  ;;  %7168 = vst [vmem:[#allocation37_spill] sm:$0xff] %v5602_v61  ;;  %v5608_v27 = vld [vmem:[#allocation9] sm:$0xff] }
 0x291   :  { %1255 = vmatpush1.msra.mxu0 %v5432_v55  ;;  %1326 = vmatpush1.msra.mxu1 %v5434_v29  ;;  %7170 = vst [vmem:[#allocation39_spill] sm:$0xff] %v5608_v27 }
 0x292   :  { %1256 = vmatprep.subr.mxu0 %v5438_v0  ;;  %1327 = vmatprep.subr.mxu1 %v5440_v57 }
 0x293   :  { %1257 = vmatpush1.msra.mxu0 %v5444_v56  ;;  %1328 = vmatpush1.msra.mxu1 %v5446_v60 }
 0x294   :  { %1258 = vmatprep.subr.mxu0 %v5450_v3  ;;  %1329 = vmatprep.subr.mxu1 %v5452_v4 }
 0x295   :  { %1259 = vmatpush1.msra.mxu0 %v5456_v52  ;;  %1330 = vmatpush1.msra.mxu1 %v5458_v58 }
 0x296   :  { %1260 = vmatprep.subr.mxu0 %v5462_v5  ;;  %1331 = vmatprep.subr.mxu1 %v5464_v6 }
 0x297   :  { %1261 = vmatpush1.msra.mxu0 %v5468_v7  ;;  %1332 = vmatpush1.msra.mxu1 %v5470_v8 }
 0x298   :  { %1262 = vmatprep.subr.mxu0 %v5474_v9  ;;  %1333 = vmatprep.subr.mxu1 %v5476_v10 }
 0x299   :  { %1263 = vmatpush1.msra.mxu0 %v5480_v12  ;;  %1334 = vmatpush1.msra.mxu1 %v5482_v13 }
 0x29a   :  { %1264 = vmatprep.subr.mxu0 %v5486_v14  ;;  %1335 = vmatprep.subr.mxu1 %v5488_v15 }
 0x29b   :  { %1265 = vmatpush1.msra.mxu0 %v5492_v16  ;;  %1336 = vmatpush1.msra.mxu1 %v5494_v17 }
 0x29c   :  { %1266 = vmatprep.subr.mxu0 %v5498_v18  ;;  %1337 = vmatprep.subr.mxu1 %v5500_v19 }
 0x29d   :  { %1267 = vmatpush1.msra.mxu0 %v5504_v21  ;;  %1338 = vmatpush1.msra.mxu1 %v5506_v22 }
 0x29e   :  { %1268 = vmatprep.subr.mxu0 %v5510_v23  ;;  %1339 = vmatprep.subr.mxu1 %v5512_v24 }
 0x29f   :  { %1269 = vmatpush1.msra.mxu0 %v5514_v25  ;;  %1340 = vmatpush1.msra.mxu1 %v5518_v26 }
 0x2a0   :  { %1270 = vmatprep.subr.mxu0 %v5520_v28  ;;  %1341 = vmatprep.subr.mxu1 %v5522_v30 }
 0x2a1   :  { %1271 = vmatpush1.msra.mxu0 %v5526_v31  ;;  %1342 = vmatpush1.msra.mxu1 %v5528_v32 }
 0x2a2   :  { %1272 = vmatprep.subr.mxu0 %v5530_v33  ;;  %1343 = vmatprep.subr.mxu1 %v5534_v34 }
 0x2a3   :  { %1273 = vmatpush1.msra.mxu0 %v5536_v35  ;;  %1344 = vmatpush1.msra.mxu1 %v5538_v36 }
 0x2a4   :  { %1274 = vmatprep.subr.mxu0 %v5542_v37  ;;  %1345 = vmatprep.subr.mxu1 %v5544_v39 }
 0x2a5   :  { %1275 = vmatpush1.msra.mxu0 %v5548_v40  ;;  %1346 = vmatpush1.msra.mxu1 %v5550_v41 }
 0x2a6   :  { %1276 = vmatprep.subr.mxu0 %v5554_v42  ;;  %1347 = vmatprep.subr.mxu1 %v5556_v43 }
 0x2a7   :  { %1277 = vmatpush1.msra.mxu0 %v5560_v44  ;;  %1348 = vmatpush1.msra.mxu1 %v5562_v45 }
 0x2a8   :  { %1278 = vmatprep.subr.mxu0 %v5566_v46  ;;  %1349 = vmatprep.subr.mxu1 %v5568_v48  ;;  %v7175_v48 = vld [vmem:[#allocation47_spill] sm:$0xff] }
 0x2a9   :  { %1279 = vmatpush1.msra.mxu0 %v5572_v49  ;;  %1350 = vmatpush1.msra.mxu1 %v5574_v50  ;;  %v7174_v49 = vld [vmem:[#allocation49_spill] sm:$0xff] }
 0x2aa   :  { %1280 = vmatprep.subr.mxu0 %v5578_v59  ;;  %1351 = vmatprep.subr.mxu1 %v5580_v20  ;;  %v5610_v59 = vld [vmem:[#allocation9 + $0x10] sm:$0xff] }
 0x2ab   :  { %1281 = vmatpush1.msra.mxu0 %v5584_v62  ;;  %1352 = vmatpush1.msra.mxu1 %v5586_v54  ;;  %7171 = vst [vmem:[#allocation40_spill] sm:$0xff] %v5610_v59 }
 0x2ac   :  { %1282 = vmatprep.subr.mxu0 %v5590_v53  ;;  %1353 = vmatprep.subr.mxu1 %v5592_v1  ;;  %v7172_v53 = vld [vmem:[#allocation46_spill] sm:$0xff] }
 0x2ad   :  { %1283 = vmatpush1.msra.mxu0 %v5596_v11  ;;  %1354 = vmatpush1.msra.mxu1 %v5598_v38  ;;  %v7173_v11 = vld [vmem:[#allocation48_spill] sm:$0xff] }
 0x2ae   :  { %1284 = vmatprep.subr.mxu0 %v5602_v61  ;;  %1355 = vmatprep.subr.mxu1 %v5604_v47 }
 0x2af   :  { %1285 = vmatpush1.msra.mxu0 %v5608_v27  ;;  %1356 = vmatpush1.msra.mxu1 %v5610_v59 }
 0x2b0   :  { %1493 = vmatprep.subr.mxu0 %v5426_v2  ;;  %1564 = vmatprep.subr.mxu1 %v5428_v51 }
 0x34f   :  { %v1081_v1 = vpop.f32.mrf.mxu0  ;;  %v1152_v38 = vpop.f32.mrf.mxu1 }
 0x350   :  { %v1082_v54 = vadd.f32 %v1081_v1, %v7172_v53  ;;  %v1153_v59 = vadd.f32 %v1152_v38, %v7175_v48  ;;  %v7183_v38 = vld [vmem:[#allocation30_spill] sm:$0xff] }
 0x351   :  { %v1083_v62 = vpop.f32.mrf.mxu0  ;;  %v1154_v47 = vpop.f32.mrf.mxu1 }
 0x352   :  { %v4279_v20 = vmul.f32 -1.442695, %v1082_v54  ;;  %v1084_v50 = vadd.f32 %v1083_v62, %v7173_v11  ;;  %v1155_v27 = vadd.f32 %v1154_v47, %v7174_v49  ;;  %v7181_v49 = vld [vmem:[#allocation28_spill] sm:$0xff] }
 0x354   :  { %4419 = vpow2.f32 %v4279_v20  ;;  %v4280_v61 = vmul.f32 -1.442695, %v1084_v50  ;;  %v4281_v46 = vmul.f32 -1.442695, %v1155_v27 }
 0x356   :  { %4421 = vpow2.f32 %v4280_v61 }
 0x357   :  { %4423 = vtanh.f32 %v1153_v59  ;;  %v7182_v59 = vld [vmem:[#allocation29_spill] sm:$0xff] }
 0x358   :  { %4425 = vpow2.f32 %v4281_v46  ;;  %v7180_v46 = vld [vmem:[#allocation27_spill] sm:$0xff] }
 0x361   :  { %v4420_v2 = vpop.eup %4419 }
 0x362   :  { %v1160_v45 = vadd.f32 1.0, %v4420_v2 }
 0x363   :  { %v4422_v51 = vpop.eup %4421 }
 0x364   :  { %4427 = vrcp.f32 %v1160_v45  ;;  %v1166_v53 = vadd.f32 1.0, %v4422_v51  ;;  %v4424_v54 = vpop.eup %4423  ;;  %v7178_v51 = vld [vmem:[#allocation25_spill] sm:$0xff]  ;;  %v7179_v45 = vld [vmem:[#allocation26_spill] sm:$0xff] }
 0x365   :  { %v4426_v62 = vpop.eup %4425 }
 0x366   :  { %4429 = vrcp.f32 %v1166_v53  ;;  %v1173_v61 = vadd.f32 1.0, %v4426_v62  ;;  %v7184_v53 = vld [vmem:[#allocation31_spill] sm:$0xff]  ;;  %v7186_v62 = vld [vmem:[#allocation33_spill] sm:$0xff] }
 0x368   :  { %4431 = vrcp.f32 %v1173_v61  ;;  %v7190_v61 = vld [vmem:[#allocation37_spill] sm:$0xff] }
 0x371   :  { %v4428_v20 = vpop.eup %4427 }
 0x372   :  { %v1177_v1 = vmul.f32 %v4428_v20, %v4424_v54  ;;  %v7185_v54 = vld [vmem:[#allocation32_spill] sm:$0xff]  ;;  %v7187_v20 = vld [vmem:[#allocation34_spill] sm:$0xff] }
 0x373   :  { %v4430_v50 = vpop.eup %4429 }
 0x374   :  { %v1176_v11 = vmul.f32 %v4430_v50, %v5417_v63  ;;  %v7177_v63 = vld [vmem:[#allocation24_spill] sm:$0xff] }
 0x375   :  { %v4432_v27 = vpop.eup %4431  ;;  %v7189_v50 = vld [vmem:[#allocation36_spill] sm:$0xff] }
 0x376   :  { %v5625_v47 = vadd.f32 %v1177_v1, %v1176_v11  ;;  %v7188_v1 = vld [vmem:[#allocation35_spill] sm:$0xff]  ;;  %v7191_v11 = vld [vmem:[#allocation38_spill] sm:$0xff] }
 0x378   :  { %4433 = vtanh.f32 %v5625_v47 }
 0x385   :  { %v4434_v2 = vpop.eup %4433 }
 0x386   :  { %v5628_v48 = vmul.f32 %v4434_v2, %v4432_v27  ;;  %v7192_v27 = vld [vmem:[#allocation39_spill] sm:$0xff]  ;;  %v7193_v2 = vmov 0.0  }
 0x388   :  { %7176 = vst [vmem:[#allocation41_spill] sm:$0xff] %v5628_v48  ;;  %1319 = vmatmul.mubr.f32.vlgmr.msra.gmra.mxu0 %v5628_v48  ;;  %1390 = vmatmul.mubr.f32.vlgmr.msra.gmra.mxu1 %v5628_v48  ;;  %v7194_v48 = vld [vmem:[#allocation40_spill] sm:$0xff] }
 0x389   :  { %1494 = vmatpush1.msra.mxu0 %v5432_v55  ;;  %1565 = vmatpush1.msra.mxu1 %v5434_v29 }
 0x38a   :  { %1495 = vmatprep.subr.mxu0 %v5438_v0  ;;  %1566 = vmatprep.subr.mxu1 %v5440_v57 }
 0x38b   :  { %1496 = vmatpush1.msra.mxu0 %v5444_v56  ;;  %1567 = vmatpush1.msra.mxu1 %v5446_v60 }
 0x38c   :  { %1497 = vmatprep.subr.mxu0 %v5450_v3  ;;  %1568 = vmatprep.subr.mxu1 %v5452_v4 }
 0x38d   :  { %1498 = vmatpush1.msra.mxu0 %v5456_v52  ;;  %1569 = vmatpush1.msra.mxu1 %v5458_v58 }
 0x38e   :  { %1499 = vmatprep.subr.mxu0 %v5462_v5  ;;  %1570 = vmatprep.subr.mxu1 %v5464_v6 }
 0x38f   :  { %1500 = vmatpush1.msra.mxu0 %v5468_v7  ;;  %1571 = vmatpush1.msra.mxu1 %v5470_v8 }
 0x390   :  { %1501 = vmatprep.subr.mxu0 %v5474_v9  ;;  %1572 = vmatprep.subr.mxu1 %v5476_v10 }
 0x391   :  { %1502 = vmatpush1.msra.mxu0 %v5480_v12  ;;  %1573 = vmatpush1.msra.mxu1 %v5482_v13 }
 0x392   :  { %1503 = vmatprep.subr.mxu0 %v5486_v14  ;;  %1574 = vmatprep.subr.mxu1 %v5488_v15 }
 0x393   :  { %1504 = vmatpush1.msra.mxu0 %v5492_v16  ;;  %1575 = vmatpush1.msra.mxu1 %v5494_v17 }
 0x394   :  { %1505 = vmatprep.subr.mxu0 %v5498_v18  ;;  %1576 = vmatprep.subr.mxu1 %v5500_v19 }
 0x395   :  { %1506 = vmatpush1.msra.mxu0 %v5504_v21  ;;  %1577 = vmatpush1.msra.mxu1 %v5506_v22 }
 0x396   :  { %1507 = vmatprep.subr.mxu0 %v5510_v23  ;;  %1578 = vmatprep.subr.mxu1 %v5512_v24 }
 0x397   :  { %1508 = vmatpush1.msra.mxu0 %v5514_v25  ;;  %1579 = vmatpush1.msra.mxu1 %v5518_v26 }
 0x398   :  { %1509 = vmatprep.subr.mxu0 %v5520_v28  ;;  %1580 = vmatprep.subr.mxu1 %v5522_v30 }
 0x399   :  { %1510 = vmatpush1.msra.mxu0 %v5526_v31  ;;  %1581 = vmatpush1.msra.mxu1 %v5528_v32 }
 0x39a   :  { %1511 = vmatprep.subr.mxu0 %v5530_v33  ;;  %1582 = vmatprep.subr.mxu1 %v5534_v34 }
 0x39b   :  { %1512 = vmatpush1.msra.mxu0 %v5536_v35  ;;  %1583 = vmatpush1.msra.mxu1 %v5538_v36 }
 0x39c   :  { %1513 = vmatprep.subr.mxu0 %v5542_v37  ;;  %1584 = vmatprep.subr.mxu1 %v5544_v39 }
 0x39d   :  { %1514 = vmatpush1.msra.mxu0 %v5548_v40  ;;  %1585 = vmatpush1.msra.mxu1 %v5550_v41 }
 0x39e   :  { %1515 = vmatprep.subr.mxu0 %v5554_v42  ;;  %1586 = vmatprep.subr.mxu1 %v5556_v43 }
 0x39f   :  { %1516 = vmatpush1.msra.mxu0 %v5560_v44  ;;  %1587 = vmatpush1.msra.mxu1 %v7177_v63 }
 0x3a0   :  { %1517 = vmatprep.subr.mxu0 %v7178_v51  ;;  %1588 = vmatprep.subr.mxu1 %v7179_v45  ;;  %v7200_v45 = vld [vmem:[#allocation51_spill] sm:$0xff] }
 0x3a1   :  { %1518 = vmatpush1.msra.mxu0 %v7180_v46  ;;  %1589 = vmatpush1.msra.mxu1 %v7181_v49  ;;  %v7199_v46 = vld [vmem:[#allocation53_spill] sm:$0xff] }
 0x3a2   :  { %1519 = vmatprep.subr.mxu0 %v7182_v59  ;;  %1590 = vmatprep.subr.mxu1 %v7183_v38 }
 0x3a3   :  { %1520 = vmatpush1.msra.mxu0 %v7184_v53  ;;  %1591 = vmatpush1.msra.mxu1 %v7185_v54  ;;  %v7195_v54 = vld [vmem:[#allocation22_spill] sm:$0xff] }
 0x3a4   :  { %1521 = vmatprep.subr.mxu0 %v7186_v62  ;;  %1592 = vmatprep.subr.mxu1 %v7187_v20  ;;  %v7196_v62 = vld [vmem:[#allocation23_spill] sm:$0xff] }
 0x3a5   :  { %1522 = vmatpush1.msra.mxu0 %v7188_v1  ;;  %1593 = vmatpush1.msra.mxu1 %v7189_v50  ;;  %v7197_v1 = vld [vmem:[#allocation50_spill] sm:$0xff] }
 0x3a6   :  { %1523 = vmatprep.subr.mxu0 %v7190_v61  ;;  %1594 = vmatprep.subr.mxu1 %v7191_v11  ;;  %v7198_v61 = vld [vmem:[#allocation52_spill] sm:$0xff] }
 0x3a7   :  { %1524 = vmatpush1.msra.mxu0 %v7192_v27  ;;  %1557 = vmatprep.mubr.f32.mxu0 %v7193_v2 }
 0x3a8   :  { %1595 = vmatpush1.msra.mxu1 %v7194_v48  ;;  %1628 = vmatprep.mubr.f32.mxu1 %v7193_v2 }
 0x3a9   :  { %1732 = vmatprep.subr.mxu0 %v7195_v54  ;;  %1803 = vmatprep.subr.mxu1 %v7196_v62 }
 0x448   :  { %v1320_v20 = vpop.f32.mrf.mxu0  ;;  %v1391_v11 = vpop.f32.mrf.mxu1 }
 0x449   :  { %v1321_v53 = vadd.f32 %v1320_v20, %v7197_v1  ;;  %v1392_v2 = vadd.f32 %v1391_v11, %v7200_v45  ;;  %v7207_v11 = vld [vmem:[#allocation29_spill] sm:$0xff] }
 0x44a   :  { %v1322_v50 = vpop.f32.mrf.mxu0  ;;  %v1393_v49 = vpop.f32.mrf.mxu1 }
 0x44b   :  { %v4282_v38 = vmul.f32 -1.442695, %v1321_v53  ;;  %v1323_v59 = vadd.f32 %v1322_v50, %v7198_v61  ;;  %v1394_v48 = vadd.f32 %v1393_v49, %v7199_v46 }
 0x44d   :  { %4435 = vpow2.f32 %v4282_v38  ;;  %v4283_v27 = vmul.f32 -1.442695, %v1323_v59  ;;  %v4284_v51 = vmul.f32 -1.442695, %v1394_v48 }
 0x44f   :  { %4437 = vpow2.f32 %v4283_v27 }
 0x450   :  { %4439 = vtanh.f32 %v1392_v2  ;;  %v7208_v2 = vld [vmem:[#allocation30_spill] sm:$0xff] }
 0x451   :  { %4441 = vpow2.f32 %v4284_v51  ;;  %v7204_v51 = vld [vmem:[#allocation26_spill] sm:$0xff] }
 0x45a   :  { %v4436_v54 = vpop.eup %4435 }
 0x45b   :  { %v1399_v63 = vadd.f32 1.0, %v4436_v54  ;;  %v7205_v54 = vld [vmem:[#allocation27_spill] sm:$0xff] }
 0x45c   :  { %v4438_v62 = vpop.eup %4437 }
 0x45d   :  { %4443 = vrcp.f32 %v1399_v63  ;;  %v1405_v20 = vadd.f32 1.0, %v4438_v62  ;;  %v4440_v53 = vpop.eup %4439  ;;  %v7203_v63 = vld [vmem:[#allocation25_spill] sm:$0xff]  ;;  %v7206_v62 = vld [vmem:[#allocation28_spill] sm:$0xff] }
 0x45e   :  { %v4442_v1 = vpop.eup %4441 }
 0x45f   :  { %4445 = vrcp.f32 %v1405_v20  ;;  %v1412_v61 = vadd.f32 1.0, %v4442_v1  ;;  %v7209_v20 = vld [vmem:[#allocation31_spill] sm:$0xff]  ;;  %v7211_v1 = vld [vmem:[#allocation33_spill] sm:$0xff] }
 0x461   :  { %4447 = vrcp.f32 %v1412_v61  ;;  %v7215_v61 = vld [vmem:[#allocation37_spill] sm:$0xff] }
 0x46a   :  { %v4444_v38 = vpop.eup %4443 }
 0x46b   :  { %v1416_v50 = vmul.f32 %v4444_v38, %v4440_v53  ;;  %v7210_v53 = vld [vmem:[#allocation32_spill] sm:$0xff]  ;;  %v7212_v38 = vld [vmem:[#allocation34_spill] sm:$0xff] }
 0x46c   :  { %v4446_v59 = vpop.eup %4445 }
 0x46d   :  { %v1415_v27 = vmul.f32 %v4446_v59, %v5625_v47  ;;  %v7202_v47 = vld [vmem:[#allocation24_spill] sm:$0xff] }
 0x46e   :  { %v4448_v48 = vpop.eup %4447  ;;  %v7214_v59 = vld [vmem:[#allocation36_spill] sm:$0xff] }
 0x46f   :  { %v5703_v46 = vadd.f32 %v1416_v50, %v1415_v27  ;;  %v7213_v50 = vld [vmem:[#allocation35_spill] sm:$0xff]  ;;  %v7216_v27 = vld [vmem:[#allocation38_spill] sm:$0xff] }
 0x471   :  { %4449 = vtanh.f32 %v5703_v46 }
 0x47e   :  { %v4450_v45 = vpop.eup %4449 }
 0x47f   :  { %v5706_v49 = vmul.f32 %v4450_v45, %v4448_v48  ;;  %v7217_v48 = vld [vmem:[#allocation39_spill] sm:$0xff]  ;;  %v7218_v45 = vmov 0.0  }
 0x481   :  { %7201 = vst [vmem:[#allocation44_spill] sm:$0xff] %v5706_v49  ;;  %1558 = vmatmul.mubr.f32.vlgmr.msra.gmra.mxu0 %v5706_v49  ;;  %1629 = vmatmul.mubr.f32.vlgmr.msra.gmra.mxu1 %v5706_v49  ;;  %v7219_v49 = vld [vmem:[#allocation40_spill] sm:$0xff] }
 0x482   :  { %1733 = vmatpush1.msra.mxu0 %v5432_v55  ;;  %1804 = vmatpush1.msra.mxu1 %v5434_v29 }
 0x483   :  { %1734 = vmatprep.subr.mxu0 %v5438_v0  ;;  %1805 = vmatprep.subr.mxu1 %v5440_v57 }
 0x484   :  { %1735 = vmatpush1.msra.mxu0 %v5444_v56  ;;  %1806 = vmatpush1.msra.mxu1 %v5446_v60 }
 0x485   :  { %1736 = vmatprep.subr.mxu0 %v5450_v3  ;;  %1807 = vmatprep.subr.mxu1 %v5452_v4 }
 0x486   :  { %1737 = vmatpush1.msra.mxu0 %v5456_v52  ;;  %1808 = vmatpush1.msra.mxu1 %v5458_v58 }
 0x487   :  { %1738 = vmatprep.subr.mxu0 %v5462_v5  ;;  %1809 = vmatprep.subr.mxu1 %v5464_v6 }
 0x488   :  { %1739 = vmatpush1.msra.mxu0 %v5468_v7  ;;  %1810 = vmatpush1.msra.mxu1 %v5470_v8 }
 0x489   :  { %1740 = vmatprep.subr.mxu0 %v5474_v9  ;;  %1811 = vmatprep.subr.mxu1 %v5476_v10 }
 0x48a   :  { %1741 = vmatpush1.msra.mxu0 %v5480_v12  ;;  %1812 = vmatpush1.msra.mxu1 %v5482_v13 }
 0x48b   :  { %1742 = vmatprep.subr.mxu0 %v5486_v14  ;;  %1813 = vmatprep.subr.mxu1 %v5488_v15 }
 0x48c   :  { %1743 = vmatpush1.msra.mxu0 %v5492_v16  ;;  %1814 = vmatpush1.msra.mxu1 %v5494_v17 }
 0x48d   :  { %1744 = vmatprep.subr.mxu0 %v5498_v18  ;;  %1815 = vmatprep.subr.mxu1 %v5500_v19 }
 0x48e   :  { %1745 = vmatpush1.msra.mxu0 %v5504_v21  ;;  %1816 = vmatpush1.msra.mxu1 %v5506_v22 }
 0x48f   :  { %1746 = vmatprep.subr.mxu0 %v5510_v23  ;;  %1817 = vmatprep.subr.mxu1 %v5512_v24 }
 0x490   :  { %1747 = vmatpush1.msra.mxu0 %v5514_v25  ;;  %1818 = vmatpush1.msra.mxu1 %v5518_v26 }
 0x491   :  { %1748 = vmatprep.subr.mxu0 %v5520_v28  ;;  %1819 = vmatprep.subr.mxu1 %v5522_v30 }
 0x492   :  { %1749 = vmatpush1.msra.mxu0 %v5526_v31  ;;  %1820 = vmatpush1.msra.mxu1 %v5528_v32 }
 0x493   :  { %1750 = vmatprep.subr.mxu0 %v5530_v33  ;;  %1821 = vmatprep.subr.mxu1 %v5534_v34 }
 0x494   :  { %1751 = vmatpush1.msra.mxu0 %v5536_v35  ;;  %1822 = vmatpush1.msra.mxu1 %v5538_v36 }
 0x495   :  { %1752 = vmatprep.subr.mxu0 %v5542_v37  ;;  %1823 = vmatprep.subr.mxu1 %v5544_v39 }
 0x496   :  { %1753 = vmatpush1.msra.mxu0 %v5548_v40  ;;  %1824 = vmatpush1.msra.mxu1 %v5550_v41 }
 0x497   :  { %1754 = vmatprep.subr.mxu0 %v5554_v42  ;;  %1825 = vmatprep.subr.mxu1 %v5556_v43 }
 0x498   :  { %1755 = vmatpush1.msra.mxu0 %v5560_v44  ;;  %1826 = vmatpush1.msra.mxu1 %v7202_v47 }
 0x499   :  { %1756 = vmatprep.subr.mxu0 %v7203_v63  ;;  %1827 = vmatprep.subr.mxu1 %v7204_v51  ;;  %v7225_v51 = vld [vmem:[#allocation55_spill] sm:$0xff] }
 0x49a   :  { %1757 = vmatpush1.msra.mxu0 %v7205_v54  ;;  %1828 = vmatpush1.msra.mxu1 %v7206_v62  ;;  %v7224_v54 = vld [vmem:[#allocation57_spill] sm:$0xff] }
 0x49b   :  { %1758 = vmatprep.subr.mxu0 %v7207_v11  ;;  %1829 = vmatprep.subr.mxu1 %v7208_v2 }
 0x49c   :  { %1759 = vmatpush1.msra.mxu0 %v7209_v20  ;;  %1830 = vmatpush1.msra.mxu1 %v7210_v53  ;;  %v7220_v53 = vld [vmem:[#allocation22_spill] sm:$0xff] }
 0x49d   :  { %1760 = vmatprep.subr.mxu0 %v7211_v1  ;;  %1831 = vmatprep.subr.mxu1 %v7212_v38  ;;  %v7221_v1 = vld [vmem:[#allocation23_spill] sm:$0xff] }
 0x49e   :  { %1761 = vmatpush1.msra.mxu0 %v7213_v50  ;;  %1832 = vmatpush1.msra.mxu1 %v7214_v59  ;;  %v7222_v50 = vld [vmem:[#allocation54_spill] sm:$0xff] }
 0x49f   :  { %1762 = vmatprep.subr.mxu0 %v7215_v61  ;;  %1833 = vmatprep.subr.mxu1 %v7216_v27  ;;  %v7223_v61 = vld [vmem:[#allocation56_spill] sm:$0xff] }
 0x4a0   :  { %1763 = vmatpush1.msra.mxu0 %v7217_v48  ;;  %1796 = vmatprep.mubr.f32.mxu0 %v7218_v45 }
 0x4a1   :  { %1834 = vmatpush1.msra.mxu1 %v7219_v49  ;;  %1867 = vmatprep.mubr.f32.mxu1 %v7218_v45 }
 0x4a2   :  { %1971 = vmatprep.subr.mxu0 %v7220_v53  ;;  %2042 = vmatprep.subr.mxu1 %v7221_v1 }
 0x541   :  { %v1559_v38 = vpop.f32.mrf.mxu0  ;;  %v1630_v27 = vpop.f32.mrf.mxu1 }
 0x542   :  { %v1560_v20 = vadd.f32 %v1559_v38, %v7222_v50  ;;  %v1631_v45 = vadd.f32 %v1630_v27, %v7225_v51  ;;  %v2200_v27 = vld [vmem:[#allocation9 + $0x1e8] sm:$0xff] }
 0x543   :  { %v1561_v59 = vpop.f32.mrf.mxu0  ;;  %v1632_v62 = vpop.f32.mrf.mxu1 }
 0x544   :  { %v4285_v2 = vmul.f32 -1.442695, %v1560_v20  ;;  %v1562_v11 = vadd.f32 %v1561_v59, %v7223_v61  ;;  %v1633_v49 = vadd.f32 %v1632_v62, %v7224_v54 }
 0x546   :  { %4451 = vpow2.f32 %v4285_v2  ;;  %v4286_v48 = vmul.f32 -1.442695, %v1562_v11  ;;  %v4287_v63 = vmul.f32 -1.442695, %v1633_v49 }
 0x548   :  { %4453 = vpow2.f32 %v4286_v48 }
 0x549   :  { %4455 = vtanh.f32 %v1631_v45  ;;  %v2202_v45 = vld [vmem:[#allocation9 + $0x1f8] sm:$0xff] }
 0x54a   :  { %4457 = vpow2.f32 %v4287_v63 }
 0x553   :  { %v4452_v53 = vpop.eup %4451 }
 0x554   :  { %v1638_v47 = vadd.f32 1.0, %v4452_v53  ;;  %v2199_v53 = vld [vmem:[#allocation9 + $0x1e0] sm:$0xff] }
 0x555   :  { %v4454_v1 = vpop.eup %4453 }
 0x556   :  { %4459 = vrcp.f32 %v1638_v47  ;;  %v1644_v38 = vadd.f32 1.0, %v4454_v1  ;;  %v4456_v20 = vpop.eup %4455  ;;  %v2201_v1 = vld [vmem:[#allocation9 + $0x1f0] sm:$0xff] }
 0x557   :  { %v4458_v50 = vpop.eup %4457 }
 0x558   :  { %4461 = vrcp.f32 %v1644_v38  ;;  %v1651_v61 = vadd.f32 1.0, %v4458_v50  ;;  %v2196_v38 = vld [vmem:[#allocation9 + $0x1c8] sm:$0xff]  ;;  %v2195_v50 = vld [vmem:[#allocation9 + $0x1c0] sm:$0xff] }
 0x55a   :  { %4463 = vrcp.f32 %v1651_v61  ;;  %v2191_v61 = vld [vmem:[#allocation9 + $0x1a0] sm:$0xff] }
 0x563   :  { %v4460_v2 = vpop.eup %4459 }
 0x564   :  { %v1655_v59 = vmul.f32 %v4460_v2, %v4456_v20  ;;  %v2198_v20 = vld [vmem:[#allocation9 + $0x1d8] sm:$0xff]  ;;  %v2197_v2 = vld [vmem:[#allocation9 + $0x1d0] sm:$0xff] }
 0x565   :  { %v4462_v11 = vpop.eup %4461 }
 0x566   :  { %v1654_v48 = vmul.f32 %v4462_v11, %v5703_v46  ;;  %v2194_v11 = vld [vmem:[#allocation9 + $0x1b8] sm:$0xff] }
 0x567   :  { %v4464_v49 = vpop.eup %4463 }
 0x568   :  { %v5781_v54 = vadd.f32 %v1655_v59, %v1654_v48  ;;  %v2192_v59 = vld [vmem:[#allocation9 + $0x1a8] sm:$0xff]  ;;  %v2193_v48 = vld [vmem:[#allocation9 + $0x1b0] sm:$0xff] }
 0x56a   :  { %4465 = vtanh.f32 %v5781_v54 }
 0x577   :  { %v4466_v51 = vpop.eup %4465 }
 0x578   :  { %v5784_v62 = vmul.f32 %v4466_v51, %v4464_v49  ;;  %v2190_v49 = vld [vmem:[#allocation9 + $0x198] sm:$0xff]  ;;  %v2187_v51 = vld [vmem:[#allocation9 + $0x180] sm:$0xff] }
 0x57a   :  { %1797 = vmatmul.mubr.f32.vlgmr.msra.gmra.mxu0 %v5784_v62  ;;  %1868 = vmatmul.mubr.f32.vlgmr.msra.gmra.mxu1 %v5784_v62 }
 0x57b   :  { %1972 = vmatpush1.msra.mxu0 %v5432_v55  ;;  %2043 = vmatpush1.msra.mxu1 %v5434_v29  ;;  %v7226_v55 = vld [vmem:[#allocation24_spill] sm:$0xff]  ;;  %v7227_v29 = vld [vmem:[#allocation25_spill] sm:$0xff] }
 0x57c   :  { %1973 = vmatprep.subr.mxu0 %v5438_v0  ;;  %2044 = vmatprep.subr.mxu1 %v5440_v57  ;;  %v7228_v0 = vld [vmem:[#allocation26_spill] sm:$0xff]  ;;  %v7229_v57 = vld [vmem:[#allocation27_spill] sm:$0xff] }
 0x57d   :  { %1974 = vmatpush1.msra.mxu0 %v5444_v56  ;;  %2045 = vmatpush1.msra.mxu1 %v5446_v60  ;;  %v7230_v56 = vld [vmem:[#allocation28_spill] sm:$0xff]  ;;  %v7231_v60 = vld [vmem:[#allocation29_spill] sm:$0xff] }
 0x57e   :  { %1975 = vmatprep.subr.mxu0 %v5450_v3  ;;  %2046 = vmatprep.subr.mxu1 %v5452_v4  ;;  %v7232_v3 = vld [vmem:[#allocation30_spill] sm:$0xff]  ;;  %v7233_v4 = vld [vmem:[#allocation31_spill] sm:$0xff] }
 0x57f   :  { %1976 = vmatpush1.msra.mxu0 %v5456_v52  ;;  %2047 = vmatpush1.msra.mxu1 %v5458_v58  ;;  %v7234_v52 = vld [vmem:[#allocation32_spill] sm:$0xff]  ;;  %v7235_v58 = vld [vmem:[#allocation33_spill] sm:$0xff] }
 0x580   :  { %1977 = vmatprep.subr.mxu0 %v5462_v5  ;;  %2048 = vmatprep.subr.mxu1 %v5464_v6  ;;  %v7236_v5 = vld [vmem:[#allocation34_spill] sm:$0xff]  ;;  %v7237_v6 = vld [vmem:[#allocation35_spill] sm:$0xff] }
 0x581   :  { %1978 = vmatpush1.msra.mxu0 %v5468_v7  ;;  %2049 = vmatpush1.msra.mxu1 %v5470_v8  ;;  %v7238_v7 = vld [vmem:[#allocation36_spill] sm:$0xff]  ;;  %v7239_v8 = vld [vmem:[#allocation37_spill] sm:$0xff] }
 0x582   :  { %1979 = vmatprep.subr.mxu0 %v5474_v9  ;;  %2050 = vmatprep.subr.mxu1 %v5476_v10  ;;  %v7240_v9 = vld [vmem:[#allocation38_spill] sm:$0xff]  ;;  %v7241_v10 = vld [vmem:[#allocation39_spill] sm:$0xff] }
 0x583   :  { %1980 = vmatpush1.msra.mxu0 %v5480_v12  ;;  %2051 = vmatpush1.msra.mxu1 %v5482_v13  ;;  %v7242_v12 = vmov 0.0   ;;  %v7243_v13 = vld [vmem:[#allocation40_spill] sm:$0xff] }
 0x584   :  { %1981 = vmatprep.subr.mxu0 %v5486_v14  ;;  %2052 = vmatprep.subr.mxu1 %v5488_v15  ;;  %v7244_v15 = vld [vmem:[#allocation58_spill] sm:$0xff] }
 0x585   :  { %1982 = vmatpush1.msra.mxu0 %v5492_v16  ;;  %2053 = vmatpush1.msra.mxu1 %v5494_v17 }
 0x586   :  { %1983 = vmatprep.subr.mxu0 %v5498_v18  ;;  %2054 = vmatprep.subr.mxu1 %v5500_v19  ;;  %v7245_v19 = vld [vmem:[#allocation60_spill] sm:$0xff] }
 0x587   :  { %1984 = vmatpush1.msra.mxu0 %v5504_v21  ;;  %2055 = vmatpush1.msra.mxu1 %v5506_v22 }
 0x588   :  { %1985 = vmatprep.subr.mxu0 %v5510_v23  ;;  %2056 = vmatprep.subr.mxu1 %v5512_v24 }
 0x589   :  { %1986 = vmatpush1.msra.mxu0 %v5514_v25  ;;  %2057 = vmatpush1.msra.mxu1 %v5518_v26  ;;  %v7246_v25 = vld [vmem:[#allocation61_spill] sm:$0xff] }
 0x58a   :  { %1987 = vmatprep.subr.mxu0 %v5520_v28  ;;  %2058 = vmatprep.subr.mxu1 %v5522_v30  ;;  %v7247_v28 = vld [vmem:[#allocation59_spill] sm:$0xff] }
 0x58b   :  { %1988 = vmatpush1.msra.mxu0 %v5526_v31  ;;  %2059 = vmatpush1.msra.mxu1 %v5528_v32 }
 0x58c   :  { %1989 = vmatprep.subr.mxu0 %v5530_v33  ;;  %2060 = vmatprep.subr.mxu1 %v5534_v34 }
 0x58d   :  { %1990 = vmatpush1.msra.mxu0 %v5536_v35  ;;  %2061 = vmatpush1.msra.mxu1 %v5538_v36 }
 0x58e   :  { %1991 = vmatprep.subr.mxu0 %v5542_v37  ;;  %2062 = vmatprep.subr.mxu1 %v5544_v39 }
 0x58f   :  { %1992 = vmatpush1.msra.mxu0 %v5548_v40  ;;  %2063 = vmatpush1.msra.mxu1 %v5550_v41 }
 0x590   :  { %1993 = vmatprep.subr.mxu0 %v5554_v42  ;;  %2064 = vmatprep.subr.mxu1 %v5556_v43 }
 0x591   :  { %1994 = vmatpush1.msra.mxu0 %v5560_v44  ;;  %2065 = vmatpush1.msra.mxu1 %v7226_v55  ;;  %v2189_v55 = vld [vmem:[#allocation9 + $0x190] sm:$0xff] }
 0x592   :  { %1995 = vmatprep.subr.mxu0 %v7227_v29  ;;  %2066 = vmatprep.subr.mxu1 %v7228_v0  ;;  %v2184_v29 = vld [vmem:[#allocation9 + $0x168] sm:$0xff]  ;;  %v2186_v0 = vld [vmem:[#allocation9 + $0x178] sm:$0xff] }
 0x593   :  { %1996 = vmatpush1.msra.mxu0 %v7229_v57  ;;  %2067 = vmatpush1.msra.mxu1 %v7230_v56  ;;  %v2183_v57 = vld [vmem:[#allocation9 + $0x160] sm:$0xff]  ;;  %v2185_v56 = vld [vmem:[#allocation9 + $0x170] sm:$0xff] }
 0x594   :  { %1997 = vmatprep.subr.mxu0 %v7231_v60  ;;  %2068 = vmatprep.subr.mxu1 %v7232_v3  ;;  %v2180_v60 = vld [vmem:[#allocation9 + $0x148] sm:$0xff]  ;;  %v2182_v3 = vld [vmem:[#allocation9 + $0x158] sm:$0xff] }
 0x595   :  { %1998 = vmatpush1.msra.mxu0 %v7233_v4  ;;  %2069 = vmatpush1.msra.mxu1 %v7234_v52  ;;  %v2179_v4 = vld [vmem:[#allocation9 + $0x140] sm:$0xff]  ;;  %v2181_v52 = vld [vmem:[#allocation9 + $0x150] sm:$0xff] }
 0x596   :  { %1999 = vmatprep.subr.mxu0 %v7235_v58  ;;  %2070 = vmatprep.subr.mxu1 %v7236_v5  ;;  %v2176_v58 = vld [vmem:[#allocation9 + $0x128] sm:$0xff]  ;;  %v2178_v5 = vld [vmem:[#allocation9 + $0x138] sm:$0xff] }
 0x597   :  { %2000 = vmatpush1.msra.mxu0 %v7237_v6  ;;  %2071 = vmatpush1.msra.mxu1 %v7238_v7  ;;  %v2175_v6 = vld [vmem:[#allocation9 + $0x120] sm:$0xff]  ;;  %v2177_v7 = vld [vmem:[#allocation9 + $0x130] sm:$0xff] }
 0x598   :  { %2001 = vmatprep.subr.mxu0 %v7239_v8  ;;  %2072 = vmatprep.subr.mxu1 %v7240_v9  ;;  %v2172_v8 = vld [vmem:[#allocation9 + $0x108] sm:$0xff]  ;;  %v2174_v9 = vld [vmem:[#allocation9 + $0x118] sm:$0xff] }
 0x599   :  { %2002 = vmatpush1.msra.mxu0 %v7241_v10  ;;  %2035 = vmatprep.mubr.f32.mxu0 %v7242_v12  ;;  %v2171_v10 = vld [vmem:[#allocation9 + $0x100] sm:$0xff] }
 0x59a   :  { %2073 = vmatpush1.msra.mxu1 %v7243_v13  ;;  %2106 = vmatprep.mubr.f32.mxu1 %v7242_v12  ;;  %v2173_v13 = vld [vmem:[#allocation9 + $0x110] sm:$0xff] }
 0x59b   :  { %2210 = vmatprep.subr.mxu0 %v2200_v27  ;;  %2281 = vmatprep.subr.mxu1 %v2202_v45  ;;  %v2140_v27 = vld [vmem:[#allocation9 + $0x8] sm:$0xff]  ;;  %v2142_v45 = vld [vmem:[#allocation9 + $0x18] sm:$0xff] }
 0x63a   :  { %v1798_v14 = vpop.f32.mrf.mxu0  ;;  %v1869_v22 = vpop.f32.mrf.mxu1 }
 0x63b   :  { %v1799_v16 = vadd.f32 %v1798_v14, %v7244_v15  ;;  %v1870_v30 = vadd.f32 %v1869_v22, %v7247_v28  ;;  %v2168_v14 = vld [vmem:[#allocation9 + $0xe8] sm:$0xff]  ;;  %v2170_v15 = vld [vmem:[#allocation9 + $0xf8] sm:$0xff]  ;;  %v2165_v22 = vld [vmem:[#allocation9 + $0xd0] sm:$0xff] }
 0x63c   :  { %v1800_v17 = vpop.f32.mrf.mxu0  ;;  %v1871_v24 = vpop.f32.mrf.mxu1  ;;  %v2156_v28 = vld [vmem:[#allocation9 + $0x88] sm:$0xff] }
 0x63d   :  { %v4288_v18 = vmul.f32 -1.442695, %v1799_v16  ;;  %v1801_v21 = vadd.f32 %v1800_v17, %v7245_v19  ;;  %v1872_v26 = vadd.f32 %v1871_v24, %v7246_v25  ;;  %v2167_v16 = vld [vmem:[#allocation9 + $0xe0] sm:$0xff]  ;;  %v2169_v17 = vld [vmem:[#allocation9 + $0xf0] sm:$0xff]  ;;  %v2166_v19 = vld [vmem:[#allocation9 + $0xd8] sm:$0xff] }
 0x63e   :  { %v2162_v24 = vld [vmem:[#allocation9 + $0xb8] sm:$0xff]  ;;  %v2159_v25 = vld [vmem:[#allocation9 + $0xa0] sm:$0xff] }
 0x63f   :  { %4467 = vpow2.f32 %v4288_v18  ;;  %v4289_v23 = vmul.f32 -1.442695, %v1801_v21  ;;  %v4290_v31 = vmul.f32 -1.442695, %v1872_v26  ;;  %v2164_v18 = vld [vmem:[#allocation9 + $0xc8] sm:$0xff]  ;;  %v2163_v21 = vld [vmem:[#allocation9 + $0xc0] sm:$0xff] }
 0x640   :  { %v2161_v26 = vld [vmem:[#allocation9 + $0xb0] sm:$0xff] }
 0x641   :  { %4469 = vpow2.f32 %v4289_v23  ;;  %v2160_v23 = vld [vmem:[#allocation9 + $0xa8] sm:$0xff] }
 0x642   :  { %4471 = vtanh.f32 %v1870_v30  ;;  %v2158_v30 = vld [vmem:[#allocation9 + $0x98] sm:$0xff] }
 0x643   :  { %4473 = vpow2.f32 %v4290_v31  ;;  %v2155_v31 = vld [vmem:[#allocation9 + $0x80] sm:$0xff] }
 0x64c   :  { %v4468_v32 = vpop.eup %4467 }
 0x64d   :  { %v1877_v33 = vadd.f32 1.0, %v4468_v32  ;;  %v2157_v32 = vld [vmem:[#allocation9 + $0x90] sm:$0xff] }
 0x64e   :  { %v4470_v34 = vpop.eup %4469 }
 0x64f   :  { %4475 = vrcp.f32 %v1877_v33  ;;  %v1883_v35 = vadd.f32 1.0, %v4470_v34  ;;  %v4472_v36 = vpop.eup %4471  ;;  %v2152_v33 = vld [vmem:[#allocation9 + $0x68] sm:$0xff]  ;;  %v2154_v34 = vld [vmem:[#allocation9 + $0x78] sm:$0xff] }
 0x650   :  { %v4474_v37 = vpop.eup %4473 }
 0x651   :  { %4477 = vrcp.f32 %v1883_v35  ;;  %v1890_v42 = vadd.f32 1.0, %v4474_v37  ;;  %v2151_v35 = vld [vmem:[#allocation9 + $0x60] sm:$0xff]  ;;  %v2148_v37 = vld [vmem:[#allocation9 + $0x48] sm:$0xff] }
 0x653   :  { %4479 = vrcp.f32 %v1890_v42  ;;  %v2144_v42 = vld [vmem:[#allocation9 + $0x28] sm:$0xff] }
 0x65c   :  { %v4476_v39 = vpop.eup %4475 }
 0x65d   :  { %v1894_v40 = vmul.f32 %v4476_v39, %v4472_v36  ;;  %v2153_v36 = vld [vmem:[#allocation9 + $0x70] sm:$0xff]  ;;  %v2150_v39 = vld [vmem:[#allocation9 + $0x58] sm:$0xff] }
 0x65e   :  { %v4478_v41 = vpop.eup %4477 }
 0x65f   :  { %v1893_v43 = vmul.f32 %v4478_v41, %v5781_v54  ;;  %v2188_v54 = vld [vmem:[#allocation9 + $0x188] sm:$0xff]  ;;  %v2149_v41 = vld [vmem:[#allocation9 + $0x50] sm:$0xff] }
 0x660   :  { %v4480_v46 = vpop.eup %4479 }
 0x661   :  { %v5857_v44 = vadd.f32 %v1894_v40, %v1893_v43  ;;  %v2147_v40 = vld [vmem:[#allocation9 + $0x40] sm:$0xff]  ;;  %v2146_v43 = vld [vmem:[#allocation9 + $0x38] sm:$0xff] }
 0x663   :  { %4481 = vtanh.f32 %v5857_v44 }
 0x670   :  { %v4482_v47 = vpop.eup %4481 }
 0x671   :  { %v5860_v63 = vmul.f32 %v4482_v47, %v4480_v46  ;;  %v2143_v46 = vld [vmem:[#allocation9 + $0x20] sm:$0xff]  ;;  %v2145_v47 = vld [vmem:[#allocation9 + $0x30] sm:$0xff] }
 0x673   :  { %2036 = vmatmul.mubr.f32.vlgmr.msra.gmra.mxu0 %v5860_v63  ;;  %2107 = vmatmul.mubr.f32.vlgmr.msra.gmra.mxu1 %v5860_v63 }
 0x674   :  { %2274 = vmatprep.mubr.f32.mxu0 %v7242_v12  ;;  %2345 = vmatprep.mubr.f32.mxu1 %v7242_v12 }
 0x675   :  { %2211 = vmatpush1.msra.mxu0 %v2199_v53  ;;  %2282 = vmatpush1.msra.mxu1 %v2201_v1  ;;  %v2139_v53 = vld [vmem:[#allocation9] sm:$0xff]  ;;  %v2141_v1 = vld [vmem:[#allocation9 + $0x10] sm:$0xff] }
 0x676   :  { %2212 = vmatprep.subr.mxu0 %v2196_v38  ;;  %2283 = vmatprep.subr.mxu1 %v2198_v20  ;;  %v2447_v38 = vld [vmem:[#allocation10 + $0x1e8] sm:$0xff]  ;;  %v2449_v20 = vld [vmem:[#allocation10 + $0x1f8] sm:$0xff] }
 0x677   :  { %2213 = vmatpush1.msra.mxu0 %v2195_v50  ;;  %2284 = vmatpush1.msra.mxu1 %v2197_v2  ;;  %v7248_v2 = vld [vmem:[#allocation62_spill] sm:$0xff] }
 0x678   :  { %2214 = vmatprep.subr.mxu0 %v2192_v59  ;;  %2285 = vmatprep.subr.mxu1 %v2194_v11 }
 0x679   :  { %2215 = vmatpush1.msra.mxu0 %v2191_v61  ;;  %2286 = vmatpush1.msra.mxu1 %v2193_v48  ;;  %v7249_v48 = vld [vmem:[#allocation64_spill] sm:$0xff] }
 0x67a   :  { %2216 = vmatprep.subr.mxu0 %v2188_v54  ;;  %2287 = vmatprep.subr.mxu1 %v2190_v49 }
 0x67b   :  { %2217 = vmatpush1.msra.mxu0 %v2187_v51  ;;  %2288 = vmatpush1.msra.mxu1 %v2189_v55 }
 0x67c   :  { %2218 = vmatprep.subr.mxu0 %v2184_v29  ;;  %2289 = vmatprep.subr.mxu1 %v2186_v0  ;;  %v7250_v29 = vld [vmem:[#allocation65_spill] sm:$0xff] }
 0x67d   :  { %2219 = vmatpush1.msra.mxu0 %v2183_v57  ;;  %2290 = vmatpush1.msra.mxu1 %v2185_v56  ;;  %v7251_v57 = vld [vmem:[#allocation63_spill] sm:$0xff] }
 0x67e   :  { %2220 = vmatprep.subr.mxu0 %v2180_v60  ;;  %2291 = vmatprep.subr.mxu1 %v2182_v3 }
 0x67f   :  { %2221 = vmatpush1.msra.mxu0 %v2179_v4  ;;  %2292 = vmatpush1.msra.mxu1 %v2181_v52 }
 0x680   :  { %2222 = vmatprep.subr.mxu0 %v2176_v58  ;;  %2293 = vmatprep.subr.mxu1 %v2178_v5 }
 0x681   :  { %2223 = vmatpush1.msra.mxu0 %v2175_v6  ;;  %2294 = vmatpush1.msra.mxu1 %v2177_v7 }
 0x682   :  { %2224 = vmatprep.subr.mxu0 %v2172_v8  ;;  %2295 = vmatprep.subr.mxu1 %v2174_v9 }
 0x683   :  { %2225 = vmatpush1.msra.mxu0 %v2171_v10  ;;  %2296 = vmatpush1.msra.mxu1 %v2173_v13 }
 0x684   :  { %2226 = vmatprep.subr.mxu0 %v2168_v14  ;;  %2297 = vmatprep.subr.mxu1 %v2170_v15 }
 0x685   :  { %2227 = vmatpush1.msra.mxu0 %v2167_v16  ;;  %2298 = vmatpush1.msra.mxu1 %v2169_v17 }
 0x686   :  { %2228 = vmatprep.subr.mxu0 %v2164_v18  ;;  %2299 = vmatprep.subr.mxu1 %v2166_v19  ;;  %v2446_v18 = vld [vmem:[#allocation10 + $0x1e0] sm:$0xff]  ;;  %v2448_v19 = vld [vmem:[#allocation10 + $0x1f0] sm:$0xff] }
 0x687   :  { %2229 = vmatpush1.msra.mxu0 %v2163_v21  ;;  %2300 = vmatpush1.msra.mxu1 %v2165_v22  ;;  %v2443_v21 = vld [vmem:[#allocation10 + $0x1c8] sm:$0xff]  ;;  %v2445_v22 = vld [vmem:[#allocation10 + $0x1d8] sm:$0xff] }
 0x688   :  { %2230 = vmatprep.subr.mxu0 %v2160_v23  ;;  %2301 = vmatprep.subr.mxu1 %v2162_v24  ;;  %v2442_v23 = vld [vmem:[#allocation10 + $0x1c0] sm:$0xff]  ;;  %v2444_v24 = vld [vmem:[#allocation10 + $0x1d0] sm:$0xff] }
 0x689   :  { %2231 = vmatpush1.msra.mxu0 %v2159_v25  ;;  %2302 = vmatpush1.msra.mxu1 %v2161_v26  ;;  %v2441_v25 = vld [vmem:[#allocation10 + $0x1b8] sm:$0xff]  ;;  %v2438_v26 = vld [vmem:[#allocation10 + $0x1a0] sm:$0xff] }
 0x68a   :  { %2232 = vmatprep.subr.mxu0 %v2156_v28  ;;  %2303 = vmatprep.subr.mxu1 %v2158_v30  ;;  %v2440_v28 = vld [vmem:[#allocation10 + $0x1b0] sm:$0xff]  ;;  %v2435_v30 = vld [vmem:[#allocation10 + $0x188] sm:$0xff] }
 0x68b   :  { %2233 = vmatpush1.msra.mxu0 %v2155_v31  ;;  %2304 = vmatpush1.msra.mxu1 %v2157_v32  ;;  %v2437_v31 = vld [vmem:[#allocation10 + $0x198] sm:$0xff]  ;;  %v2434_v32 = vld [vmem:[#allocation10 + $0x180] sm:$0xff] }
 0x68c   :  { %2234 = vmatprep.subr.mxu0 %v2152_v33  ;;  %2305 = vmatprep.subr.mxu1 %v2154_v34  ;;  %v2436_v33 = vld [vmem:[#allocation10 + $0x190] sm:$0xff]  ;;  %v2431_v34 = vld [vmem:[#allocation10 + $0x168] sm:$0xff] }
 0x68d   :  { %2235 = vmatpush1.msra.mxu0 %v2151_v35  ;;  %2306 = vmatpush1.msra.mxu1 %v2153_v36  ;;  %v2433_v35 = vld [vmem:[#allocation10 + $0x178] sm:$0xff]  ;;  %v2430_v36 = vld [vmem:[#allocation10 + $0x160] sm:$0xff] }
 0x68e   :  { %2236 = vmatprep.subr.mxu0 %v2148_v37  ;;  %2307 = vmatprep.subr.mxu1 %v2150_v39  ;;  %v2432_v37 = vld [vmem:[#allocation10 + $0x170] sm:$0xff]  ;;  %v2427_v39 = vld [vmem:[#allocation10 + $0x148] sm:$0xff] }
 0x68f   :  { %2237 = vmatpush1.msra.mxu0 %v2147_v40  ;;  %2308 = vmatpush1.msra.mxu1 %v2149_v41  ;;  %v2429_v40 = vld [vmem:[#allocation10 + $0x158] sm:$0xff]  ;;  %v2426_v41 = vld [vmem:[#allocation10 + $0x140] sm:$0xff] }
 0x690   :  { %2238 = vmatprep.subr.mxu0 %v2144_v42  ;;  %2309 = vmatprep.subr.mxu1 %v2146_v43  ;;  %v2428_v42 = vld [vmem:[#allocation10 + $0x150] sm:$0xff]  ;;  %v2423_v43 = vld [vmem:[#allocation10 + $0x128] sm:$0xff] }
 0x691   :  { %2239 = vmatpush1.msra.mxu0 %v2143_v46  ;;  %2310 = vmatpush1.msra.mxu1 %v2145_v47  ;;  %v2425_v46 = vld [vmem:[#allocation10 + $0x138] sm:$0xff]  ;;  %v2422_v47 = vld [vmem:[#allocation10 + $0x120] sm:$0xff] }
 0x692   :  { %2240 = vmatprep.subr.mxu0 %v2140_v27  ;;  %2311 = vmatprep.subr.mxu1 %v2142_v45  ;;  %v2424_v27 = vld [vmem:[#allocation10 + $0x130] sm:$0xff]  ;;  %v2419_v45 = vld [vmem:[#allocation10 + $0x108] sm:$0xff] }
 0x693   :  { %2241 = vmatpush1.msra.mxu0 %v2139_v53  ;;  %2312 = vmatpush1.msra.mxu1 %v2141_v1  ;;  %v2421_v53 = vld [vmem:[#allocation10 + $0x118] sm:$0xff]  ;;  %v2418_v1 = vld [vmem:[#allocation10 + $0x100] sm:$0xff] }
 0x694   :  { %2472 = vmatprep.subr.mxu0 %v2447_v38  ;;  %2585 = vmatprep.subr.mxu1 %v2449_v20  ;;  %v2420_v38 = vld [vmem:[#allocation10 + $0x110] sm:$0xff]  ;;  %v2415_v20 = vld [vmem:[#allocation10 + $0xe8] sm:$0xff] }
 0x733   :  { %v2037_v50 = vpop.f32.mrf.mxu0  ;;  %v2108_v49 = vpop.f32.mrf.mxu1 }
 0x734   :  { %v2038_v59 = vadd.f32 %v2037_v50, %v7248_v2  ;;  %v2109_v56 = vadd.f32 %v2108_v49, %v7251_v57  ;;  %v2417_v50 = vld [vmem:[#allocation10 + $0xf8] sm:$0xff]  ;;  %v2414_v2 = vld [vmem:[#allocation10 + $0xe0] sm:$0xff]  ;;  %v2407_v49 = vld [vmem:[#allocation10 + $0xa8] sm:$0xff] }
 0x735   :  { %v2039_v11 = vpop.f32.mrf.mxu0  ;;  %v2110_v55 = vpop.f32.mrf.mxu1  ;;  %v2405_v57 = vld [vmem:[#allocation10 + $0x98] sm:$0xff] }
 0x736   :  { %v4291_v61 = vmul.f32 -1.442695, %v2038_v59  ;;  %v2040_v54 = vadd.f32 %v2039_v11, %v7249_v48  ;;  %v2111_v0 = vadd.f32 %v2110_v55, %v7250_v29  ;;  %v2416_v59 = vld [vmem:[#allocation10 + $0xf0] sm:$0xff]  ;;  %v2411_v11 = vld [vmem:[#allocation10 + $0xc8] sm:$0xff]  ;;  %v2410_v48 = vld [vmem:[#allocation10 + $0xc0] sm:$0xff] }
 0x737   :  { %v2406_v55 = vld [vmem:[#allocation10 + $0xa0] sm:$0xff]  ;;  %v2408_v29 = vld [vmem:[#allocation10 + $0xb0] sm:$0xff] }
 0x738   :  { %4483 = vpow2.f32 %v4291_v61  ;;  %v4292_v51 = vmul.f32 -1.442695, %v2040_v54  ;;  %v4293_v60 = vmul.f32 -1.442695, %v2111_v0  ;;  %v2413_v61 = vld [vmem:[#allocation10 + $0xd8] sm:$0xff]  ;;  %v2412_v54 = vld [vmem:[#allocation10 + $0xd0] sm:$0xff] }
 0x739   :  { %v2403_v0 = vld [vmem:[#allocation10 + $0x88] sm:$0xff] }
 0x73a   :  { %4485 = vpow2.f32 %v4292_v51  ;;  %v2409_v51 = vld [vmem:[#allocation10 + $0xb8] sm:$0xff] }
 0x73b   :  { %4487 = vtanh.f32 %v2109_v56  ;;  %v2402_v56 = vld [vmem:[#allocation10 + $0x80] sm:$0xff] }
 0x73c   :  { %4489 = vpow2.f32 %v4293_v60  ;;  %v2404_v60 = vld [vmem:[#allocation10 + $0x90] sm:$0xff] }
 0x745   :  { %v4484_v3 = vpop.eup %4483 }
 0x746   :  { %v2116_v4 = vadd.f32 1.0, %v4484_v3  ;;  %v2399_v3 = vld [vmem:[#allocation10 + $0x68] sm:$0xff] }
 0x747   :  { %v4486_v52 = vpop.eup %4485 }
 0x748   :  { %4491 = vrcp.f32 %v2116_v4  ;;  %v2122_v58 = vadd.f32 1.0, %v4486_v52  ;;  %v4488_v5 = vpop.eup %4487  ;;  %v2401_v4 = vld [vmem:[#allocation10 + $0x78] sm:$0xff]  ;;  %v2398_v52 = vld [vmem:[#allocation10 + $0x60] sm:$0xff] }
 0x749   :  { %v4490_v6 = vpop.eup %4489 }
 0x74a   :  { %4493 = vrcp.f32 %v2122_v58  ;;  %v2129_v10 = vadd.f32 1.0, %v4490_v6  ;;  %v2400_v58 = vld [vmem:[#allocation10 + $0x70] sm:$0xff]  ;;  %v2397_v6 = vld [vmem:[#allocation10 + $0x58] sm:$0xff] }
 0x74c   :  { %4495 = vrcp.f32 %v2129_v10  ;;  %v2393_v10 = vld [vmem:[#allocation10 + $0x38] sm:$0xff] }
 0x755   :  { %v4492_v7 = vpop.eup %4491 }
 0x756   :  { %v2133_v8 = vmul.f32 %v4492_v7, %v4488_v5  ;;  %v2395_v5 = vld [vmem:[#allocation10 + $0x48] sm:$0xff]  ;;  %v2394_v7 = vld [vmem:[#allocation10 + $0x40] sm:$0xff] }
 0x757   :  { %v4494_v9 = vpop.eup %4493 }
 0x758   :  { %v2132_v13 = vmul.f32 %v4494_v9, %v5857_v44  ;;  %v2439_v44 = vld [vmem:[#allocation10 + $0x1a8] sm:$0xff] }
 0x759   :  { %v4496_v15 = vpop.eup %4495  ;;  %v2391_v9 = vld [vmem:[#allocation10 + $0x28] sm:$0xff] }
 0x75a   :  { %v5871_v14 = vadd.f32 %v2133_v8, %v2132_v13  ;;  %v2396_v8 = vld [vmem:[#allocation10 + $0x50] sm:$0xff]  ;;  %v2390_v13 = vld [vmem:[#allocation10 + $0x20] sm:$0xff] }
 0x75c   :  { %4497 = vtanh.f32 %v5871_v14 }
 0x769   :  { %v4498_v16 = vpop.eup %4497 }
 0x76a   :  { %v5874_v17 = vmul.f32 %v4498_v16, %v4496_v15  ;;  %v2392_v15 = vld [vmem:[#allocation10 + $0x30] sm:$0xff]  ;;  %v2387_v16 = vld [vmem:[#allocation10 + $0x8] sm:$0xff] }
 0x76c   :  { %2275 = vmatmul.mubr.f32.vlgmr.msra.gmra.mxu0 %v5874_v17  ;;  %2346 = vmatmul.mubr.f32.vlgmr.msra.gmra.mxu1 %v5874_v17 }
 0x76d   :  { %2473 = vmatpush1.msra.mxu0 %v2446_v18  ;;  %2586 = vmatpush1.msra.mxu1 %v2448_v19  ;;  %v2389_v18 = vld [vmem:[#allocation10 + $0x18] sm:$0xff]  ;;  %v2386_v19 = vld [vmem:[#allocation10] sm:$0xff] }
 0x76e   :  { %2474 = vmatprep.subr.mxu0 %v2443_v21  ;;  %2587 = vmatprep.subr.mxu1 %v2445_v22  ;;  %v2388_v21 = vld [vmem:[#allocation10 + $0x10] sm:$0xff] }
 0x76f   :  { %2475 = vmatpush1.msra.mxu0 %v2442_v23  ;;  %2588 = vmatpush1.msra.mxu1 %v2444_v24  ;;  %v7252_v22 = vld [vmem:[#allocation70_spill] sm:$0xff]  ;;  %v7253_v23 = vld [vmem:[#allocation21_spill] sm:$0xff] }
 0x770   :  { %2476 = vmatprep.subr.mxu0 %v2439_v44  ;;  %2589 = vmatprep.subr.mxu1 %v2441_v25  ;;  %v7254_v24 = vld [vmem:[#allocation41_spill] sm:$0xff]  ;;  %v7255_v44 = vld [vmem:[#allocation44_spill] sm:$0xff]  ;;  %v5910_v25 = vld [vmem:[#allocation12 + $0x1f8] sm:$0xff] }
 0x771   :  { %2477 = vmatpush1.msra.mxu0 %v2438_v26  ;;  %2590 = vmatpush1.msra.mxu1 %v2440_v28  ;;  %7257 = vst [vmem:[#allocation43_spill] sm:$0xff] %v5910_v25  ;;  %v5916_v26 = vld [vmem:[#allocation12 + $0x1f0] sm:$0xff]  ;;  %v5922_v28 = vld [vmem:[#allocation12 + $0x1d8] sm:$0xff] }
 0x772   :  { %2478 = vmatprep.subr.mxu0 %v2435_v30  ;;  %2591 = vmatprep.subr.mxu1 %v2437_v31  ;;  %v5926_v30 = vld [vmem:[#allocation12 + $0x1c0] sm:$0xff]  ;;  %v5928_v31 = vld [vmem:[#allocation12 + $0x1d0] sm:$0xff] }
 0x773   :  { %2479 = vmatpush1.msra.mxu0 %v2434_v32  ;;  %2592 = vmatpush1.msra.mxu1 %v2436_v33  ;;  %v5932_v32 = vld [vmem:[#allocation12 + $0x1a8] sm:$0xff]  ;;  %v5934_v33 = vld [vmem:[#allocation12 + $0x1b8] sm:$0xff] }
 0x774   :  { %2480 = vmatprep.subr.mxu0 %v2431_v34  ;;  %2593 = vmatprep.subr.mxu1 %v2433_v35  ;;  %v5938_v34 = vld [vmem:[#allocation12 + $0x1a0] sm:$0xff]  ;;  %v5940_v35 = vld [vmem:[#allocation12 + $0x1b0] sm:$0xff] }
 0x775   :  { %2481 = vmatpush1.msra.mxu0 %v2430_v36  ;;  %2594 = vmatpush1.msra.mxu1 %v2432_v37  ;;  %v5944_v36 = vld [vmem:[#allocation12 + $0x188] sm:$0xff]  ;;  %v5946_v37 = vld [vmem:[#allocation12 + $0x198] sm:$0xff] }
 0x776   :  { %2482 = vmatprep.subr.mxu0 %v2427_v39  ;;  %2595 = vmatprep.subr.mxu1 %v2429_v40  ;;  %v5950_v39 = vld [vmem:[#allocation12 + $0x180] sm:$0xff]  ;;  %v5952_v40 = vld [vmem:[#allocation12 + $0x190] sm:$0xff] }
 0x777   :  { %2483 = vmatpush1.msra.mxu0 %v2426_v41  ;;  %2596 = vmatpush1.msra.mxu1 %v2428_v42  ;;  %v5956_v41 = vld [vmem:[#allocation12 + $0x168] sm:$0xff]  ;;  %v5958_v42 = vld [vmem:[#allocation12 + $0x178] sm:$0xff] }
 0x778   :  { %2484 = vmatprep.subr.mxu0 %v2423_v43  ;;  %2597 = vmatprep.subr.mxu1 %v2425_v46  ;;  %v5962_v43 = vld [vmem:[#allocation12 + $0x160] sm:$0xff]  ;;  %v5964_v46 = vld [vmem:[#allocation12 + $0x170] sm:$0xff] }
 0x779   :  { %2485 = vmatpush1.msra.mxu0 %v2422_v47  ;;  %2598 = vmatpush1.msra.mxu1 %v2424_v27  ;;  %v5968_v47 = vld [vmem:[#allocation12 + $0x148] sm:$0xff]  ;;  %v5970_v27 = vld [vmem:[#allocation12 + $0x158] sm:$0xff] }
 0x77a   :  { %2486 = vmatprep.subr.mxu0 %v2419_v45  ;;  %2599 = vmatprep.subr.mxu1 %v2421_v53  ;;  %v5974_v45 = vld [vmem:[#allocation12 + $0x140] sm:$0xff]  ;;  %v5976_v53 = vld [vmem:[#allocation12 + $0x150] sm:$0xff] }
 0x77b   :  { %2487 = vmatpush1.msra.mxu0 %v2418_v1  ;;  %2600 = vmatpush1.msra.mxu1 %v2420_v38  ;;  %v5980_v1 = vld [vmem:[#allocation12 + $0x128] sm:$0xff]  ;;  %v5982_v38 = vld [vmem:[#allocation12 + $0x138] sm:$0xff] }
 0x77c   :  { %2488 = vmatprep.subr.mxu0 %v2415_v20  ;;  %2601 = vmatprep.subr.mxu1 %v2417_v50  ;;  %v5986_v20 = vld [vmem:[#allocation12 + $0x120] sm:$0xff]  ;;  %v5988_v50 = vld [vmem:[#allocation12 + $0x130] sm:$0xff] }
 0x77d   :  { %2489 = vmatpush1.msra.mxu0 %v2414_v2  ;;  %2602 = vmatpush1.msra.mxu1 %v2416_v59  ;;  %v5992_v2 = vld [vmem:[#allocation12 + $0x108] sm:$0xff]  ;;  %v5994_v59 = vld [vmem:[#allocation12 + $0x118] sm:$0xff] }
 0x77e   :  { %2490 = vmatprep.subr.mxu0 %v2411_v11  ;;  %2603 = vmatprep.subr.mxu1 %v2413_v61  ;;  %v5998_v11 = vld [vmem:[#allocation12 + $0x100] sm:$0xff]  ;;  %v6000_v61 = vld [vmem:[#allocation12 + $0x110] sm:$0xff] }
 0x77f   :  { %2491 = vmatpush1.msra.mxu0 %v2410_v48  ;;  %2604 = vmatpush1.msra.mxu1 %v2412_v54  ;;  %v6004_v48 = vld [vmem:[#allocation12 + $0xe8] sm:$0xff]  ;;  %v6006_v54 = vld [vmem:[#allocation12 + $0xf8] sm:$0xff] }
 0x780   :  { %2492 = vmatprep.subr.mxu0 %v2407_v49  ;;  %2605 = vmatprep.subr.mxu1 %v2409_v51  ;;  %v6010_v49 = vld [vmem:[#allocation12 + $0xe0] sm:$0xff]  ;;  %v6012_v51 = vld [vmem:[#allocation12 + $0xf0] sm:$0xff] }
 0x781   :  { %2493 = vmatpush1.msra.mxu0 %v2406_v55  ;;  %2606 = vmatpush1.msra.mxu1 %v2408_v29  ;;  %v6016_v55 = vld [vmem:[#allocation12 + $0xc8] sm:$0xff]  ;;  %v6018_v29 = vld [vmem:[#allocation12 + $0xd8] sm:$0xff] }
 0x782   :  { %2494 = vmatprep.subr.mxu0 %v2403_v0  ;;  %2607 = vmatprep.subr.mxu1 %v2405_v57  ;;  %v6022_v0 = vld [vmem:[#allocation12 + $0xc0] sm:$0xff]  ;;  %v6024_v57 = vld [vmem:[#allocation12 + $0xd0] sm:$0xff] }
 0x783   :  { %2495 = vmatpush1.msra.mxu0 %v2402_v56  ;;  %2608 = vmatpush1.msra.mxu1 %v2404_v60  ;;  %v6028_v56 = vld [vmem:[#allocation12 + $0xa8] sm:$0xff]  ;;  %v6030_v60 = vld [vmem:[#allocation12 + $0xb8] sm:$0xff] }
 0x784   :  { %2496 = vmatprep.subr.mxu0 %v2399_v3  ;;  %2609 = vmatprep.subr.mxu1 %v2401_v4  ;;  %v6034_v3 = vld [vmem:[#allocation12 + $0xa0] sm:$0xff]  ;;  %v6036_v4 = vld [vmem:[#allocation12 + $0xb0] sm:$0xff] }
 0x785   :  { %2497 = vmatpush1.msra.mxu0 %v2398_v52  ;;  %2610 = vmatpush1.msra.mxu1 %v2400_v58  ;;  %7258 = vst [vmem:[#allocation46_spill] sm:$0xff] %v6036_v4  ;;  %v6040_v52 = vld [vmem:[#allocation12 + $0x88] sm:$0xff]  ;;  %v6042_v58 = vld [vmem:[#allocation12 + $0x98] sm:$0xff] }
 0x786   :  { %2498 = vmatprep.subr.mxu0 %v2395_v5  ;;  %2611 = vmatprep.subr.mxu1 %v2397_v6  ;;  %7259 = vst [vmem:[#allocation48_spill] sm:$0xff] %v6040_v52  ;;  %7260 = vst [vmem:[#allocation49_spill] sm:$0xff] %v6042_v58  ;;  %v6046_v5 = vld [vmem:[#allocation12 + $0x80] sm:$0xff]  ;;  %v6048_v6 = vld [vmem:[#allocation12 + $0x90] sm:$0xff] }
 0x787   :  { %2499 = vmatpush1.msra.mxu0 %v2394_v7  ;;  %2612 = vmatpush1.msra.mxu1 %v2396_v8  ;;  %7261 = vst [vmem:[#allocation47_spill] sm:$0xff] %v6046_v5  ;;  %7262 = vst [vmem:[#allocation50_spill] sm:$0xff] %v6048_v6  ;;  %v6052_v7 = vld [vmem:[#allocation12 + $0x68] sm:$0xff]  ;;  %v6054_v8 = vld [vmem:[#allocation12 + $0x78] sm:$0xff] }
 0x788   :  { %2500 = vmatprep.subr.mxu0 %v2391_v9  ;;  %2613 = vmatprep.subr.mxu1 %v2393_v10  ;;  %7263 = vst [vmem:[#allocation52_spill] sm:$0xff] %v6052_v7  ;;  %7264 = vst [vmem:[#allocation53_spill] sm:$0xff] %v6054_v8  ;;  %v6058_v9 = vld [vmem:[#allocation12 + $0x60] sm:$0xff]  ;;  %v6060_v10 = vld [vmem:[#allocation12 + $0x70] sm:$0xff] }
 0x789   :  { %2501 = vmatpush1.msra.mxu0 %v2390_v13  ;;  %2614 = vmatpush1.msra.mxu1 %v2392_v15  ;;  %7265 = vst [vmem:[#allocation51_spill] sm:$0xff] %v6058_v9  ;;  %7266 = vst [vmem:[#allocation22_spill] sm:$0xff] %v6060_v10  ;;  %v6064_v13 = vld [vmem:[#allocation12 + $0x48] sm:$0xff]  ;;  %v6066_v15 = vld [vmem:[#allocation12 + $0x58] sm:$0xff] }
 0x78a   :  { %2502 = vmatprep.subr.mxu0 %v2387_v16  ;;  %2615 = vmatprep.subr.mxu1 %v2389_v18  ;;  %7267 = vst [vmem:[#allocation23_spill] sm:$0xff] %v6064_v13  ;;  %7268 = vst [vmem:[#allocation54_spill] sm:$0xff] %v6066_v15  ;;  %v6070_v16 = vld [vmem:[#allocation12 + $0x40] sm:$0xff]  ;;  %v6072_v18 = vld [vmem:[#allocation12 + $0x50] sm:$0xff] }
 0x78b   :  { %2503 = vmatpush1.msra.mxu0 %v2386_v19  ;;  %2536 = vmatprep.mubr.f32.mxu0 %v7242_v12  ;;  %7269 = vst [vmem:[#allocation56_spill] sm:$0xff] %v6070_v16  ;;  %7270 = vst [vmem:[#allocation57_spill] sm:$0xff] %v6072_v18  ;;  %v6076_v19 = vld [vmem:[#allocation12 + $0x28] sm:$0xff] }
 0x78c   :  { %2616 = vmatpush1.msra.mxu1 %v2388_v21  ;;  %2649 = vmatprep.mubr.f32.mxu1 %v7242_v12  ;;  %7271 = vst [vmem:[#allocation55_spill] sm:$0xff] %v6076_v19  ;;  %v6078_v21 = vld [vmem:[#allocation12 + $0x38] sm:$0xff] }
 0x78d   :  { %2537 = vmatmul.mubr.f32.vlgmr.msra.gmra.mxu0 %v7252_v22  ;;  %2650 = vmatmul.mubr.f32.vlgmr.msra.gmra.mxu1 %v7252_v22  ;;  %7272 = vst [vmem:[#allocation24_spill] sm:$0xff] %v6078_v21  ;;  %v6082_v22 = vld [vmem:[#allocation12 + $0x20] sm:$0xff] }
 0x78e   :  { %2542 = vmatprep.mubr.f32.mxu0 %v7242_v12  ;;  %2655 = vmatprep.mubr.f32.mxu1 %v7242_v12  ;;  %7273 = vst [vmem:[#allocation25_spill] sm:$0xff] %v6082_v22 }
 0x78f   :  { %2869 = vmatprep.subr.mxu1 %v5910_v25 }
 0x790   :  { %2870 = vmatpush1.msra.mxu1 %v5916_v26 }
 0x791   :  { %2543 = vmatmul.mubr.f32.gmra.mxu0 %v7253_v23  ;;  %2656 = vmatmul.mubr.f32.gmra.mxu1 %v7253_v23  ;;  %v6084_v23 = vld [vmem:[#allocation12 + $0x30] sm:$0xff] }
 0x792   :  { %2548 = vmatprep.mubr.f32.mxu0 %v7242_v12  ;;  %2661 = vmatprep.mubr.f32.mxu1 %v7242_v12  ;;  %7274 = vst [vmem:[#allocation26_spill] sm:$0xff] %v6084_v23 }
 0x793   :  { %2871 = vmatprep.subr.mxu1 %v5922_v28 }
 0x794   :  { %2872 = vmatpush1.msra.mxu1 %v5928_v31 }
 0x795   :  { %2549 = vmatmul.mubr.f32.gmra.mxu0 %v7254_v24  ;;  %2662 = vmatmul.mubr.f32.gmra.mxu1 %v7254_v24  ;;  %v6088_v24 = vld [vmem:[#allocation12 + $0x8] sm:$0xff] }
 0x796   :  { %2554 = vmatprep.mubr.f32.mxu0 %v7242_v12  ;;  %2667 = vmatprep.mubr.f32.mxu1 %v7242_v12  ;;  %7275 = vst [vmem:[#allocation27_spill] sm:$0xff] %v6088_v24 }
 0x797   :  { %2873 = vmatprep.subr.mxu1 %v5934_v33 }
 0x798   :  { %2874 = vmatpush1.msra.mxu1 %v5940_v35 }
 0x799   :  { %2555 = vmatmul.mubr.f32.gmra.mxu0 %v7255_v44  ;;  %2668 = vmatmul.mubr.f32.gmra.mxu1 %v7255_v44  ;;  %v6090_v44 = vld [vmem:[#allocation12 + $0x18] sm:$0xff] }
 0x79a   :  { %2560 = vmatprep.mubr.f32.mxu0 %v7242_v12  ;;  %2673 = vmatprep.mubr.f32.mxu1 %v7242_v12  ;;  %7276 = vst [vmem:[#allocation28_spill] sm:$0xff] %v6090_v44 }
 0x79b   :  { %2875 = vmatprep.subr.mxu1 %v5946_v37 }
 0x79c   :  { %2876 = vmatpush1.msra.mxu1 %v5952_v40 }
 0x79d   :  { %2561 = vmatmul.mubr.f32.gmra.mxu0 %v5784_v62  ;;  %2674 = vmatmul.mubr.f32.gmra.mxu1 %v5784_v62  ;;  %v5908_v62 = vld [vmem:[#allocation12 + $0x1e8] sm:$0xff] }
 0x79e   :  { %2566 = vmatprep.mubr.f32.mxu0 %v7242_v12  ;;  %2679 = vmatprep.mubr.f32.mxu1 %v7242_v12  ;;  %7256 = vst [vmem:[#allocation45_spill] sm:$0xff] %v5908_v62 }
 0x79f   :  { %2798 = vmatprep.subr.mxu0 %v5908_v62  ;;  %2877 = vmatprep.subr.mxu1 %v5958_v42 }
 0x7a0   :  { %2878 = vmatpush1.msra.mxu1 %v5964_v46 }
 0x7a1   :  { %2567 = vmatmul.mubr.f32.gmra.mxu0 %v5860_v63  ;;  %2680 = vmatmul.mubr.f32.gmra.mxu1 %v5860_v63  ;;  %v5914_v63 = vld [vmem:[#allocation12 + $0x1e0] sm:$0xff] }
 0x7a2   :  { %2572 = vmatprep.mubr.f32.mxu0 %v7242_v12  ;;  %2685 = vmatprep.mubr.f32.mxu1 %v7242_v12 }
 0x7a3   :  { %2799 = vmatpush1.msra.mxu0 %v5914_v63  ;;  %2879 = vmatprep.subr.mxu1 %v5970_v27 }
 0x7a4   :  { %2880 = vmatpush1.msra.mxu1 %v5976_v53 }
 0x7a5   :  { %2573 = vmatmul.mubr.f32.gmra.mxu0 %v5874_v17  ;;  %2686 = vmatmul.mubr.f32.gmra.mxu1 %v5874_v17  ;;  %v5920_v17 = vld [vmem:[#allocation12 + $0x1c8] sm:$0xff] }
 0x7a6   :  { %2578 = vmatprep.mubr.f32.mxu0 %v7242_v12  ;;  %2691 = vmatprep.mubr.f32.mxu1 %v7242_v12 }
 0x7a7   :  { %2800 = vmatprep.subr.mxu0 %v5920_v17  ;;  %2881 = vmatprep.subr.mxu1 %v5982_v38 }
 0x7a8   :  { %2801 = vmatpush1.msra.mxu0 %v5926_v30  ;;  %2882 = vmatpush1.msra.mxu1 %v5988_v50 }
 0x7a9   :  { %2802 = vmatprep.subr.mxu0 %v5932_v32  ;;  %2883 = vmatprep.subr.mxu1 %v5994_v59 }
 0x7aa   :  { %2803 = vmatpush1.msra.mxu0 %v5938_v34  ;;  %2884 = vmatpush1.msra.mxu1 %v6000_v61 }
 0x7ab   :  { %2804 = vmatprep.subr.mxu0 %v5944_v36  ;;  %2885 = vmatprep.subr.mxu1 %v6006_v54 }
 0x7ac   :  { %2805 = vmatpush1.msra.mxu0 %v5950_v39  ;;  %2886 = vmatpush1.msra.mxu1 %v6012_v51 }
 0x7ad   :  { %2806 = vmatprep.subr.mxu0 %v5956_v41  ;;  %2887 = vmatprep.subr.mxu1 %v6018_v29 }
 0x7ae   :  { %2807 = vmatpush1.msra.mxu0 %v5962_v43  ;;  %2888 = vmatpush1.msra.mxu1 %v6024_v57 }
 0x7af   :  { %2808 = vmatprep.subr.mxu0 %v5968_v47  ;;  %2889 = vmatprep.subr.mxu1 %v6030_v60 }
 0x7b0   :  { %2809 = vmatpush1.msra.mxu0 %v5974_v45  ;;  %2890 = vmatpush1.msra.mxu1 %v6036_v4 }
 0x7b1   :  { %2810 = vmatprep.subr.mxu0 %v5980_v1  ;;  %2891 = vmatprep.subr.mxu1 %v6042_v58 }
 0x7b2   :  { %2811 = vmatpush1.msra.mxu0 %v5986_v20  ;;  %2892 = vmatpush1.msra.mxu1 %v6048_v6 }
 0x7b3   :  { %2812 = vmatprep.subr.mxu0 %v5992_v2  ;;  %2893 = vmatprep.subr.mxu1 %v6054_v8  ;;  %v7281_v8 = vld [vmem:[#allocation69_spill] sm:$0xff] }
 0x7b4   :  { %2813 = vmatpush1.msra.mxu0 %v5998_v11  ;;  %2894 = vmatpush1.msra.mxu1 %v6060_v10 }
 0x7b5   :  { %2814 = vmatprep.subr.mxu0 %v6004_v48  ;;  %2895 = vmatprep.subr.mxu1 %v6066_v15 }
 0x7b6   :  { %2815 = vmatpush1.msra.mxu0 %v6010_v49  ;;  %2896 = vmatpush1.msra.mxu1 %v6072_v18  ;;  %v6092_v18 = vld [vmem:[#allocation12] sm:$0xff] }
 0x7b7   :  { %2816 = vmatprep.subr.mxu0 %v6016_v55  ;;  %2897 = vmatprep.subr.mxu1 %v6078_v21  ;;  %7277 = vst [vmem:[#allocation29_spill] sm:$0xff] %v6092_v18 }
 0x7b8   :  { %2817 = vmatpush1.msra.mxu0 %v6022_v0  ;;  %2898 = vmatpush1.msra.mxu1 %v6084_v23 }
 0x7b9   :  { %2818 = vmatprep.subr.mxu0 %v6028_v56  ;;  %2899 = vmatprep.subr.mxu1 %v6090_v44 }
 0x7ba   :  { %2819 = vmatpush1.msra.mxu0 %v6034_v3 }
 0x7bb   :  { %2820 = vmatprep.subr.mxu0 %v6040_v52 }
 0x7bc   :  { %2821 = vmatpush1.msra.mxu0 %v6046_v5 }
 0x7bd   :  { %2822 = vmatprep.subr.mxu0 %v6052_v7  ;;  %v7282_v7 = vld [vmem:[#allocation67_spill] sm:$0xff] }
 0x7be   :  { %2823 = vmatpush1.msra.mxu0 %v6058_v9 }
 0x7bf   :  { %2824 = vmatprep.subr.mxu0 %v6064_v13  ;;  %v7280_v13 = vld [vmem:[#allocation68_spill] sm:$0xff] }
 0x7c0   :  { %2825 = vmatpush1.msra.mxu0 %v6070_v16 }
 0x7c1   :  { %2826 = vmatprep.subr.mxu0 %v6076_v19  ;;  %v6096_v19 = vld [vmem:[#allocation12 + $0x10] sm:$0xff] }
 0x7c2   :  { %2827 = vmatpush1.msra.mxu0 %v6082_v22  ;;  %7278 = vst [vmem:[#allocation30_spill] sm:$0xff] %v6096_v19  ;;  %2900 = vmatpush1.msra.mxu1 %v6096_v19  ;;  %v7279_v22 = vld [vmem:[#allocation66_spill] sm:$0xff] }
 0x7c3   :  { %2828 = vmatprep.subr.mxu0 %v6088_v24  ;;  %3039 = vmatprep.subr.mxu1 %v5910_v25 }
 0x7c4   :  { %2829 = vmatpush1.msra.mxu0 %v6092_v18 }
 0x7c5   :  { %2968 = vmatprep.subr.mxu0 %v5908_v62 }
 0x82c   :  { %v2276_v23 = vpop.f32.mrf.mxu0  ;;  %v2347_v24 = vpop.f32.mrf.mxu1 }
 0x82d   :  { %v2277_v21 = vadd.f32 %v2276_v23, %v7279_v22  ;;  %v2348_v19 = vadd.f32 %v2347_v24, %v7282_v7  ;;  %v7289_v24 = vld [vmem:[#allocation23_spill] sm:$0xff] }
 0x82e   :  { %v2278_v16 = vpop.f32.mrf.mxu0  ;;  %v2349_v9 = vpop.f32.mrf.mxu1 }
 0x82f   :  { %v4294_v15 = vmul.f32 -1.442695, %v2277_v21  ;;  %v2279_v10 = vadd.f32 %v2278_v16, %v7280_v13  ;;  %v2350_v18 = vadd.f32 %v2349_v9, %v7281_v8 }
 0x831   :  { %4499 = vpow2.f32 %v4294_v15  ;;  %v4295_v44 = vmul.f32 -1.442695, %v2279_v10  ;;  %v4296_v6 = vmul.f32 -1.442695, %v2350_v18  ;;  %v7287_v18 = vld [vmem:[#allocation51_spill] sm:$0xff] }
 0x833   :  { %4501 = vpow2.f32 %v4295_v44 }
 0x834   :  { %4503 = vtanh.f32 %v2348_v19  ;;  %v7288_v19 = vld [vmem:[#allocation22_spill] sm:$0xff] }
 0x835   :  { %4505 = vpow2.f32 %v4296_v6  ;;  %v7286_v6 = vld [vmem:[#allocation53_spill] sm:$0xff] }
 0x83e   :  { %v4500_v62 = vpop.eup %4499 }
 0x83f   :  { %v2355_v5 = vadd.f32 1.0, %v4500_v62 }
 0x840   :  { %v4502_v25 = vpop.eup %4501 }
 0x841   :  { %4507 = vrcp.f32 %v2355_v5  ;;  %v2361_v22 = vadd.f32 1.0, %v4502_v25  ;;  %v4504_v21 = vpop.eup %4503  ;;  %v7284_v25 = vld [vmem:[#allocation50_spill] sm:$0xff]  ;;  %v7285_v5 = vld [vmem:[#allocation52_spill] sm:$0xff] }
 0x842   :  { %v4506_v13 = vpop.eup %4505 }
 0x843   :  { %4509 = vrcp.f32 %v2361_v22  ;;  %v2368_v23 = vadd.f32 1.0, %v4506_v13  ;;  %v7290_v22 = vld [vmem:[#allocation54_spill] sm:$0xff]  ;;  %v7292_v13 = vld [vmem:[#allocation57_spill] sm:$0xff] }
 0x845   :  { %4511 = vrcp.f32 %v2368_v23  ;;  %v7296_v23 = vld [vmem:[#allocation26_spill] sm:$0xff] }
 0x84e   :  { %v4508_v15 = vpop.eup %4507 }
 0x84f   :  { %v2372_v16 = vmul.f32 %v4508_v15, %v4504_v21  ;;  %v7291_v21 = vld [vmem:[#allocation56_spill] sm:$0xff]  ;;  %v7293_v15 = vld [vmem:[#allocation55_spill] sm:$0xff] }
 0x850   :  { %v4510_v10 = vpop.eup %4509 }
 0x851   :  { %v2371_v44 = vmul.f32 %v4510_v10, %v5871_v14  ;;  %v7283_v14 = vld [vmem:[#allocation47_spill] sm:$0xff]  ;;  %v7295_v10 = vld [vmem:[#allocation25_spill] sm:$0xff] }
 0x852   :  { %v4512_v7 = vpop.eup %4511 }
 0x853   :  { %v2373_v8 = vadd.f32 %v2372_v16, %v2371_v44  ;;  %v7294_v16 = vld [vmem:[#allocation24_spill] sm:$0xff]  ;;  %v7297_v44 = vld [vmem:[#allocation27_spill] sm:$0xff] }
 0x855   :  { %4513 = vtanh.f32 %v2373_v8  ;;  %v7298_v8 = vld [vmem:[#allocation28_spill] sm:$0xff] }
 0x862   :  { %v4514_v9 = vpop.eup %4513 }
 0x863   :  { %v2375_v62 = vmul.f32 %v4514_v9, %v4512_v7  ;;  %v7299_v7 = vld [vmem:[#allocation29_spill] sm:$0xff]  ;;  %v7300_v9 = vld [vmem:[#allocation30_spill] sm:$0xff] }
 0x865   :  { %2579 = vmatmul.mubr.f32.gmra.mxu0 %v2375_v62  ;;  %2692 = vmatmul.mubr.f32.gmra.mxu1 %v2375_v62  ;;  %v7301_v62 = vld [vmem:[#allocation45_spill] sm:$0xff] }
 0x866   :  { %2862 = vmatprep.mubr.f32.mxu0 %v7242_v12  ;;  %2933 = vmatprep.mubr.f32.mxu1 %v7242_v12 }
 0x869   :  { %2863 = vmatmul.mubr.f32.vlgmr.msra.gmra.mxu0 %v7242_v12  ;;  %2934 = vmatmul.mubr.f32.vlgmr.msra.gmra.mxu1 %v7242_v12 }
 0x86a   :  { %2969 = vmatpush1.msra.mxu0 %v5914_v63  ;;  %3040 = vmatpush1.msra.mxu1 %v5916_v26 }
 0x86b   :  { %2970 = vmatprep.subr.mxu0 %v5920_v17  ;;  %3041 = vmatprep.subr.mxu1 %v5922_v28 }
 0x86c   :  { %2971 = vmatpush1.msra.mxu0 %v5926_v30  ;;  %3042 = vmatpush1.msra.mxu1 %v5928_v31 }
 0x86d   :  { %2972 = vmatprep.subr.mxu0 %v5932_v32  ;;  %3043 = vmatprep.subr.mxu1 %v5934_v33 }
 0x86e   :  { %2973 = vmatpush1.msra.mxu0 %v5938_v34  ;;  %3044 = vmatpush1.msra.mxu1 %v5940_v35 }
 0x86f   :  { %2974 = vmatprep.subr.mxu0 %v5944_v36  ;;  %3045 = vmatprep.subr.mxu1 %v5946_v37 }
 0x870   :  { %2975 = vmatpush1.msra.mxu0 %v5950_v39  ;;  %3046 = vmatpush1.msra.mxu1 %v5952_v40 }
 0x871   :  { %2976 = vmatprep.subr.mxu0 %v5956_v41  ;;  %3047 = vmatprep.subr.mxu1 %v5958_v42 }
 0x872   :  { %2977 = vmatpush1.msra.mxu0 %v5962_v43  ;;  %3048 = vmatpush1.msra.mxu1 %v5964_v46 }
 0x873   :  { %2978 = vmatprep.subr.mxu0 %v5968_v47  ;;  %3049 = vmatprep.subr.mxu1 %v5970_v27 }
 0x874   :  { %2979 = vmatpush1.msra.mxu0 %v5974_v45  ;;  %3050 = vmatpush1.msra.mxu1 %v5976_v53 }
 0x875   :  { %2980 = vmatprep.subr.mxu0 %v5980_v1  ;;  %3051 = vmatprep.subr.mxu1 %v5982_v38 }
 0x876   :  { %2981 = vmatpush1.msra.mxu0 %v5986_v20  ;;  %3052 = vmatpush1.msra.mxu1 %v5988_v50 }
 0x877   :  { %2982 = vmatprep.subr.mxu0 %v5992_v2  ;;  %3053 = vmatprep.subr.mxu1 %v5994_v59 }
 0x878   :  { %2983 = vmatpush1.msra.mxu0 %v5998_v11  ;;  %3054 = vmatpush1.msra.mxu1 %v6000_v61 }
 0x879   :  { %2984 = vmatprep.subr.mxu0 %v6004_v48  ;;  %3055 = vmatprep.subr.mxu1 %v6006_v54 }
 0x87a   :  { %2985 = vmatpush1.msra.mxu0 %v6010_v49  ;;  %3056 = vmatpush1.msra.mxu1 %v6012_v51 }
 0x87b   :  { %2986 = vmatprep.subr.mxu0 %v6016_v55  ;;  %3057 = vmatprep.subr.mxu1 %v6018_v29 }
 0x87c   :  { %2987 = vmatpush1.msra.mxu0 %v6022_v0  ;;  %3058 = vmatpush1.msra.mxu1 %v6024_v57 }
 0x87d   :  { %2988 = vmatprep.subr.mxu0 %v6028_v56  ;;  %3059 = vmatprep.subr.mxu1 %v6030_v60 }
 0x87e   :  { %2989 = vmatpush1.msra.mxu0 %v6034_v3  ;;  %3060 = vmatpush1.msra.mxu1 %v6036_v4 }
 0x87f   :  { %2990 = vmatprep.subr.mxu0 %v6040_v52  ;;  %3061 = vmatprep.subr.mxu1 %v6042_v58 }
 0x880   :  { %2991 = vmatpush1.msra.mxu0 %v7283_v14  ;;  %3062 = vmatpush1.msra.mxu1 %v7284_v25 }
 0x881   :  { %2992 = vmatprep.subr.mxu0 %v7285_v5  ;;  %3063 = vmatprep.subr.mxu1 %v7286_v6 }
 0x882   :  { %2993 = vmatpush1.msra.mxu0 %v7287_v18  ;;  %3064 = vmatpush1.msra.mxu1 %v7288_v19 }
 0x883   :  { %2994 = vmatprep.subr.mxu0 %v7289_v24  ;;  %3065 = vmatprep.subr.mxu1 %v7290_v22 }
 0x884   :  { %2995 = vmatpush1.msra.mxu0 %v7291_v21  ;;  %3066 = vmatpush1.msra.mxu1 %v7292_v13 }
 0x885   :  { %2996 = vmatprep.subr.mxu0 %v7293_v15  ;;  %3067 = vmatprep.subr.mxu1 %v7294_v16  ;;  %v7302_v15 = vld [vmem:[#allocation43_spill] sm:$0xff]  ;;  %v2538_v16 = vpop.f32.mrf.mxu0 }
 0x886   :  { %2997 = vmatpush1.msra.mxu0 %v7295_v10  ;;  %3068 = vmatpush1.msra.mxu1 %v7296_v23  ;;  %v2651_v10 = vpop.f32.mrf.mxu1 }
 0x887   :  { %2998 = vmatprep.subr.mxu0 %v7297_v44  ;;  %3069 = vmatprep.subr.mxu1 %v7298_v8  ;;  %v2540_v13 = vpop.f32.mrf.mxu0 }
 0x888   :  { %2999 = vmatpush1.msra.mxu0 %v7299_v7  ;;  %3032 = vmatprep.mubr.f32.mxu0 %v7242_v12  ;;  %v2653_v23 = vpop.f32.mrf.mxu1 }
 0x889   :  { %3070 = vmatpush1.msra.mxu1 %v7300_v9  ;;  %3103 = vmatprep.mubr.f32.mxu1 %v7242_v12  ;;  %v6177_v21 = vpop.f32.mrf.mxu0 }
 0x88a   :  { %3138 = vmatprep.subr.mxu0 %v7301_v62  ;;  %3209 = vmatprep.subr.mxu1 %v7302_v15  ;;  %7303 = vst [vmem:[#allocation31_spill] sm:$0xff] %v6177_v21  ;;  %v6179_v44 = vpop.f32.mrf.mxu1 }
 0x88b   :  { %7304 = vst [vmem:[#allocation32_spill] sm:$0xff] %v6179_v44  ;;  %v6181_v8 = vpop.f32.mrf.mxu0 }
 0x88c   :  { %7305 = vst [vmem:[#allocation33_spill] sm:$0xff] %v6181_v8  ;;  %v6183_v7 = vpop.f32.mrf.mxu1 }
 0x88d   :  { %7306 = vst [vmem:[#allocation34_spill] sm:$0xff] %v6183_v7  ;;  %v6185_v22 = vpop.f32.mrf.mxu0 }
 0x88e   :  { %7307 = vst [vmem:[#allocation35_spill] sm:$0xff] %v6185_v22  ;;  %v6187_v9 = vpop.f32.mrf.mxu1 }
 0x88f   :  { %7308 = vst [vmem:[#allocation36_spill] sm:$0xff] %v6187_v9  ;;  %v6189_v12 = vpop.f32.mrf.mxu0 }
 0x890   :  { %7309 = vst [vmem:[#allocation37_spill] sm:$0xff] %v6189_v12  ;;  %v6191_v62 = vpop.f32.mrf.mxu1 }
 0x891   :  { %7310 = vst [vmem:[#allocation38_spill] sm:$0xff] %v6191_v62  ;;  %v6193_v15 = vpop.f32.mrf.mxu0 }
 0x892   :  { %7311 = vst [vmem:[#allocation39_spill] sm:$0xff] %v6193_v15  ;;  %v6195_v24 = vpop.f32.mrf.mxu1 }
 0x893   :  { %7312 = vst [vmem:[#allocation40_spill] sm:$0xff] %v6195_v24  ;;  %v6197_v19 = vpop.f32.mrf.mxu0 }
 0x894   :  { %7313 = vst [vmem:[#allocation58_spill] sm:$0xff] %v6197_v19  ;;  %v6199_v21 = vpop.f32.mrf.mxu1 }
 0x895   :  { %7314 = vst [vmem:[#allocation60_spill] sm:$0xff] %v6199_v21  ;;  %v6201_v44 = vpop.f32.mrf.mxu0 }
 0x896   :  { %7315 = vst [vmem:[#allocation61_spill] sm:$0xff] %v6201_v44  ;;  %v6203_v8 = vpop.f32.mrf.mxu1 }
 0x897   :  { %7316 = vst [vmem:[#allocation59_spill] sm:$0xff] %v6203_v8  ;;  %v6205_v7 = vpop.f32.mrf.mxu0  ;;  %v2450_v8 = vld [vmem:[%s6891_s6] sm:$0xf] }
 0x898   :  { %7317 = vst [vmem:[#allocation62_spill] sm:$0xff] %v6205_v7  ;;  %v6207_v22 = vpop.f32.mrf.mxu1  ;;  %v7326_v7 = vld [vmem:[#allocation42_spill] sm:$0xff] }
 0x899   :  { %7318 = vst [vmem:[#allocation64_spill] sm:$0xff] %v6207_v22  ;;  %v6209_v9 = vpop.f32.mrf.mxu0  ;;  %v7327_v22 = vsub.s32 0, %v7326_v7 }
 0x89a   :  { %7319 = vst [vmem:[#allocation65_spill] sm:$0xff] %v6209_v9  ;;  %v6211_v12 = vpop.f32.mrf.mxu1 }
 0x89b   :  { %7320 = vst [vmem:[#allocation63_spill] sm:$0xff] %v6211_v12  ;;  %v6213_v62 = vpop.f32.mrf.mxu0  ;;  %v6228_v21 = vrot.slane %v2450_v8, %v7327_v22 }
 0x89c   :  { %7321 = vst [vmem:[#allocation70_spill] sm:$0xff] %v6213_v62  ;;  %v6215_v15 = vpop.f32.mrf.mxu1 }
 0x89d   :  { %7322 = vst [vmem:[#allocation21_spill] sm:$0xff] %v6215_v15  ;;  %v6217_v24 = vpop.f32.mrf.mxu0  ;;  %7328 = vst [vmem:[#allocation68_spill] sm:$0xff] %v6228_v21  ;;  %v7331_v15 = vsub.s32 1, %v7326_v7  ;;  %v2539_v18 = vadd.f32 %v2538_v16, %v6228_v21 }
 0x89e   :  { %7323 = vst [vmem:[#allocation41_spill] sm:$0xff] %v6217_v24  ;;  %v6219_v19 = vpop.f32.mrf.mxu1 }
 0x89f   :  { %7324 = vst [vmem:[#allocation44_spill] sm:$0xff] %v6219_v19  ;;  %v6224_v44 = vpop.f32.mrf.mxu0  ;;  %v6236_v62 = vrot.slane %v2450_v8, %v7331_v15  ;;  %v7335_v15 = vsub.s32 3, %v7326_v7 }
 0x8a0   :  { %7325 = vst [vmem:[#allocation66_spill] sm:$0xff] %v6224_v44  ;;  %v6230_v9 = vpop.f32.mrf.mxu1 }
 0x8a1   :  { %7329 = vst [vmem:[#allocation69_spill] sm:$0xff] %v6230_v9  ;;  %v2541_v44 = vadd.f32 %v2540_v13, %v6236_v62  ;;  %v6248_v52 = vrot.slane %v2450_v8, %v7335_v15 }
 0x8a3   :  { %7336 = vst [vmem:[#allocation73_spill] sm:$0xff] %v6248_v52  ;;  %v2654_v16 = vadd.f32 %v2653_v23, %v6248_v52 }
 0x925   :  { %v6232_v12 = vpop.f32.mrf.mxu0  ;;  %v6238_v24 = vpop.f32.mrf.mxu1 }
 0x926   :  { %7330 = vst [vmem:[#allocation67_spill] sm:$0xff] %v6232_v12  ;;  %7332 = vst [vmem:[#allocation42_spill] sm:$0xff] %v6238_v24 }
 0x927   :  { %v6240_v19 = vpop.f32.mrf.mxu0  ;;  %v6244_v5 = vpop.f32.mrf.mxu1 }
 0x928   :  { %7333 = vst [vmem:[#allocation71_spill] sm:$0xff] %v6240_v19  ;;  %7334 = vst [vmem:[#allocation72_spill] sm:$0xff] %v6244_v5  ;;  %v7337_v19 = vsub.s32 2, %v7326_v7 }
 0x929   :  { %v2864_v6 = vpop.f32.mrf.mxu0  ;;  %v2935_v12 = vpop.f32.mrf.mxu1 }
 0x92a   :  { %v2865_v22 = vadd.f32 %v2864_v6, %v2539_v18  ;;  %v6253_v13 = vrot.slane %v2450_v8, %v7337_v19 }
 0x92b   :  { %v2866_v25 = vpop.f32.mrf.mxu0  ;;  %v2937_v24 = vpop.f32.mrf.mxu1 }
 0x92c   :  { %v4297_v9 = vmul.f32 -1.442695, %v2865_v22  ;;  %v2867_v14 = vadd.f32 %v2866_v25, %v2541_v44  ;;  %v2938_v5 = vadd.f32 %v2937_v24, %v2654_v16  ;;  %v2652_v6 = vadd.f32 %v2651_v10, %v6253_v13  ;;  %v7339_v16 = vld [vmem:[#allocation49_spill] sm:$0xff] }
 0x92e   :  { %4515 = vpow2.f32 %v4297_v9  ;;  %v4298_v58 = vmul.f32 -1.442695, %v2867_v14  ;;  %v4299_v18 = vmul.f32 -1.442695, %v2938_v5  ;;  %v2936_v44 = vadd.f32 %v2935_v12, %v2652_v6  ;;  %v7340_v6 = vld [vmem:[#allocation47_spill] sm:$0xff] }
 0x930   :  { %4517 = vpow2.f32 %v4298_v58 }
 0x931   :  { %4519 = vpow2.f32 %v4299_v18  ;;  %v7341_v18 = vld [vmem:[#allocation50_spill] sm:$0xff] }
 0x93b   :  { %v4516_v25 = vpop.eup %4515 }
 0x93c   :  { %v2943_v9 = vadd.f32 1.0, %v4516_v25  ;;  %v7342_v25 = vld [vmem:[#allocation52_spill] sm:$0xff] }
 0x93d   :  { %v4518_v14 = vpop.eup %4517 }
 0x93e   :  { %4521 = vrcp.f32 %v2943_v9  ;;  %v2949_v22 = vadd.f32 1.0, %v4518_v14  ;;  %v4520_v58 = vpop.eup %4519  ;;  %v7344_v9 = vld [vmem:[#allocation51_spill] sm:$0xff]  ;;  %v7345_v14 = vld [vmem:[#allocation22_spill] sm:$0xff] }
 0x93f   :  { %4523 = vtanh.f32 %v2936_v44  ;;  %v2956_v7 = vadd.f32 1.0, %v4520_v58  ;;  %v7343_v44 = vld [vmem:[#allocation53_spill] sm:$0xff]  ;;  %v7347_v58 = vld [vmem:[#allocation54_spill] sm:$0xff] }
 0x940   :  { %4525 = vrcp.f32 %v2949_v22  ;;  %v7346_v22 = vld [vmem:[#allocation23_spill] sm:$0xff] }
 0x941   :  { %4527 = vrcp.f32 %v2956_v7  ;;  %v7350_v7 = vld [vmem:[#allocation55_spill] sm:$0xff] }
 0x94b   :  { %v4522_v15 = vpop.eup %4521 }
 0x94c   :  { %v4524_v23 = vpop.eup %4523 }
 0x94d   :  { %v4526_v52 = vpop.eup %4525  ;;  %v2960_v8 = vmul.f32 %v4524_v23, %v4522_v15  ;;  %v7348_v15 = vld [vmem:[#allocation56_spill] sm:$0xff]  ;;  %v7349_v23 = vld [vmem:[#allocation57_spill] sm:$0xff] }
 0x94e   :  { %v2959_v19 = vmul.f32 0.0, %v4526_v52  ;;  %v4528_v12 = vpop.eup %4527  ;;  %v7338_v52 = vld [vmem:[#allocation48_spill] sm:$0xff] }
 0x950   :  { %v6256_v24 = vadd.f32 %v2960_v8, %v2959_v19  ;;  %v7351_v19 = vld [vmem:[#allocation24_spill] sm:$0xff]  ;;  %v7352_v8 = vld [vmem:[#allocation25_spill] sm:$0xff] }
 0x952   :  { %4529 = vtanh.f32 %v6256_v24 }
 0x95f   :  { %v4530_v5 = vpop.eup %4529 }
 0x960   :  { %v2963_v10 = vmul.f32 %v4530_v5, %v4528_v12  ;;  %v7353_v12 = vld [vmem:[#allocation26_spill] sm:$0xff]  ;;  %v7354_v5 = vld [vmem:[#allocation27_spill] sm:$0xff] }
 0x962   :  { %3033 = vmatmul.mubr.f32.vlgmr.msra.gmra.mxu0 %v2963_v10  ;;  %3104 = vmatmul.mubr.f32.vlgmr.msra.gmra.mxu1 %v2963_v10  ;;  %v7355_v10 = vld [vmem:[#allocation28_spill] sm:$0xff] }
 0x963   :  { %3139 = vmatpush1.msra.mxu0 %v5914_v63  ;;  %3210 = vmatpush1.msra.mxu1 %v5916_v26 }
 0x964   :  { %3140 = vmatprep.subr.mxu0 %v5920_v17  ;;  %3211 = vmatprep.subr.mxu1 %v5922_v28 }
 0x965   :  { %3141 = vmatpush1.msra.mxu0 %v5926_v30  ;;  %3212 = vmatpush1.msra.mxu1 %v5928_v31 }
 0x966   :  { %3142 = vmatprep.subr.mxu0 %v5932_v32  ;;  %3213 = vmatprep.subr.mxu1 %v5934_v33 }
 0x967   :  { %3143 = vmatpush1.msra.mxu0 %v5938_v34  ;;  %3214 = vmatpush1.msra.mxu1 %v5940_v35 }
 0x968   :  { %3144 = vmatprep.subr.mxu0 %v5944_v36  ;;  %3215 = vmatprep.subr.mxu1 %v5946_v37 }
 0x969   :  { %3145 = vmatpush1.msra.mxu0 %v5950_v39  ;;  %3216 = vmatpush1.msra.mxu1 %v5952_v40 }
 0x96a   :  { %3146 = vmatprep.subr.mxu0 %v5956_v41  ;;  %3217 = vmatprep.subr.mxu1 %v5958_v42 }
 0x96b   :  { %3147 = vmatpush1.msra.mxu0 %v5962_v43  ;;  %3218 = vmatpush1.msra.mxu1 %v5964_v46 }
 0x96c   :  { %3148 = vmatprep.subr.mxu0 %v5968_v47  ;;  %3219 = vmatprep.subr.mxu1 %v5970_v27 }
 0x96d   :  { %3149 = vmatpush1.msra.mxu0 %v5974_v45  ;;  %3220 = vmatpush1.msra.mxu1 %v5976_v53 }
 0x96e   :  { %3150 = vmatprep.subr.mxu0 %v5980_v1  ;;  %3221 = vmatprep.subr.mxu1 %v5982_v38 }
 0x96f   :  { %3151 = vmatpush1.msra.mxu0 %v5986_v20  ;;  %3222 = vmatpush1.msra.mxu1 %v5988_v50 }
 0x970   :  { %3152 = vmatprep.subr.mxu0 %v5992_v2  ;;  %3223 = vmatprep.subr.mxu1 %v5994_v59 }
 0x971   :  { %3153 = vmatpush1.msra.mxu0 %v5998_v11  ;;  %3224 = vmatpush1.msra.mxu1 %v6000_v61 }
 0x972   :  { %3154 = vmatprep.subr.mxu0 %v6004_v48  ;;  %3225 = vmatprep.subr.mxu1 %v6006_v54 }
 0x973   :  { %3155 = vmatpush1.msra.mxu0 %v6010_v49  ;;  %3226 = vmatpush1.msra.mxu1 %v6012_v51 }
 0x974   :  { %3156 = vmatprep.subr.mxu0 %v6016_v55  ;;  %3227 = vmatprep.subr.mxu1 %v6018_v29 }
 0x975   :  { %3157 = vmatpush1.msra.mxu0 %v6022_v0  ;;  %3228 = vmatpush1.msra.mxu1 %v6024_v57 }
 0x976   :  { %3158 = vmatprep.subr.mxu0 %v6028_v56  ;;  %3229 = vmatprep.subr.mxu1 %v6030_v60 }
 0x977   :  { %3159 = vmatpush1.msra.mxu0 %v6034_v3  ;;  %3230 = vmatpush1.msra.mxu1 %v6036_v4 }
 0x978   :  { %3160 = vmatprep.subr.mxu0 %v7338_v52  ;;  %3231 = vmatprep.subr.mxu1 %v7339_v16  ;;  %v7365_v16 = vld [vmem:[#allocation32_spill] sm:$0xff] }
 0x979   :  { %3161 = vmatpush1.msra.mxu0 %v7340_v6  ;;  %3232 = vmatpush1.msra.mxu1 %v7341_v18  ;;  %v7363_v18 = vld [vmem:[#allocation73_spill] sm:$0xff] }
 0x97a   :  { %3162 = vmatprep.subr.mxu0 %v7342_v25  ;;  %3233 = vmatprep.subr.mxu1 %v7343_v44 }
 0x97b   :  { %3163 = vmatpush1.msra.mxu0 %v7344_v9  ;;  %3234 = vmatpush1.msra.mxu1 %v7345_v14  ;;  %v7356_v14 = vld [vmem:[#allocation29_spill] sm:$0xff] }
 0x97c   :  { %3164 = vmatprep.subr.mxu0 %v7346_v22  ;;  %3235 = vmatprep.subr.mxu1 %v7347_v58  ;;  %v7357_v22 = vmov 0.0   ;;  %v7358_v58 = vld [vmem:[#allocation30_spill] sm:$0xff] }
 0x97d   :  { %3165 = vmatpush1.msra.mxu0 %v7348_v15  ;;  %3236 = vmatpush1.msra.mxu1 %v7349_v23  ;;  %v7359_v23 = vld [vmem:[#allocation45_spill] sm:$0xff] }
 0x97e   :  { %3166 = vmatprep.subr.mxu0 %v7350_v7  ;;  %3237 = vmatprep.subr.mxu1 %v7351_v19  ;;  %v7360_v7 = vld [vmem:[#allocation43_spill] sm:$0xff] }
 0x97f   :  { %3167 = vmatpush1.msra.mxu0 %v7352_v8  ;;  %3238 = vmatpush1.msra.mxu1 %v7353_v12  ;;  %v7361_v8 = vld [vmem:[#allocation31_spill] sm:$0xff] }
 0x980   :  { %3168 = vmatprep.subr.mxu0 %v7354_v5  ;;  %3239 = vmatprep.subr.mxu1 %v7355_v10  ;;  %v2545_v19 = vadd.f32 %v7361_v8, %v6228_v21  ;;  %v7362_v5 = vld [vmem:[#allocation33_spill] sm:$0xff]  ;;  %v2658_v8 = vadd.f32 %v7365_v16, %v6253_v13 }
 0x981   :  { %3169 = vmatpush1.msra.mxu0 %v7356_v14  ;;  %3202 = vmatprep.mubr.f32.mxu0 %v7357_v22  ;;  %v2547_v15 = vadd.f32 %v7362_v5, %v6236_v62 }
 0x982   :  { %3240 = vmatpush1.msra.mxu1 %v7358_v58  ;;  %3273 = vmatprep.mubr.f32.mxu1 %v7357_v22 }
 0x983   :  { %3308 = vmatprep.subr.mxu0 %v7359_v23  ;;  %3379 = vmatprep.subr.mxu1 %v7360_v7  ;;  %v7364_v23 = vld [vmem:[#allocation34_spill] sm:$0xff] }
 0x984   :  { %v2660_v6 = vadd.f32 %v7364_v23, %v7363_v18 }
 0xa22   :  { %v3034_v12 = vpop.f32.mrf.mxu0  ;;  %v3105_v25 = vpop.f32.mrf.mxu1 }
 0xa23   :  { %v3035_v10 = vadd.f32 %v3034_v12, %v2545_v19  ;;  %v3106_v21 = vadd.f32 %v3105_v25, %v2658_v8  ;;  %v7378_v25 = vld [vmem:[#allocation57_spill] sm:$0xff] }
 0xa24   :  { %v3036_v9 = vpop.f32.mrf.mxu0  ;;  %v3107_v22 = vpop.f32.mrf.mxu1  ;;  %v7381_v8 = vld [vmem:[#allocation25_spill] sm:$0xff] }
 0xa25   :  { %v4300_v14 = vmul.f32 -1.442695, %v3035_v10  ;;  %v3037_v44 = vadd.f32 %v3036_v9, %v2547_v15  ;;  %v3108_v7 = vadd.f32 %v3107_v22, %v2660_v6  ;;  %v7380_v10 = vld [vmem:[#allocation24_spill] sm:$0xff] }
 0xa27   :  { %4531 = vpow2.f32 %v4300_v14  ;;  %v4301_v58 = vmul.f32 -1.442695, %v3037_v44  ;;  %v4302_v52 = vmul.f32 -1.442695, %v3108_v7  ;;  %v7379_v7 = vld [vmem:[#allocation55_spill] sm:$0xff] }
 0xa29   :  { %4533 = vpow2.f32 %v4301_v58 }
 0xa2a   :  { %4535 = vtanh.f32 %v3106_v21 }
 0xa2b   :  { %4537 = vpow2.f32 %v4302_v52  ;;  %v7377_v52 = vld [vmem:[#allocation56_spill] sm:$0xff] }
 0xa34   :  { %v4532_v4 = vpop.eup %4531 }
 0xa35   :  { %v3113_v5 = vadd.f32 1.0, %v4532_v4 }
 0xa36   :  { %v4534_v19 = vpop.eup %4533 }
 0xa37   :  { %4539 = vrcp.f32 %v3113_v5  ;;  %v3119_v9 = vadd.f32 1.0, %v4534_v19  ;;  %v4536_v44 = vpop.eup %4535  ;;  %v7382_v5 = vld [vmem:[#allocation26_spill] sm:$0xff]  ;;  %v7383_v19 = vld [vmem:[#allocation27_spill] sm:$0xff] }
 0xa38   :  { %v4538_v14 = vpop.eup %4537 }
 0xa39   :  { %4541 = vrcp.f32 %v3119_v9  ;;  %v3126_v23 = vadd.f32 1.0, %v4538_v14  ;;  %v7384_v9 = vld [vmem:[#allocation28_spill] sm:$0xff]  ;;  %v7386_v14 = vmov 0.0  }
 0xa3b   :  { %4543 = vrcp.f32 %v3126_v23  ;;  %v7390_v23 = vld [vmem:[#allocation68_spill] sm:$0xff] }
 0xa44   :  { %v4540_v58 = vpop.eup %4539 }
 0xa45   :  { %v3130_v15 = vmul.f32 %v4540_v58, %v4536_v44  ;;  %v7385_v44 = vld [vmem:[#allocation29_spill] sm:$0xff]  ;;  %v7387_v58 = vld [vmem:[#allocation30_spill] sm:$0xff] }
 0xa46   :  { %v4542_v12 = vpop.eup %4541 }
 0xa47   :  { %v3129_v6 = vmul.f32 %v4542_v12, %v6256_v24  ;;  %v7376_v24 = vld [vmem:[#allocation54_spill] sm:$0xff]  ;;  %v7389_v12 = vld [vmem:[#allocation43_spill] sm:$0xff] }
 0xa48   :  { %v4544_v4 = vpop.eup %4543 }
 0xa49   :  { %v6334_v22 = vadd.f32 %v3130_v15, %v3129_v6  ;;  %v7388_v15 = vld [vmem:[#allocation45_spill] sm:$0xff]  ;;  %v7391_v6 = vld [vmem:[#allocation35_spill] sm:$0xff] }
 0xa4b   :  { %4545 = vtanh.f32 %v6334_v22 }
 0xa58   :  { %v4546_v21 = vpop.eup %4545 }
 0xa59   :  { %v3133_v16 = vmul.f32 %v4546_v21, %v4544_v4  ;;  %v2551_v4 = vadd.f32 %v7391_v6, %v7390_v23 }
 0xa5b   :  { %3203 = vmatmul.mubr.f32.vlgmr.msra.gmra.mxu0 %v3133_v16  ;;  %3274 = vmatmul.mubr.f32.vlgmr.msra.gmra.mxu1 %v3133_v16  ;;  %v7392_v16 = vld [vmem:[#allocation37_spill] sm:$0xff] }
 0xa5c   :  { %3309 = vmatpush1.msra.mxu0 %v5914_v63  ;;  %3380 = vmatpush1.msra.mxu1 %v5916_v26  ;;  %v7366_v63 = vld [vmem:[#allocation46_spill] sm:$0xff]  ;;  %v7367_v26 = vld [vmem:[#allocation48_spill] sm:$0xff] }
 0xa5d   :  { %3310 = vmatprep.subr.mxu0 %v5920_v17  ;;  %3381 = vmatprep.subr.mxu1 %v5922_v28  ;;  %v7368_v17 = vld [vmem:[#allocation49_spill] sm:$0xff]  ;;  %v7369_v28 = vld [vmem:[#allocation47_spill] sm:$0xff] }
 0xa5e   :  { %3311 = vmatpush1.msra.mxu0 %v5926_v30  ;;  %3382 = vmatpush1.msra.mxu1 %v5928_v31  ;;  %v7370_v30 = vld [vmem:[#allocation50_spill] sm:$0xff]  ;;  %v7371_v31 = vld [vmem:[#allocation52_spill] sm:$0xff] }
 0xa5f   :  { %3312 = vmatprep.subr.mxu0 %v5932_v32  ;;  %3383 = vmatprep.subr.mxu1 %v5934_v33  ;;  %v7372_v32 = vld [vmem:[#allocation53_spill] sm:$0xff]  ;;  %v7373_v33 = vld [vmem:[#allocation51_spill] sm:$0xff] }
 0xa60   :  { %3313 = vmatpush1.msra.mxu0 %v5938_v34  ;;  %3384 = vmatpush1.msra.mxu1 %v5940_v35  ;;  %v7374_v34 = vld [vmem:[#allocation22_spill] sm:$0xff]  ;;  %v7375_v35 = vld [vmem:[#allocation23_spill] sm:$0xff] }
 0xa61   :  { %3314 = vmatprep.subr.mxu0 %v5944_v36  ;;  %3385 = vmatprep.subr.mxu1 %v5946_v37 }
 0xa62   :  { %3315 = vmatpush1.msra.mxu0 %v5950_v39  ;;  %3386 = vmatpush1.msra.mxu1 %v5952_v40 }
 0xa63   :  { %3316 = vmatprep.subr.mxu0 %v5956_v41  ;;  %3387 = vmatprep.subr.mxu1 %v5958_v42 }
 0xa64   :  { %3317 = vmatpush1.msra.mxu0 %v5962_v43  ;;  %3388 = vmatpush1.msra.mxu1 %v5964_v46 }
 0xa65   :  { %3318 = vmatprep.subr.mxu0 %v5968_v47  ;;  %3389 = vmatprep.subr.mxu1 %v5970_v27 }
 0xa66   :  { %3319 = vmatpush1.msra.mxu0 %v5974_v45  ;;  %3390 = vmatpush1.msra.mxu1 %v5976_v53 }
 0xa67   :  { %3320 = vmatprep.subr.mxu0 %v5980_v1  ;;  %3391 = vmatprep.subr.mxu1 %v5982_v38 }
 0xa68   :  { %3321 = vmatpush1.msra.mxu0 %v5986_v20  ;;  %3392 = vmatpush1.msra.mxu1 %v5988_v50 }
 0xa69   :  { %3322 = vmatprep.subr.mxu0 %v5992_v2  ;;  %3393 = vmatprep.subr.mxu1 %v5994_v59 }
 0xa6a   :  { %3323 = vmatpush1.msra.mxu0 %v5998_v11  ;;  %3394 = vmatpush1.msra.mxu1 %v6000_v61 }
 0xa6b   :  { %3324 = vmatprep.subr.mxu0 %v6004_v48  ;;  %3395 = vmatprep.subr.mxu1 %v6006_v54 }
 0xa6c   :  { %3325 = vmatpush1.msra.mxu0 %v6010_v49  ;;  %3396 = vmatpush1.msra.mxu1 %v6012_v51 }
 0xa6d   :  { %3326 = vmatprep.subr.mxu0 %v6016_v55  ;;  %3397 = vmatprep.subr.mxu1 %v6018_v29 }
 0xa6e   :  { %3327 = vmatpush1.msra.mxu0 %v6022_v0  ;;  %3398 = vmatpush1.msra.mxu1 %v6024_v57 }
 0xa6f   :  { %3328 = vmatprep.subr.mxu0 %v6028_v56  ;;  %3399 = vmatprep.subr.mxu1 %v6030_v60 }
 0xa70   :  { %3329 = vmatpush1.msra.mxu0 %v6034_v3  ;;  %3400 = vmatpush1.msra.mxu1 %v7366_v63 }
 0xa71   :  { %3330 = vmatprep.subr.mxu0 %v7367_v26  ;;  %3401 = vmatprep.subr.mxu1 %v7368_v17 }
 0xa72   :  { %3331 = vmatpush1.msra.mxu0 %v7369_v28  ;;  %3402 = vmatpush1.msra.mxu1 %v7370_v30 }
 0xa73   :  { %3332 = vmatprep.subr.mxu0 %v7371_v31  ;;  %3403 = vmatprep.subr.mxu1 %v7372_v32 }
 0xa74   :  { %3333 = vmatpush1.msra.mxu0 %v7373_v33  ;;  %3404 = vmatpush1.msra.mxu1 %v7374_v34 }
 0xa75   :  { %3334 = vmatprep.subr.mxu0 %v7375_v35  ;;  %3405 = vmatprep.subr.mxu1 %v7376_v24 }
 0xa76   :  { %3335 = vmatpush1.msra.mxu0 %v7377_v52  ;;  %3406 = vmatpush1.msra.mxu1 %v7378_v25  ;;  %v7394_v25 = vld [vmem:[#allocation36_spill] sm:$0xff] }
 0xa77   :  { %3336 = vmatprep.subr.mxu0 %v7379_v7  ;;  %3407 = vmatprep.subr.mxu1 %v7380_v10  ;;  %v2664_v6 = vadd.f32 %v7394_v25, %v6253_v13 }
 0xa78   :  { %3337 = vmatpush1.msra.mxu0 %v7381_v8  ;;  %3408 = vmatpush1.msra.mxu1 %v7382_v5 }
 0xa79   :  { %3338 = vmatprep.subr.mxu0 %v7383_v19  ;;  %3409 = vmatprep.subr.mxu1 %v7384_v9  ;;  %v2553_v19 = vadd.f32 %v7392_v16, %v6236_v62 }
 0xa7a   :  { %3339 = vmatpush1.msra.mxu0 %v7385_v44  ;;  %3372 = vmatprep.mubr.f32.mxu0 %v7386_v14 }
 0xa7b   :  { %3410 = vmatpush1.msra.mxu1 %v7387_v58  ;;  %3443 = vmatprep.mubr.f32.mxu1 %v7386_v14 }
 0xa7c   :  { %3478 = vmatprep.subr.mxu0 %v7388_v15  ;;  %3549 = vmatprep.subr.mxu1 %v7389_v12  ;;  %v7393_v15 = vld [vmem:[#allocation38_spill] sm:$0xff] }
 0xa7d   :  { %v2666_v7 = vadd.f32 %v7393_v15, %v7363_v18  ;;  %v6421_v15 = vld [vmem:[#allocation12 + $0x1c8] sm:$0xff] }
 0xb1b   :  { %v3204_v21 = vpop.f32.mrf.mxu0  ;;  %v3275_v10 = vpop.f32.mrf.mxu1 }
 0xb1c   :  { %v3205_v9 = vadd.f32 %v3204_v21, %v2551_v4  ;;  %v3276_v23 = vadd.f32 %v3275_v10, %v2664_v6  ;;  %v6430_v6 = vld [vmem:[#allocation12 + $0x1d0] sm:$0xff] }
 0xb1d   :  { %v3206_v5 = vpop.f32.mrf.mxu0  ;;  %v3277_v14 = vpop.f32.mrf.mxu1 }
 0xb1e   :  { %v4303_v44 = vmul.f32 -1.442695, %v3205_v9  ;;  %v3207_v8 = vadd.f32 %v3206_v5, %v2553_v19  ;;  %v3278_v12 = vadd.f32 %v3277_v14, %v2666_v7 }
 0xb20   :  { %4547 = vpow2.f32 %v4303_v44  ;;  %v4304_v58 = vmul.f32 -1.442695, %v3207_v8  ;;  %v4305_v52 = vmul.f32 -1.442695, %v3278_v12  ;;  %v6427_v12 = vld [vmem:[#allocation12 + $0x1c0] sm:$0xff] }
 0xb22   :  { %4549 = vpow2.f32 %v4304_v58 }
 0xb23   :  { %4551 = vtanh.f32 %v3276_v23  ;;  %v6418_v23 = vld [vmem:[#allocation12 + $0x1f0] sm:$0xff] }
 0xb24   :  { %4553 = vpow2.f32 %v4305_v52  ;;  %v6415_v52 = vld [vmem:[#allocation12 + $0x1e0] sm:$0xff] }
 0xb2d   :  { %v4548_v24 = vpop.eup %4547 }
 0xb2e   :  { %v3283_v16 = vadd.f32 1.0, %v4548_v24 }
 0xb2f   :  { %v4550_v4 = vpop.eup %4549 }
 0xb30   :  { %4555 = vrcp.f32 %v3283_v16  ;;  %v3289_v5 = vadd.f32 1.0, %v4550_v4  ;;  %v4552_v8 = vpop.eup %4551  ;;  %v6433_v16 = vld [vmem:[#allocation12 + $0x1a8] sm:$0xff]  ;;  %v6436_v4 = vld [vmem:[#allocation12 + $0x1b8] sm:$0xff] }
 0xb31   :  { %v4554_v19 = vpop.eup %4553 }
 0xb32   :  { %4557 = vrcp.f32 %v3289_v5  ;;  %v3296_v21 = vadd.f32 1.0, %v4554_v19  ;;  %v6439_v5 = vld [vmem:[#allocation12 + $0x1a0] sm:$0xff] }
 0xb34   :  { %4559 = vrcp.f32 %v3296_v21 }
 0xb3d   :  { %v4556_v9 = vpop.eup %4555 }
 0xb3e   :  { %v3300_v44 = vmul.f32 %v4556_v9, %v4552_v8  ;;  %v6442_v8 = vld [vmem:[#allocation12 + $0x1b0] sm:$0xff] }
 0xb3f   :  { %v4558_v58 = vpop.eup %4557 }
 0xb40   :  { %v3299_v7 = vmul.f32 %v4558_v58, %v6334_v22  ;;  %v6424_v22 = vld [vmem:[#allocation12 + $0x1d8] sm:$0xff] }
 0xb41   :  { %v4560_v24 = vpop.eup %4559 }
 0xb42   :  { %v6412_v14 = vadd.f32 %v3300_v44, %v3299_v7 }
 0xb44   :  { %4561 = vtanh.f32 %v6412_v14 }
 0xb51   :  { %v4562_v25 = vpop.eup %4561 }
 0xb52   :  { %v3303_v10 = vmul.f32 %v4562_v25, %v4560_v24 }
 0xb54   :  { %3373 = vmatmul.mubr.f32.vlgmr.msra.gmra.mxu0 %v3303_v10  ;;  %3444 = vmatmul.mubr.f32.vlgmr.msra.gmra.mxu1 %v3303_v10  ;;  %v6530_v10 = vld [vmem:[#allocation12 + $0x198] sm:$0xff] }
 0xb55   :  { %3479 = vmatpush1.msra.mxu0 %v6415_v52  ;;  %3550 = vmatpush1.msra.mxu1 %v6418_v23 }
 0xb56   :  { %3480 = vmatprep.subr.mxu0 %v6421_v15  ;;  %3551 = vmatprep.subr.mxu1 %v6424_v22 }
 0xb57   :  { %3481 = vmatpush1.msra.mxu0 %v6427_v12  ;;  %3552 = vmatpush1.msra.mxu1 %v6430_v6 }
 0xb58   :  { %3482 = vmatprep.subr.mxu0 %v6433_v16  ;;  %3553 = vmatprep.subr.mxu1 %v6436_v4 }
 0xb59   :  { %3483 = vmatpush1.msra.mxu0 %v6439_v5  ;;  %3554 = vmatpush1.msra.mxu1 %v6442_v8 }
 0xb5a   :  { %3484 = vmatprep.subr.mxu0 %v5944_v36  ;;  %3555 = vmatprep.subr.mxu1 %v5946_v37  ;;  %v7395_v36 = vld [vmem:[#allocation54_spill] sm:$0xff]  ;;  %v7396_v37 = vld [vmem:[#allocation56_spill] sm:$0xff] }
 0xb5b   :  { %3485 = vmatpush1.msra.mxu0 %v5950_v39  ;;  %3556 = vmatpush1.msra.mxu1 %v5952_v40  ;;  %v7397_v39 = vld [vmem:[#allocation57_spill] sm:$0xff]  ;;  %v7398_v40 = vld [vmem:[#allocation55_spill] sm:$0xff] }
 0xb5c   :  { %3486 = vmatprep.subr.mxu0 %v5956_v41  ;;  %3557 = vmatprep.subr.mxu1 %v5958_v42  ;;  %v7399_v41 = vld [vmem:[#allocation24_spill] sm:$0xff]  ;;  %v7400_v42 = vld [vmem:[#allocation25_spill] sm:$0xff] }
 0xb5d   :  { %3487 = vmatpush1.msra.mxu0 %v5962_v43  ;;  %3558 = vmatpush1.msra.mxu1 %v5964_v46  ;;  %v7401_v43 = vld [vmem:[#allocation26_spill] sm:$0xff]  ;;  %v7402_v46 = vld [vmem:[#allocation27_spill] sm:$0xff] }
 0xb5e   :  { %3488 = vmatprep.subr.mxu0 %v5968_v47  ;;  %3559 = vmatprep.subr.mxu1 %v5970_v27  ;;  %v7403_v47 = vld [vmem:[#allocation28_spill] sm:$0xff]  ;;  %v7404_v27 = vld [vmem:[#allocation29_spill] sm:$0xff] }
 0xb5f   :  { %3489 = vmatpush1.msra.mxu0 %v5974_v45  ;;  %3560 = vmatpush1.msra.mxu1 %v5976_v53  ;;  %v7405_v45 = vmov 0.0   ;;  %v7406_v53 = vld [vmem:[#allocation30_spill] sm:$0xff] }
 0xb60   :  { %3490 = vmatprep.subr.mxu0 %v5980_v1  ;;  %3561 = vmatprep.subr.mxu1 %v5982_v38  ;;  %v6499_v1 = vld [vmem:[#allocation12 + $0x1e8] sm:$0xff]  ;;  %v6502_v38 = vld [vmem:[#allocation12 + $0x1f8] sm:$0xff] }
 0xb61   :  { %3491 = vmatpush1.msra.mxu0 %v5986_v20  ;;  %3562 = vmatpush1.msra.mxu1 %v5988_v50  ;;  %7407 = vst [vmem:[#allocation31_spill] sm:$0xff] %v6499_v1  ;;  %7408 = vst [vmem:[#allocation33_spill] sm:$0xff] %v6502_v38  ;;  %v7409_v20 = vld [vmem:[#allocation68_spill] sm:$0xff]  ;;  %v7410_v50 = vld [vmem:[#allocation39_spill] sm:$0xff] }
 0xb62   :  { %3492 = vmatprep.subr.mxu0 %v5992_v2  ;;  %3563 = vmatprep.subr.mxu1 %v5994_v59  ;;  %v2557_v2 = vadd.f32 %v7410_v50, %v7409_v20  ;;  %v6566_v50 = vld [vmem:[#allocation12 + $0x138] sm:$0xff] }
 0xb63   :  { %3493 = vmatpush1.msra.mxu0 %v5998_v11  ;;  %3564 = vmatpush1.msra.mxu1 %v6000_v61  ;;  %v7411_v11 = vld [vmem:[#allocation58_spill] sm:$0xff] }
 0xb64   :  { %3494 = vmatprep.subr.mxu0 %v6004_v48  ;;  %3565 = vmatprep.subr.mxu1 %v6006_v54  ;;  %v2559_v61 = vadd.f32 %v7411_v11, %v6236_v62  ;;  %v6575_v11 = vld [vmem:[#allocation12 + $0x108] sm:$0xff] }
 0xb65   :  { %3495 = vmatpush1.msra.mxu0 %v6010_v49  ;;  %3566 = vmatpush1.msra.mxu1 %v6012_v51 }
 0xb66   :  { %3496 = vmatprep.subr.mxu0 %v6016_v55  ;;  %3567 = vmatprep.subr.mxu1 %v6018_v29 }
 0xb67   :  { %3497 = vmatpush1.msra.mxu0 %v6022_v0  ;;  %3568 = vmatpush1.msra.mxu1 %v6024_v57  ;;  %v7412_v57 = vld [vmem:[#allocation60_spill] sm:$0xff] }
 0xb68   :  { %3498 = vmatprep.subr.mxu0 %v6028_v56  ;;  %3569 = vmatprep.subr.mxu1 %v6030_v60  ;;  %v2672_v56 = vadd.f32 %v7412_v57, %v7363_v18  ;;  %v6602_v57 = vld [vmem:[#allocation12 + $0xd8] sm:$0xff] }
 0xb69   :  { %3499 = vmatpush1.msra.mxu0 %v6034_v3  ;;  %3570 = vmatpush1.msra.mxu1 %v7366_v63  ;;  %v7413_v3 = vld [vmem:[#allocation40_spill] sm:$0xff] }
 0xb6a   :  { %3500 = vmatprep.subr.mxu0 %v7367_v26  ;;  %3571 = vmatprep.subr.mxu1 %v7368_v17  ;;  %v2670_v63 = vadd.f32 %v7413_v3, %v6253_v13  ;;  %v6611_v3 = vld [vmem:[#allocation12 + $0xa8] sm:$0xff] }
 0xb6b   :  { %3501 = vmatpush1.msra.mxu0 %v7369_v28  ;;  %3572 = vmatpush1.msra.mxu1 %v7370_v30 }
 0xb6c   :  { %3502 = vmatprep.subr.mxu0 %v7371_v31  ;;  %3573 = vmatprep.subr.mxu1 %v7372_v32 }
 0xb6d   :  { %3503 = vmatpush1.msra.mxu0 %v7373_v33  ;;  %3574 = vmatpush1.msra.mxu1 %v7374_v34 }
 0xb6e   :  { %3504 = vmatprep.subr.mxu0 %v7375_v35  ;;  %3575 = vmatprep.subr.mxu1 %v7395_v36  ;;  %v6533_v36 = vld [vmem:[#allocation12 + $0x180] sm:$0xff] }
 0xb6f   :  { %3505 = vmatpush1.msra.mxu0 %v7396_v37  ;;  %3576 = vmatpush1.msra.mxu1 %v7397_v39  ;;  %v6536_v37 = vld [vmem:[#allocation12 + $0x190] sm:$0xff]  ;;  %v6539_v39 = vld [vmem:[#allocation12 + $0x168] sm:$0xff] }
 0xb70   :  { %3506 = vmatprep.subr.mxu0 %v7398_v40  ;;  %3577 = vmatprep.subr.mxu1 %v7399_v41  ;;  %v6542_v40 = vld [vmem:[#allocation12 + $0x178] sm:$0xff]  ;;  %v6545_v41 = vld [vmem:[#allocation12 + $0x160] sm:$0xff] }
 0xb71   :  { %3507 = vmatpush1.msra.mxu0 %v7400_v42  ;;  %3578 = vmatpush1.msra.mxu1 %v7401_v43  ;;  %v6548_v42 = vld [vmem:[#allocation12 + $0x170] sm:$0xff]  ;;  %v6551_v43 = vld [vmem:[#allocation12 + $0x148] sm:$0xff] }
 0xb72   :  { %3508 = vmatprep.subr.mxu0 %v7402_v46  ;;  %3579 = vmatprep.subr.mxu1 %v7403_v47  ;;  %v6554_v46 = vld [vmem:[#allocation12 + $0x158] sm:$0xff]  ;;  %v6557_v47 = vld [vmem:[#allocation12 + $0x140] sm:$0xff] }
 0xb73   :  { %3509 = vmatpush1.msra.mxu0 %v7404_v27  ;;  %3542 = vmatprep.mubr.f32.mxu0 %v7405_v45  ;;  %v6560_v27 = vld [vmem:[#allocation12 + $0x150] sm:$0xff] }
 0xb74   :  { %3580 = vmatpush1.msra.mxu1 %v7406_v53  ;;  %3613 = vmatprep.mubr.f32.mxu1 %v7405_v45  ;;  %v6563_v53 = vld [vmem:[#allocation12 + $0x128] sm:$0xff] }
 0xb75   :  { %3648 = vmatprep.subr.mxu0 %v6499_v1  ;;  %3719 = vmatprep.subr.mxu1 %v6502_v38 }
 0xc14   :  { %v3374_v59 = vpop.f32.mrf.mxu0  ;;  %v3445_v55 = vpop.f32.mrf.mxu1 }
 0xc15   :  { %v3375_v48 = vadd.f32 %v3374_v59, %v2557_v2  ;;  %v3446_v26 = vadd.f32 %v3445_v55, %v2670_v63  ;;  %v6569_v2 = vld [vmem:[#allocation12 + $0x120] sm:$0xff]  ;;  %v6572_v59 = vld [vmem:[#allocation12 + $0x130] sm:$0xff]  ;;  %v6614_v63 = vld [vmem:[#allocation12 + $0xb8] sm:$0xff] }
 0xc16   :  { %v3376_v54 = vpop.f32.mrf.mxu0  ;;  %v3447_v0 = vpop.f32.mrf.mxu1  ;;  %v6593_v55 = vld [vmem:[#allocation12 + $0xe0] sm:$0xff] }
 0xc17   :  { %v4306_v49 = vmul.f32 -1.442695, %v3375_v48  ;;  %v3377_v51 = vadd.f32 %v3376_v54, %v2559_v61  ;;  %v3448_v60 = vadd.f32 %v3447_v0, %v2672_v56  ;;  %v6578_v61 = vld [vmem:[#allocation12 + $0x118] sm:$0xff]  ;;  %v6581_v48 = vld [vmem:[#allocation12 + $0x100] sm:$0xff]  ;;  %v6584_v54 = vld [vmem:[#allocation12 + $0x110] sm:$0xff] }
 0xc18   :  { %v6599_v0 = vld [vmem:[#allocation12 + $0xc8] sm:$0xff]  ;;  %v6605_v56 = vld [vmem:[#allocation12 + $0xc0] sm:$0xff] }
 0xc19   :  { %4563 = vpow2.f32 %v4306_v49  ;;  %v4307_v29 = vmul.f32 -1.442695, %v3377_v51  ;;  %v4308_v17 = vmul.f32 -1.442695, %v3448_v60  ;;  %v6587_v49 = vld [vmem:[#allocation12 + $0xe8] sm:$0xff]  ;;  %v6590_v51 = vld [vmem:[#allocation12 + $0xf8] sm:$0xff] }
 0xc1a   :  { %v6608_v60 = vld [vmem:[#allocation12 + $0xd0] sm:$0xff] }
 0xc1b   :  { %4565 = vpow2.f32 %v4307_v29  ;;  %v6596_v29 = vld [vmem:[#allocation12 + $0xf0] sm:$0xff] }
 0xc1c   :  { %4567 = vtanh.f32 %v3446_v26  ;;  %v6617_v26 = vld [vmem:[#allocation12 + $0xa0] sm:$0xff] }
 0xc1d   :  { %4569 = vpow2.f32 %v4308_v17  ;;  %v6620_v17 = vld [vmem:[#allocation12 + $0xb0] sm:$0xff] }
 0xc1e   :  { %7414 = vst [vmem:[#allocation73_spill] sm:$0xff] %v6620_v17 }
 0xc26   :  { %v4564_v28 = vpop.eup %4563 }
 0xc27   :  { %v3453_v30 = vadd.f32 1.0, %v4564_v28  ;;  %v6623_v28 = vld [vmem:[#allocation12 + $0x88] sm:$0xff] }
 0xc28   :  { %v4566_v31 = vpop.eup %4565  ;;  %7415 = vst [vmem:[#allocation34_spill] sm:$0xff] %v6623_v28 }
 0xc29   :  { %4571 = vrcp.f32 %v3453_v30  ;;  %v3459_v32 = vadd.f32 1.0, %v4566_v31  ;;  %v4568_v33 = vpop.eup %4567  ;;  %v6626_v30 = vld [vmem:[#allocation12 + $0x98] sm:$0xff]  ;;  %v6629_v31 = vld [vmem:[#allocation12 + $0x80] sm:$0xff] }
 0xc2a   :  { %v4570_v34 = vpop.eup %4569  ;;  %7416 = vst [vmem:[#allocation32_spill] sm:$0xff] %v6626_v30  ;;  %7417 = vst [vmem:[#allocation46_spill] sm:$0xff] %v6629_v31 }
 0xc2b   :  { %4573 = vrcp.f32 %v3459_v32  ;;  %v3466_v44 = vadd.f32 1.0, %v4570_v34  ;;  %v6632_v32 = vld [vmem:[#allocation12 + $0x90] sm:$0xff]  ;;  %v6638_v34 = vld [vmem:[#allocation12 + $0x78] sm:$0xff] }
 0xc2c   :  { %7418 = vst [vmem:[#allocation48_spill] sm:$0xff] %v6632_v32  ;;  %7420 = vst [vmem:[#allocation47_spill] sm:$0xff] %v6638_v34 }
 0xc2d   :  { %4575 = vrcp.f32 %v3466_v44  ;;  %v6650_v44 = vld [vmem:[#allocation12 + $0x58] sm:$0xff] }
 0xc2e   :  { %7424 = vst [vmem:[#allocation51_spill] sm:$0xff] %v6650_v44 }
 0xc36   :  { %v4572_v35 = vpop.eup %4571 }
 0xc37   :  { %v3470_v19 = vmul.f32 %v4572_v35, %v4568_v33  ;;  %v6635_v33 = vld [vmem:[#allocation12 + $0x68] sm:$0xff]  ;;  %v6641_v35 = vld [vmem:[#allocation12 + $0x60] sm:$0xff] }
 0xc38   :  { %v4574_v9 = vpop.eup %4573  ;;  %7419 = vst [vmem:[#allocation49_spill] sm:$0xff] %v6635_v33  ;;  %7421 = vst [vmem:[#allocation50_spill] sm:$0xff] %v6641_v35 }
 0xc39   :  { %v3469_v58 = vmul.f32 %v4574_v9, %v6412_v14  ;;  %v6527_v14 = vld [vmem:[#allocation12 + $0x188] sm:$0xff] }
 0xc3a   :  { %v4576_v7 = vpop.eup %4575  ;;  %v6647_v9 = vld [vmem:[#allocation12 + $0x48] sm:$0xff] }
 0xc3b   :  { %v6514_v21 = vadd.f32 %v3470_v19, %v3469_v58  ;;  %v6644_v19 = vld [vmem:[#allocation12 + $0x70] sm:$0xff]  ;;  %7423 = vst [vmem:[#allocation53_spill] sm:$0xff] %v6647_v9  ;;  %v6653_v58 = vld [vmem:[#allocation12 + $0x40] sm:$0xff] }
 0xc3c   :  { %7422 = vst [vmem:[#allocation52_spill] sm:$0xff] %v6644_v19  ;;  %7425 = vst [vmem:[#allocation22_spill] sm:$0xff] %v6653_v58 }
 0xc3d   :  { %4577 = vtanh.f32 %v6514_v21 }
 0xc4a   :  { %v4578_v24 = vpop.eup %4577 }
 0xc4b   :  { %v3473_v25 = vmul.f32 %v4578_v24, %v4576_v7  ;;  %v6656_v7 = vld [vmem:[#allocation12 + $0x50] sm:$0xff]  ;;  %v6659_v24 = vld [vmem:[#allocation12 + $0x28] sm:$0xff] }
 0xc4c   :  { %7426 = vst [vmem:[#allocation23_spill] sm:$0xff] %v6656_v7  ;;  %7427 = vst [vmem:[#allocation45_spill] sm:$0xff] %v6659_v24 }
 0xc4d   :  { %3543 = vmatmul.mubr.f32.vlgmr.msra.gmra.mxu0 %v3473_v25  ;;  %3614 = vmatmul.mubr.f32.vlgmr.msra.gmra.mxu1 %v3473_v25  ;;  %v6662_v25 = vld [vmem:[#allocation12 + $0x38] sm:$0xff] }
 0xc4e   :  { %3649 = vmatpush1.msra.mxu0 %v6415_v52  ;;  %3720 = vmatpush1.msra.mxu1 %v6418_v23  ;;  %7428 = vst [vmem:[#allocation43_spill] sm:$0xff] %v6662_v25 }
 0xc4f   :  { %3650 = vmatprep.subr.mxu0 %v6421_v15  ;;  %3721 = vmatprep.subr.mxu1 %v6424_v22 }
 0xc50   :  { %3651 = vmatpush1.msra.mxu0 %v6427_v12  ;;  %3722 = vmatpush1.msra.mxu1 %v6430_v6 }
 0xc51   :  { %3652 = vmatprep.subr.mxu0 %v6433_v16  ;;  %3723 = vmatprep.subr.mxu1 %v6436_v4 }
 0xc52   :  { %3653 = vmatpush1.msra.mxu0 %v6439_v5  ;;  %3724 = vmatpush1.msra.mxu1 %v6442_v8 }
 0xc53   :  { %3654 = vmatprep.subr.mxu0 %v6527_v14  ;;  %3725 = vmatprep.subr.mxu1 %v6530_v10 }
 0xc54   :  { %3655 = vmatpush1.msra.mxu0 %v6533_v36  ;;  %3726 = vmatpush1.msra.mxu1 %v6536_v37 }
 0xc55   :  { %3656 = vmatprep.subr.mxu0 %v6539_v39  ;;  %3727 = vmatprep.subr.mxu1 %v6542_v40 }
 0xc56   :  { %3657 = vmatpush1.msra.mxu0 %v6545_v41  ;;  %3728 = vmatpush1.msra.mxu1 %v6548_v42 }
 0xc57   :  { %3658 = vmatprep.subr.mxu0 %v6551_v43  ;;  %3729 = vmatprep.subr.mxu1 %v6554_v46 }
 0xc58   :  { %3659 = vmatpush1.msra.mxu0 %v6557_v47  ;;  %3730 = vmatpush1.msra.mxu1 %v6560_v27 }
 0xc59   :  { %3660 = vmatprep.subr.mxu0 %v6563_v53  ;;  %3731 = vmatprep.subr.mxu1 %v6566_v50 }
 0xc5a   :  { %3661 = vmatpush1.msra.mxu0 %v6569_v2  ;;  %3732 = vmatpush1.msra.mxu1 %v6572_v59 }
 0xc5b   :  { %3662 = vmatprep.subr.mxu0 %v6575_v11  ;;  %3733 = vmatprep.subr.mxu1 %v6578_v61 }
 0xc5c   :  { %3663 = vmatpush1.msra.mxu0 %v6581_v48  ;;  %3734 = vmatpush1.msra.mxu1 %v6584_v54 }
 0xc5d   :  { %3664 = vmatprep.subr.mxu0 %v6587_v49  ;;  %3735 = vmatprep.subr.mxu1 %v6590_v51 }
 0xc5e   :  { %3665 = vmatpush1.msra.mxu0 %v6593_v55  ;;  %3736 = vmatpush1.msra.mxu1 %v6596_v29 }
 0xc5f   :  { %3666 = vmatprep.subr.mxu0 %v6599_v0  ;;  %3737 = vmatprep.subr.mxu1 %v6602_v57 }
 0xc60   :  { %3667 = vmatpush1.msra.mxu0 %v6605_v56  ;;  %3738 = vmatpush1.msra.mxu1 %v6608_v60 }
 0xc61   :  { %3668 = vmatprep.subr.mxu0 %v6611_v3  ;;  %3739 = vmatprep.subr.mxu1 %v6614_v63 }
 0xc62   :  { %3669 = vmatpush1.msra.mxu0 %v6617_v26  ;;  %3740 = vmatpush1.msra.mxu1 %v6620_v17 }
 0xc63   :  { %3670 = vmatprep.subr.mxu0 %v6623_v28  ;;  %3741 = vmatprep.subr.mxu1 %v6626_v30  ;;  %v7438_v30 = vld [vmem:[#allocation59_spill] sm:$0xff] }
 0xc64   :  { %3671 = vmatpush1.msra.mxu0 %v6629_v31  ;;  %3742 = vmatpush1.msra.mxu1 %v6632_v32 }
 0xc65   :  { %3672 = vmatprep.subr.mxu0 %v6635_v33  ;;  %3743 = vmatprep.subr.mxu1 %v6638_v34 }
 0xc66   :  { %3673 = vmatpush1.msra.mxu0 %v6641_v35  ;;  %3744 = vmatpush1.msra.mxu1 %v6644_v19 }
 0xc67   :  { %3674 = vmatprep.subr.mxu0 %v6647_v9  ;;  %3745 = vmatprep.subr.mxu1 %v6650_v44  ;;  %v6665_v9 = vld [vmem:[#allocation12 + $0x20] sm:$0xff]  ;;  %v6668_v44 = vld [vmem:[#allocation12 + $0x30] sm:$0xff] }
 0xc68   :  { %3675 = vmatpush1.msra.mxu0 %v6653_v58  ;;  %3746 = vmatpush1.msra.mxu1 %v6656_v7  ;;  %7429 = vst [vmem:[#allocation35_spill] sm:$0xff] %v6665_v9  ;;  %7430 = vst [vmem:[#allocation37_spill] sm:$0xff] %v6668_v44  ;;  %v6671_v58 = vld [vmem:[#allocation12 + $0x8] sm:$0xff]  ;;  %v6674_v7 = vld [vmem:[#allocation12 + $0x18] sm:$0xff] }
 0xc69   :  { %3676 = vmatprep.subr.mxu0 %v6659_v24  ;;  %3747 = vmatprep.subr.mxu1 %v6662_v25  ;;  %7431 = vst [vmem:[#allocation38_spill] sm:$0xff] %v6671_v58  ;;  %7432 = vst [vmem:[#allocation36_spill] sm:$0xff] %v6674_v7  ;;  %v6677_v24 = vld [vmem:[#allocation12] sm:$0xff]  ;;  %v6681_v25 = vld [vmem:[#allocation12 + $0x10] sm:$0xff] }
 0xc6a   :  { %3677 = vmatpush1.msra.mxu0 %v6665_v9  ;;  %3748 = vmatpush1.msra.mxu1 %v6668_v44  ;;  %7433 = vst [vmem:[#allocation54_spill] sm:$0xff] %v6677_v24  ;;  %7434 = vst [vmem:[#allocation56_spill] sm:$0xff] %v6681_v25  ;;  %v7436_v9 = vld [vmem:[#allocation62_spill] sm:$0xff] }
 0xc6b   :  { %3678 = vmatprep.subr.mxu0 %v6671_v58  ;;  %3749 = vmatprep.subr.mxu1 %v6674_v7  ;;  %v7435_v58 = vld [vmem:[#allocation61_spill] sm:$0xff]  ;;  %v2565_v19 = vadd.f32 %v7436_v9, %v6236_v62 }
 0xc6c   :  { %3679 = vmatpush1.msra.mxu0 %v6677_v24  ;;  %3712 = vmatprep.mubr.f32.mxu0 %v7405_v45  ;;  %v2563_v44 = vadd.f32 %v7435_v58, %v7409_v20  ;;  %v2676_v58 = vadd.f32 %v7438_v30, %v6253_v13  ;;  %v7441_v30 = vld [vmem:[#allocation32_spill] sm:$0xff] }
 0xc6d   :  { %3750 = vmatpush1.msra.mxu1 %v6681_v25  ;;  %3783 = vmatprep.mubr.f32.mxu1 %v7405_v45 }
 0xc6e   :  { %3818 = vmatprep.subr.mxu0 %v6499_v1  ;;  %3889 = vmatprep.subr.mxu1 %v6502_v38  ;;  %v7437_v1 = vld [vmem:[#allocation64_spill] sm:$0xff] }
 0xc6f   :  { %v2678_v31 = vadd.f32 %v7437_v1, %v7363_v18 }
 0xd0d   :  { %v3544_v7 = vpop.f32.mrf.mxu0  ;;  %v3615_v32 = vpop.f32.mrf.mxu1 }
 0xd0e   :  { %v3545_v24 = vadd.f32 %v3544_v7, %v2563_v44  ;;  %v3616_v20 = vadd.f32 %v3615_v32, %v2676_v58  ;;  %v7442_v32 = vld [vmem:[#allocation46_spill] sm:$0xff]  ;;  %v7444_v58 = vld [vmem:[#allocation49_spill] sm:$0xff] }
 0xd0f   :  { %v3546_v35 = vpop.f32.mrf.mxu0  ;;  %v3617_v45 = vpop.f32.mrf.mxu1 }
 0xd10   :  { %v4309_v34 = vmul.f32 -1.442695, %v3545_v24  ;;  %v3547_v33 = vadd.f32 %v3546_v35, %v2565_v19  ;;  %v3618_v38 = vadd.f32 %v3617_v45, %v2678_v31 }
 0xd12   :  { %4579 = vpow2.f32 %v4309_v34  ;;  %v4310_v25 = vmul.f32 -1.442695, %v3547_v33  ;;  %v4311_v28 = vmul.f32 -1.442695, %v3618_v38 }
 0xd14   :  { %4581 = vpow2.f32 %v4310_v25  ;;  %v7443_v25 = vld [vmem:[#allocation48_spill] sm:$0xff] }
 0xd15   :  { %4583 = vtanh.f32 %v3616_v20 }
 0xd16   :  { %4585 = vpow2.f32 %v4311_v28  ;;  %v7440_v28 = vld [vmem:[#allocation34_spill] sm:$0xff] }
 0xd1f   :  { %v4580_v17 = vpop.eup %4579 }
 0xd20   :  { %v3623_v9 = vadd.f32 1.0, %v4580_v17 }
 0xd21   :  { %v4582_v44 = vpop.eup %4581 }
 0xd22   :  { %4587 = vrcp.f32 %v3623_v9  ;;  %v3629_v34 = vadd.f32 1.0, %v4582_v44  ;;  %v4584_v33 = vpop.eup %4583  ;;  %v7445_v9 = vld [vmem:[#allocation47_spill] sm:$0xff]  ;;  %v7446_v44 = vld [vmem:[#allocation50_spill] sm:$0xff] }
 0xd23   :  { %v4586_v35 = vpop.eup %4585 }
 0xd24   :  { %4589 = vrcp.f32 %v3629_v34  ;;  %v3636_v1 = vadd.f32 1.0, %v4586_v35  ;;  %v7447_v34 = vld [vmem:[#allocation52_spill] sm:$0xff]  ;;  %v7449_v35 = vld [vmem:[#allocation51_spill] sm:$0xff] }
 0xd26   :  { %4591 = vrcp.f32 %v3636_v1  ;;  %v7453_v1 = vld [vmem:[#allocation43_spill] sm:$0xff] }
 0xd2f   :  { %v4588_v19 = vpop.eup %4587 }
 0xd30   :  { %v3640_v7 = vmul.f32 %v4588_v19, %v4584_v33  ;;  %v7448_v33 = vld [vmem:[#allocation53_spill] sm:$0xff]  ;;  %v7450_v19 = vld [vmem:[#allocation22_spill] sm:$0xff] }
 0xd31   :  { %v4590_v24 = vpop.eup %4589 }
 0xd32   :  { %v3639_v45 = vmul.f32 %v4590_v24, %v6514_v21  ;;  %v7439_v21 = vld [vmem:[#allocation73_spill] sm:$0xff] }
 0xd33   :  { %v4592_v38 = vpop.eup %4591  ;;  %v7452_v24 = vld [vmem:[#allocation45_spill] sm:$0xff] }
 0xd34   :  { %v6696_v31 = vadd.f32 %v3640_v7, %v3639_v45  ;;  %v7451_v7 = vld [vmem:[#allocation23_spill] sm:$0xff] }
 0xd35   :  { %v7454_v45 = vld [vmem:[#allocation35_spill] sm:$0xff] }
 0xd36   :  { %4593 = vtanh.f32 %v6696_v31 }
 0xd43   :  { %v4594_v20 = vpop.eup %4593 }
 0xd44   :  { %v3643_v17 = vmul.f32 %v4594_v20, %v4592_v38  ;;  %v7455_v38 = vld [vmem:[#allocation37_spill] sm:$0xff]  ;;  %v7456_v20 = vld [vmem:[#allocation38_spill] sm:$0xff] }
 0xd46   :  { %3713 = vmatmul.mubr.f32.vlgmr.msra.gmra.mxu0 %v3643_v17  ;;  %3784 = vmatmul.mubr.f32.vlgmr.msra.gmra.mxu1 %v3643_v17  ;;  %v7457_v17 = vld [vmem:[#allocation36_spill] sm:$0xff] }
 0xd47   :  { %3819 = vmatpush1.msra.mxu0 %v6415_v52  ;;  %3890 = vmatpush1.msra.mxu1 %v6418_v23 }
 0xd48   :  { %3820 = vmatprep.subr.mxu0 %v6421_v15  ;;  %3891 = vmatprep.subr.mxu1 %v6424_v22 }
 0xd49   :  { %3821 = vmatpush1.msra.mxu0 %v6427_v12  ;;  %3892 = vmatpush1.msra.mxu1 %v6430_v6 }
 0xd4a   :  { %3822 = vmatprep.subr.mxu0 %v6433_v16  ;;  %3893 = vmatprep.subr.mxu1 %v6436_v4 }
 0xd4b   :  { %3823 = vmatpush1.msra.mxu0 %v6439_v5  ;;  %3894 = vmatpush1.msra.mxu1 %v6442_v8 }
 0xd4c   :  { %3824 = vmatprep.subr.mxu0 %v6527_v14  ;;  %3895 = vmatprep.subr.mxu1 %v6530_v10 }
 0xd4d   :  { %3825 = vmatpush1.msra.mxu0 %v6533_v36  ;;  %3896 = vmatpush1.msra.mxu1 %v6536_v37 }
 0xd4e   :  { %3826 = vmatprep.subr.mxu0 %v6539_v39  ;;  %3897 = vmatprep.subr.mxu1 %v6542_v40 }
 0xd4f   :  { %3827 = vmatpush1.msra.mxu0 %v6545_v41  ;;  %3898 = vmatpush1.msra.mxu1 %v6548_v42 }
 0xd50   :  { %3828 = vmatprep.subr.mxu0 %v6551_v43  ;;  %3899 = vmatprep.subr.mxu1 %v6554_v46 }
 0xd51   :  { %3829 = vmatpush1.msra.mxu0 %v6557_v47  ;;  %3900 = vmatpush1.msra.mxu1 %v6560_v27 }
 0xd52   :  { %3830 = vmatprep.subr.mxu0 %v6563_v53  ;;  %3901 = vmatprep.subr.mxu1 %v6566_v50 }
 0xd53   :  { %3831 = vmatpush1.msra.mxu0 %v6569_v2  ;;  %3902 = vmatpush1.msra.mxu1 %v6572_v59 }
 0xd54   :  { %3832 = vmatprep.subr.mxu0 %v6575_v11  ;;  %3903 = vmatprep.subr.mxu1 %v6578_v61 }
 0xd55   :  { %3833 = vmatpush1.msra.mxu0 %v6581_v48  ;;  %3904 = vmatpush1.msra.mxu1 %v6584_v54 }
 0xd56   :  { %3834 = vmatprep.subr.mxu0 %v6587_v49  ;;  %3905 = vmatprep.subr.mxu1 %v6590_v51 }
 0xd57   :  { %3835 = vmatpush1.msra.mxu0 %v6593_v55  ;;  %3906 = vmatpush1.msra.mxu1 %v6596_v29 }
 0xd58   :  { %3836 = vmatprep.subr.mxu0 %v6599_v0  ;;  %3907 = vmatprep.subr.mxu1 %v6602_v57 }
 0xd59   :  { %3837 = vmatpush1.msra.mxu0 %v6605_v56  ;;  %3908 = vmatpush1.msra.mxu1 %v6608_v60 }
 0xd5a   :  { %3838 = vmatprep.subr.mxu0 %v6611_v3  ;;  %3909 = vmatprep.subr.mxu1 %v6614_v63 }
 0xd5b   :  { %3839 = vmatpush1.msra.mxu0 %v6617_v26  ;;  %3910 = vmatpush1.msra.mxu1 %v7439_v21 }
 0xd5c   :  { %3840 = vmatprep.subr.mxu0 %v7440_v28  ;;  %3911 = vmatprep.subr.mxu1 %v7441_v30  ;;  %v7467_v30 = vld [vmem:[#allocation63_spill] sm:$0xff] }
 0xd5d   :  { %3841 = vmatpush1.msra.mxu0 %v7442_v32  ;;  %3912 = vmatpush1.msra.mxu1 %v7443_v25 }
 0xd5e   :  { %3842 = vmatprep.subr.mxu0 %v7444_v58  ;;  %3913 = vmatprep.subr.mxu1 %v7445_v9 }
 0xd5f   :  { %3843 = vmatpush1.msra.mxu0 %v7446_v44  ;;  %3914 = vmatpush1.msra.mxu1 %v7447_v34  ;;  %v7458_v34 = vld [vmem:[#allocation54_spill] sm:$0xff] }
 0xd60   :  { %3844 = vmatprep.subr.mxu0 %v7448_v33  ;;  %3915 = vmatprep.subr.mxu1 %v7449_v35  ;;  %v7459_v33 = vmov 0.0   ;;  %v7460_v35 = vld [vmem:[#allocation56_spill] sm:$0xff] }
 0xd61   :  { %3845 = vmatpush1.msra.mxu0 %v7450_v19  ;;  %3916 = vmatpush1.msra.mxu1 %v7451_v7  ;;  %v7461_v7 = vld [vmem:[#allocation31_spill] sm:$0xff] }
 0xd62   :  { %3846 = vmatprep.subr.mxu0 %v7452_v24  ;;  %3917 = vmatprep.subr.mxu1 %v7453_v1  ;;  %v7462_v24 = vld [vmem:[#allocation33_spill] sm:$0xff]  ;;  %v7463_v1 = vld [vmem:[#allocation68_spill] sm:$0xff] }
 0xd63   :  { %3847 = vmatpush1.msra.mxu0 %v7454_v45  ;;  %3918 = vmatpush1.msra.mxu1 %v7455_v38  ;;  %v7464_v45 = vld [vmem:[#allocation65_spill] sm:$0xff] }
 0xd64   :  { %3848 = vmatprep.subr.mxu0 %v7456_v20  ;;  %3919 = vmatprep.subr.mxu1 %v7457_v17  ;;  %v2569_v19 = vadd.f32 %v7464_v45, %v7463_v1  ;;  %v7465_v20 = vld [vmem:[#allocation70_spill] sm:$0xff]  ;;  %v2682_v45 = vadd.f32 %v7467_v30, %v6253_v13 }
 0xd65   :  { %3849 = vmatpush1.msra.mxu0 %v7458_v34  ;;  %3882 = vmatprep.mubr.f32.mxu0 %v7459_v33  ;;  %v2571_v44 = vadd.f32 %v7465_v20, %v6236_v62 }
 0xd66   :  { %3920 = vmatpush1.msra.mxu1 %v7460_v35  ;;  %3953 = vmatprep.mubr.f32.mxu1 %v7459_v33 }
 0xd67   :  { %3988 = vmatprep.subr.mxu0 %v7461_v7  ;;  %4059 = vmatprep.subr.mxu1 %v7462_v24  ;;  %v7466_v7 = vld [vmem:[#allocation21_spill] sm:$0xff] }
 0xd68   :  { %v2684_v32 = vadd.f32 %v7466_v7, %v7363_v18 }
 0xe06   :  { %v3714_v38 = vpop.f32.mrf.mxu0  ;;  %v3785_v25 = vpop.f32.mrf.mxu1 }
 0xe07   :  { %v3715_v17 = vadd.f32 %v3714_v38, %v2569_v19  ;;  %v3786_v1 = vadd.f32 %v3785_v25, %v2682_v45 }
 0xe08   :  { %v3716_v9 = vpop.f32.mrf.mxu0  ;;  %v3787_v33 = vpop.f32.mrf.mxu1 }
 0xe09   :  { %v4312_v34 = vmul.f32 -1.442695, %v3715_v17  ;;  %v3717_v58 = vadd.f32 %v3716_v9, %v2571_v44  ;;  %v3788_v24 = vadd.f32 %v3787_v33, %v2684_v32 }
 0xe0b   :  { %4595 = vpow2.f32 %v4312_v34  ;;  %v4313_v35 = vmul.f32 -1.442695, %v3717_v58  ;;  %v4314_v28 = vmul.f32 -1.442695, %v3788_v24 }
 0xe0d   :  { %4597 = vpow2.f32 %v4313_v35 }
 0xe0e   :  { %4599 = vtanh.f32 %v3786_v1 }
 0xe0f   :  { %4601 = vpow2.f32 %v4314_v28 }
 0xe18   :  { %v4596_v21 = vpop.eup %4595 }
 0xe19   :  { %v3793_v20 = vadd.f32 1.0, %v4596_v21 }
 0xe1a   :  { %v4598_v19 = vpop.eup %4597 }
 0xe1b   :  { %4603 = vrcp.f32 %v3793_v20  ;;  %v3799_v9 = vadd.f32 1.0, %v4598_v19  ;;  %v4600_v58 = vpop.eup %4599 }
 0xe1c   :  { %v4602_v44 = vpop.eup %4601 }
 0xe1d   :  { %4605 = vrcp.f32 %v3799_v9  ;;  %v3806_v17 = vadd.f32 1.0, %v4602_v44 }
 0xe1f   :  { %4607 = vrcp.f32 %v3806_v17 }
 0xe28   :  { %v4604_v34 = vpop.eup %4603 }
 0xe29   :  { %v3810_v35 = vmul.f32 %v4604_v34, %v4600_v58 }
 0xe2a   :  { %v4606_v38 = vpop.eup %4605 }
 0xe2b   :  { %v3809_v32 = vmul.f32 %v4606_v38, %v6696_v31 }
 0xe2c   :  { %v4608_v21 = vpop.eup %4607 }
 0xe2d   :  { %v6774_v33 = vadd.f32 %v3810_v35, %v3809_v32 }
 0xe2f   :  { %4609 = vtanh.f32 %v6774_v33 }
 0xe3c   :  { %v4610_v30 = vpop.eup %4609 }
 0xe3d   :  { %v3813_v25 = vmul.f32 %v4610_v30, %v4608_v21  ;;  %v4169_v21 = vld [vmem:[#allocation13 + $0x78] sm:$0xff]  ;;  %v4168_v30 = vld [vmem:[#allocation13 + $0x70] sm:$0xff] }
 0xe3f   :  { %3883 = vmatmul.mubr.f32.vlgmr.msra.gmra.mxu0 %v3813_v25  ;;  %3954 = vmatmul.mubr.f32.vlgmr.msra.gmra.mxu1 %v3813_v25  ;;  %v4167_v25 = vld [vmem:[#allocation13 + $0x68] sm:$0xff] }
 0xe40   :  { %3989 = vmatpush1.msra.mxu0 %v6415_v52  ;;  %4060 = vmatpush1.msra.mxu1 %v6418_v23  ;;  %v7468_v52 = vld [vmem:[#allocation73_spill] sm:$0xff]  ;;  %v7469_v23 = vld [vmem:[#allocation34_spill] sm:$0xff] }
 0xe41   :  { %3990 = vmatprep.subr.mxu0 %v6421_v15  ;;  %4061 = vmatprep.subr.mxu1 %v6424_v22  ;;  %v7470_v15 = vld [vmem:[#allocation32_spill] sm:$0xff]  ;;  %v7471_v22 = vld [vmem:[#allocation46_spill] sm:$0xff] }
 0xe42   :  { %3991 = vmatpush1.msra.mxu0 %v6427_v12  ;;  %4062 = vmatpush1.msra.mxu1 %v6430_v6  ;;  %v7472_v12 = vld [vmem:[#allocation48_spill] sm:$0xff]  ;;  %v7473_v6 = vld [vmem:[#allocation49_spill] sm:$0xff] }
 0xe43   :  { %3992 = vmatprep.subr.mxu0 %v6433_v16  ;;  %4063 = vmatprep.subr.mxu1 %v6436_v4  ;;  %v7474_v16 = vld [vmem:[#allocation47_spill] sm:$0xff]  ;;  %v7475_v4 = vld [vmem:[#allocation50_spill] sm:$0xff] }
 0xe44   :  { %3993 = vmatpush1.msra.mxu0 %v6439_v5  ;;  %4064 = vmatpush1.msra.mxu1 %v6442_v8  ;;  %v7476_v5 = vld [vmem:[#allocation52_spill] sm:$0xff]  ;;  %v7477_v8 = vld [vmem:[#allocation53_spill] sm:$0xff] }
 0xe45   :  { %3994 = vmatprep.subr.mxu0 %v6527_v14  ;;  %4065 = vmatprep.subr.mxu1 %v6530_v10  ;;  %v7478_v14 = vld [vmem:[#allocation51_spill] sm:$0xff]  ;;  %v7479_v10 = vld [vmem:[#allocation22_spill] sm:$0xff] }
 0xe46   :  { %3995 = vmatpush1.msra.mxu0 %v6533_v36  ;;  %4066 = vmatpush1.msra.mxu1 %v6536_v37  ;;  %v7480_v36 = vld [vmem:[#allocation23_spill] sm:$0xff]  ;;  %v7481_v37 = vld [vmem:[#allocation45_spill] sm:$0xff] }
 0xe47   :  { %3996 = vmatprep.subr.mxu0 %v6539_v39  ;;  %4067 = vmatprep.subr.mxu1 %v6542_v40  ;;  %v7482_v39 = vld [vmem:[#allocation43_spill] sm:$0xff] }
 0xe48   :  { %3997 = vmatpush1.msra.mxu0 %v6545_v41  ;;  %4068 = vmatpush1.msra.mxu1 %v6548_v42  ;;  %v7483_v40 = vld [vmem:[#allocation35_spill] sm:$0xff]  ;;  %v7484_v41 = vld [vmem:[#allocation37_spill] sm:$0xff]  ;;  %v7485_v42 = vld [vmem:[#allocation38_spill] sm:$0xff] }
 0xe49   :  { %3998 = vmatprep.subr.mxu0 %v6551_v43  ;;  %4069 = vmatprep.subr.mxu1 %v6554_v46  ;;  %v7486_v43 = vld [vmem:[#allocation36_spill] sm:$0xff]  ;;  %v7487_v46 = vld [vmem:[#allocation54_spill] sm:$0xff] }
 0xe4a   :  { %3999 = vmatpush1.msra.mxu0 %v6557_v47  ;;  %4070 = vmatpush1.msra.mxu1 %v6560_v27  ;;  %v7488_v47 = vmov 0.0   ;;  %v7489_v27 = vld [vmem:[#allocation56_spill] sm:$0xff] }
 0xe4b   :  { %4000 = vmatprep.subr.mxu0 %v6563_v53  ;;  %4071 = vmatprep.subr.mxu1 %v6566_v50  ;;  %v7490_v53 = vld [vmem:[#allocation68_spill] sm:$0xff]  ;;  %v7491_v50 = vld [vmem:[#allocation41_spill] sm:$0xff] }
 0xe4c   :  { %4001 = vmatpush1.msra.mxu0 %v6569_v2  ;;  %4072 = vmatpush1.msra.mxu1 %v6572_v59  ;;  %v2575_v2 = vadd.f32 %v7491_v50, %v7490_v53 }
 0xe4d   :  { %4002 = vmatprep.subr.mxu0 %v6575_v11  ;;  %4073 = vmatprep.subr.mxu1 %v6578_v61  ;;  %v7492_v11 = vld [vmem:[#allocation66_spill] sm:$0xff] }
 0xe4e   :  { %4003 = vmatpush1.msra.mxu0 %v6581_v48  ;;  %4074 = vmatpush1.msra.mxu1 %v6584_v54  ;;  %v2577_v61 = vadd.f32 %v7492_v11, %v6236_v62  ;;  %v7497_v11 = vld [vmem:[#allocation72_spill] sm:$0xff] }
 0xe4f   :  { %4004 = vmatprep.subr.mxu0 %v6587_v49  ;;  %4075 = vmatprep.subr.mxu1 %v6590_v51 }
 0xe50   :  { %4005 = vmatpush1.msra.mxu0 %v6593_v55  ;;  %4076 = vmatpush1.msra.mxu1 %v6596_v29 }
 0xe51   :  { %4006 = vmatprep.subr.mxu0 %v6599_v0  ;;  %4077 = vmatprep.subr.mxu1 %v6602_v57  ;;  %v7493_v57 = vld [vmem:[#allocation69_spill] sm:$0xff] }
 0xe52   :  { %4007 = vmatpush1.msra.mxu0 %v6605_v56  ;;  %4078 = vmatpush1.msra.mxu1 %v6608_v60  ;;  %v2690_v56 = vadd.f32 %v7493_v57, %v7363_v18 }
 0xe53   :  { %4008 = vmatprep.subr.mxu0 %v6611_v3  ;;  %4079 = vmatprep.subr.mxu1 %v6614_v63  ;;  %v7494_v3 = vld [vmem:[#allocation44_spill] sm:$0xff] }
 0xe54   :  { %4009 = vmatpush1.msra.mxu0 %v6617_v26  ;;  %4080 = vmatpush1.msra.mxu1 %v7468_v52  ;;  %v2688_v63 = vadd.f32 %v7494_v3, %v6253_v13  ;;  %v4165_v52 = vld [vmem:[#allocation13 + $0x58] sm:$0xff] }
 0xe55   :  { %4010 = vmatprep.subr.mxu0 %v7469_v23  ;;  %4081 = vmatprep.subr.mxu1 %v7470_v15  ;;  %v4164_v23 = vld [vmem:[#allocation13 + $0x50] sm:$0xff]  ;;  %v4163_v15 = vld [vmem:[#allocation13 + $0x48] sm:$0xff] }
 0xe56   :  { %4011 = vmatpush1.msra.mxu0 %v7471_v22  ;;  %4082 = vmatpush1.msra.mxu1 %v7472_v12  ;;  %v4162_v22 = vld [vmem:[#allocation13 + $0x40] sm:$0xff]  ;;  %v4161_v12 = vld [vmem:[#allocation13 + $0x38] sm:$0xff] }
 0xe57   :  { %4012 = vmatprep.subr.mxu0 %v7473_v6  ;;  %4083 = vmatprep.subr.mxu1 %v7474_v16  ;;  %v4160_v6 = vld [vmem:[#allocation13 + $0x30] sm:$0xff]  ;;  %v4159_v16 = vld [vmem:[#allocation13 + $0x28] sm:$0xff] }
 0xe58   :  { %4013 = vmatpush1.msra.mxu0 %v7475_v4  ;;  %4084 = vmatpush1.msra.mxu1 %v7476_v5  ;;  %v4158_v4 = vld [vmem:[#allocation13 + $0x20] sm:$0xff]  ;;  %v4157_v5 = vld [vmem:[#allocation13 + $0x18] sm:$0xff] }
 0xe59   :  { %4014 = vmatprep.subr.mxu0 %v7477_v8  ;;  %4085 = vmatprep.subr.mxu1 %v7478_v14  ;;  %v4156_v8 = vld [vmem:[#allocation13 + $0x10] sm:$0xff]  ;;  %v4155_v14 = vld [vmem:[#allocation13 + $0x8] sm:$0xff] }
 0xe5a   :  { %4015 = vmatpush1.msra.mxu0 %v7479_v10  ;;  %4086 = vmatpush1.msra.mxu1 %v7480_v36  ;;  %v4154_v10 = vld [vmem:[#allocation13] sm:$0xff]  ;;  %v7495_v36 = vld [vmem:[#allocation67_spill] sm:$0xff] }
 0xe5b   :  { %4016 = vmatprep.subr.mxu0 %v7481_v37  ;;  %4087 = vmatprep.subr.mxu1 %v7482_v39  ;;  %v2581_v37 = vadd.f32 %v7495_v36, %v7490_v53 }
 0xe5c   :  { %4017 = vmatpush1.msra.mxu0 %v7483_v40  ;;  %4088 = vmatpush1.msra.mxu1 %v7484_v41  ;;  %v7496_v40 = vld [vmem:[#allocation71_spill] sm:$0xff] }
 0xe5d   :  { %4018 = vmatprep.subr.mxu0 %v7485_v42  ;;  %4089 = vmatprep.subr.mxu1 %v7486_v43  ;;  %v2583_v41 = vadd.f32 %v7496_v40, %v6236_v62 }
 0xe5e   :  { %4019 = vmatpush1.msra.mxu0 %v7487_v46  ;;  %4052 = vmatprep.mubr.f32.mxu0 %v7488_v47 }
 0xe5f   :  { %4090 = vmatpush1.msra.mxu1 %v7489_v27  ;;  %4123 = vmatprep.mubr.f32.mxu1 %v7488_v47 }
 0xe60   :  { %4339 = vmatprep.subr.mxu0 %v7488_v47 }
 0xeff   :  { %v3884_v59 = vpop.f32.mrf.mxu0  ;;  %v3955_v55 = vpop.f32.mrf.mxu1 }
 0xf00   :  { %v3885_v48 = vadd.f32 %v3884_v59, %v2575_v2  ;;  %v3956_v26 = vadd.f32 %v3955_v55, %v2688_v63 }
 0xf01   :  { %v3886_v54 = vpop.f32.mrf.mxu0  ;;  %v3957_v0 = vpop.f32.mrf.mxu1 }
 0xf02   :  { %v4315_v49 = vmul.f32 -1.442695, %v3885_v48  ;;  %v3887_v51 = vadd.f32 %v3886_v54, %v2577_v61  ;;  %v3958_v60 = vadd.f32 %v3957_v0, %v2690_v56  ;;  %v7498_v48 = vld [vmem:[#allocation42_spill] sm:$0xff] }
 0xf03   :  { %v2694_v53 = vadd.f32 %v7498_v48, %v6253_v13 }
 0xf04   :  { %4611 = vpow2.f32 %v4315_v49  ;;  %v4316_v29 = vmul.f32 -1.442695, %v3887_v51  ;;  %v4317_v31 = vmul.f32 -1.442695, %v3958_v60 }
 0xf06   :  { %4613 = vpow2.f32 %v4316_v29 }
 0xf07   :  { %4615 = vtanh.f32 %v3956_v26 }
 0xf08   :  { %4617 = vpow2.f32 %v4317_v31 }
 0xf11   :  { %v4612_v28 = vpop.eup %4611 }
 0xf12   :  { %v3963_v1 = vadd.f32 1.0, %v4612_v28 }
 0xf13   :  { %v4614_v7 = vpop.eup %4613 }
 0xf14   :  { %4619 = vrcp.f32 %v3963_v1  ;;  %v3969_v24 = vadd.f32 1.0, %v4614_v7  ;;  %v4616_v45 = vpop.eup %4615  ;;  %v4321_v1 = vld [vmem:[%s6893_s8] ss:$0 sm:$0xff] }
 0xf15   :  { %v4618_v20 = vpop.eup %4617 }
 0xf16   :  { %4621 = vrcp.f32 %v3969_v24  ;;  %v3976_v44 = vadd.f32 1.0, %v4618_v20 }
 0xf18   :  { %4623 = vrcp.f32 %v3976_v44 }
 0xf21   :  { %v4620_v19 = vpop.eup %4619 }
 0xf22   :  { %v3980_v9 = vmul.f32 %v4620_v19, %v4616_v45 }
 0xf23   :  { %v4622_v58 = vpop.eup %4621 }
 0xf24   :  { %v3979_v34 = vmul.f32 %v4622_v58, %v6774_v33  ;;  %v4166_v33 = vld [vmem:[#allocation13 + $0x60] sm:$0xff] }
 0xf25   :  { %v4624_v38 = vpop.eup %4623 }
 0xf26   :  { %v6851_v35 = vadd.f32 %v3980_v9, %v3979_v34 }
 0xf28   :  { %4625 = vtanh.f32 %v6851_v35 }
 0xf35   :  { %v4626_v17 = vpop.eup %4625 }
 0xf36   :  { %v3983_v32 = vmul.f32 %v4626_v17, %v4624_v38 }
 0xf38   :  { %4053 = vmatmul.mubr.f32.vlgmr.msra.gmra.mxu0 %v3983_v32  ;;  %4124 = vmatmul.mubr.f32.vlgmr.msra.gmra.mxu1 %v3983_v32 }
 0xf39   :  { %4340 = vmatpush3.msra.mxu0 %v4169_v21  ;;  %4371 = vmatprep.mubr.msk.f32.mxu0 %vm4868_vm0, %v7488_v47 }
 0xf3a   :  { %4341 = vmatprep.subr.mxu0 %v7488_v47 }
 0xf3b   :  { %4342 = vmatpush3.msra.mxu0 %v4168_v30 }
 0xf3c   :  { %4343 = vmatprep.subr.mxu0 %v7488_v47 }
 0xf3d   :  { %4344 = vmatpush3.msra.mxu0 %v4167_v25 }
 0xf3e   :  { %4345 = vmatprep.subr.mxu0 %v7488_v47 }
 0xf3f   :  { %4346 = vmatpush3.msra.mxu0 %v4166_v33 }
 0xf40   :  { %4347 = vmatprep.subr.mxu0 %v7488_v47 }
 0xf41   :  { %4348 = vmatpush3.msra.mxu0 %v4165_v52 }
 0xf42   :  { %4349 = vmatprep.subr.mxu0 %v7488_v47 }
 0xf43   :  { %4350 = vmatpush3.msra.mxu0 %v4164_v23 }
 0xf44   :  { %4351 = vmatprep.subr.mxu0 %v7488_v47 }
 0xf45   :  { %4352 = vmatpush3.msra.mxu0 %v4163_v15 }
 0xf46   :  { %4353 = vmatprep.subr.mxu0 %v7488_v47 }
 0xf47   :  { %4354 = vmatpush3.msra.mxu0 %v4162_v22 }
 0xf48   :  { %4355 = vmatprep.subr.mxu0 %v7488_v47 }
 0xf49   :  { %4356 = vmatpush3.msra.mxu0 %v4161_v12 }
 0xf4a   :  { %4357 = vmatprep.subr.mxu0 %v7488_v47 }
 0xf4b   :  { %4358 = vmatpush3.msra.mxu0 %v4160_v6 }
 0xf4c   :  { %4359 = vmatprep.subr.mxu0 %v7488_v47 }
 0xf4d   :  { %4360 = vmatpush3.msra.mxu0 %v4159_v16 }
 0xf4e   :  { %4361 = vmatprep.subr.mxu0 %v7488_v47 }
 0xf4f   :  { %4362 = vmatpush3.msra.mxu0 %v4158_v4 }
 0xf50   :  { %4363 = vmatprep.subr.mxu0 %v7488_v47 }
 0xf51   :  { %4364 = vmatpush3.msra.mxu0 %v4157_v5 }
 0xf52   :  { %4365 = vmatprep.subr.mxu0 %v7488_v47 }
 0xf53   :  { %4366 = vmatpush3.msra.mxu0 %v4156_v8 }
 0xf54   :  { %4367 = vmatprep.subr.mxu0 %v7488_v47 }
 0xf55   :  { %4368 = vmatpush3.msra.mxu0 %v4155_v14 }
 0xf56   :  { %4369 = vmatprep.subr.mxu0 %v7488_v47  ;;  %v2696_v47 = vadd.f32 %v7497_v11, %v7363_v18 }
 0xf57   :  { %4370 = vmatpush3.msra.mxu0 %v4154_v10 }
 0xff8   :  { %v4054_v39 = vpop.f32.mrf.mxu0  ;;  %v4125_v50 = vpop.f32.mrf.mxu1 }
 0xff9   :  { %v4055_v42 = vadd.f32 %v4054_v39, %v2581_v37  ;;  %v4126_v54 = vadd.f32 %v4125_v50, %v2694_v53 }
 0xffa   :  { %v4056_v43 = vpop.f32.mrf.mxu0  ;;  %v4127_v59 = vpop.f32.mrf.mxu1 }
 0xffb   :  { %v4318_v46 = vmul.f32 -1.442695, %v4055_v42  ;;  %v4057_v27 = vadd.f32 %v4056_v43, %v2583_v41  ;;  %v4128_v61 = vadd.f32 %v4127_v59, %v2696_v47 }
 0xffd   :  { %4627 = vpow2.f32 %v4318_v46  ;;  %v4319_v2 = vmul.f32 -1.442695, %v4057_v27  ;;  %v4320_v49 = vmul.f32 -1.442695, %v4128_v61 }
 0xfff   :  { %4629 = vpow2.f32 %v4319_v2 }
0x1000   :  { %4631 = vtanh.f32 %v4126_v54 }
0x1001   :  { %4633 = vpow2.f32 %v4320_v49 }
0x100a   :  { %v4628_v51 = vpop.eup %4627 }
0x100b   :  { %v4133_v62 = vadd.f32 1.0, %v4628_v51 }
0x100c   :  { %v4630_v55 = vpop.eup %4629 }
0x100d   :  { %4635 = vrcp.f32 %v4133_v62  ;;  %v4139_v29 = vadd.f32 1.0, %v4630_v55  ;;  %v4632_v0 = vpop.eup %4631 }
0x100e   :  { %v4634_v57 = vpop.eup %4633 }
0x100f   :  { %4637 = vrcp.f32 %v4139_v29  ;;  %v4146_v18 = vadd.f32 1.0, %v4634_v57 }
0x1011   :  { %4639 = vrcp.f32 %v4146_v18 }
0x101a   :  { %v4636_v56 = vpop.eup %4635 }
0x101b   :  { %v4150_v60 = vmul.f32 %v4636_v56, %v4632_v0 }
0x101c   :  { %v4638_v3 = vpop.eup %4637 }
0x101d   :  { %v4149_v63 = vmul.f32 %v4638_v3, %v6851_v35 }
0x101e   :  { %v4640_v13 = vpop.eup %4639 }
0x101f   :  { %v4151_v26 = vadd.f32 %v4150_v60, %v4149_v63 }
0x1021   :  { %4641 = vtanh.f32 %v4151_v26 }
0x102e   :  { %v4642_v31 = vpop.eup %4641 }
0x102f   :  { %v4153_v28 = vmul.f32 %v4642_v31, %v4640_v13 }
0x1031   :  { %4372 = vmatmul.mubr.f32.vlgmr.msra.gmra.mxu0 %v4153_v28 }
0x10f1   :  { %v4243_v7 = vpop.f32.mrf.mxu0 }
0x10f2   :  { %v4244_v24 = vadd.f32 %v4321_v1, %v4243_v7 }
0x10f3   :  { %v4373_v45 = vpop.f32.mrf.mxu0 }
0x10f4   :  { %4247 = vst [vmem:[#allocation15] sm:$0xff] %v4244_v24 }
0x10f5   :  { %4838 = shalt.err (!%p4835_p6)
}
0x10f6   :  { %4257 = dma.vmem_to_hbm [thread:$0]  %s4255_s21, 128, %s6894_s9, [#allocation6]  }
0x10f7   :  { %4855 = dma.done.wait [#allocation6], 128  }
0x10f8   :  { %4856 = vsyncadd [#allocation6], 4294967168 }
0x10f9   :  { %4261 = vsyncpa [#allocation5], 1 }
0x10fa   :  { %4262 = vsyncpa [#allocation8], 1 }
0x10fb   :  { %4263 = vsyncpa [#allocation11], 1 }
0x10fc   :  { %4264 = vsyncpa [#allocation14], 1 }
0x10fd   :  { %4265 = vsyncpa [#allocation6], 1 }

</bundles_post_ra>
